<compile_context>
chip_gen: v6e
topology: v6e:2x2x1
jax: 0.10.0
libtpu: 0.0.40
codegen_flags: <defaults>
</compile_context>

<pallas_src>
import functools

import jax
import jax.numpy as jnp
from jax.experimental import pallas as pl
from jax.experimental.pallas import tpu as pltpu

EPS = 1e-5


def ln_linear_kernel(x_ref, gamma_ref, beta_ref, w_ref, bias_ref, o_ref):
    # x_ref:     (R, C)   f32   all rows, full feature dim (grid-invariant)
    # gamma_ref: (1, C)   f32
    # beta_ref:  (1, C)   f32
    # w_ref:     (C, TN)  bf16  tile of the pre-transposed linear weight
    # bias_ref:  (1, TN)  f32
    # o_ref:     (R, TN)
    x = x_ref[...]

    # LayerNorm over the last dim (C = 384), stats in f32
    # (matches torch.nn.LayerNorm((384,), eps=1e-5)).
    mean = jnp.mean(x, axis=-1, keepdims=True)
    centered = x - mean
    var = jnp.mean(centered * centered, axis=-1, keepdims=True)
    inv = jax.lax.rsqrt(var + EPS)                       # EUP rsqrt
    y = (centered * inv) * gamma_ref[...] + beta_ref[...]

    # Linear: y @ W^T + b, MXU in bf16 with f32 accumulation.
    out = jnp.dot(y.astype(jnp.bfloat16), w_ref[...],
                  preferred_element_type=jnp.float32)
    o_ref[...] = (out + bias_ref[...]).astype(o_ref.dtype)


def prepare_params(gamma, beta, weight, bias):
    """One-time parameter preparation (hoisted out of the per-call path).

    weight comes in torch Linear layout (N, C); cached as (C, N) bf16 so the
    per-call path never pays the transpose+cast HBM traffic again.
    """
    N, C = weight.shape
    return {
        "gamma": jnp.asarray(gamma).reshape(1, C).astype(jnp.float32),
        "beta": jnp.asarray(beta).reshape(1, C).astype(jnp.float32),
        "wt": jnp.asarray(weight).T.astype(jnp.bfloat16),     # (C, N)
        "bias": jnp.asarray(bias).reshape(1, N).astype(jnp.float32),
    }


def default_tn():
    """Per-generation output tile: 2 steps/core on v7x, 2 total steps else."""
    try:
        kind = jax.devices()[0].device_kind.lower()
    except Exception:
        kind = ""
    return 384 if "v7" in kind else 768


@functools.partial(jax.jit, static_argnames=("tn", "out_dtype"))
def layernorm_linear(x, params, *, tn=768, out_dtype=jnp.float32):
    """x: (B, H, W, C); params from prepare_params(). Returns (B, H, W, N)."""
    B, H, W, C = x.shape
    wt = params["wt"]
    N = wt.shape[1]
    R = B * H * W
    assert N % tn == 0

    x2 = x.reshape(R, C).astype(jnp.float32)     # metadata-only for f32 input

    out_bytes = R * N * jnp.dtype(out_dtype).itemsize
    cost = pl.CostEstimate(
        flops=2 * R * C * N,
        transcendentals=R,                       # one rsqrt per row
        bytes_accessed=R * C * 4 + C * N * 2 + (2 * C + N) * 4 + out_bytes,
    )

    out = pl.pallas_call(
        ln_linear_kernel,
        out_shape=jax.ShapeDtypeStruct((R, N), out_dtype),
        grid_spec=pltpu.PrefetchScalarGridSpec(
            num_scalar_prefetch=0,
            grid=(N // tn,),
            in_specs=[
                pl.BlockSpec((R, C), lambda j: (0, 0)),   # x (all rows, invariant)
                pl.BlockSpec((1, C), lambda j: (0, 0)),   # gamma
                pl.BlockSpec((1, C), lambda j: (0, 0)),   # beta
                pl.BlockSpec((C, tn), lambda j: (0, j)),  # W^T tile (bf16)
                pl.BlockSpec((1, tn), lambda j: (0, j)),  # bias tile
            ],
            out_specs=pl.BlockSpec((R, tn), lambda j: (0, j)),
        ),
        compiler_params=pltpu.CompilerParams(
            dimension_semantics=("parallel",)),
        cost_estimate=cost,
    )(x2, params["gamma"], params["beta"], wt, params["bias"])

    return out.reshape(B, H, W, N)               # 196 = 14*14 -> metadata only


def reference(x, gamma, beta, weight, bias):
    mean = jnp.mean(x, axis=-1, keepdims=True)
    var = jnp.mean((x - mean) ** 2, axis=-1, keepdims=True)
    xn = (x - mean) * jax.lax.rsqrt(var + EPS)
    y = xn * gamma + beta
    return jnp.einsum("bhwc,nc->bhwn", y, weight) + bias


if __name__ == "__main__":
    key = jax.random.PRNGKey(0)
    kx, kg, kb, kw, kbias = jax.random.split(key, 5)

    B, H, W, C, N = 1, 14, 14, 384, 1536

    x = jax.random.normal(kx, (B, H, W, C), dtype=jnp.float32)
    gamma = jax.random.normal(kg, (C,), dtype=jnp.float32) * 0.1 + 1.0
    beta = jax.random.normal(kb, (C,), dtype=jnp.float32) * 0.1
    weight = jax.random.normal(kw, (N, C), dtype=jnp.float32) * (1.0 / C ** 0.5)
    bias = jax.random.normal(kbias, (N,), dtype=jnp.float32) * 0.1

    params = prepare_params(gamma, beta, weight, bias)   # one-time transform
    out = layernorm_linear(x, params, tn=default_tn())
    out = jax.block_until_ready(out)

    ref = reference(x, gamma, beta, weight, bias)
    assert out.shape == (B, H, W, N), out.shape
    # Tolerance loosened vs the f32 reference because the matmul operands are
    # bf16 (MXU-native path); LN statistics remain f32.
    assert jnp.allclose(out, ref, atol=3e-2, rtol=3e-2), float(
        jnp.max(jnp.abs(out - ref)))

    print("KERNEL_OK")
</pallas_src>

<mosaic_0001>
module attributes {stable_mosaic.version = 11 : i64} {
  func.func @ln_linear_kernel(%arg0: i32, %arg1: memref<196x384xf32, #tpu.memory_space<vmem>>, %arg2: memref<1x384xf32, #tpu.memory_space<vmem>>, %arg3: memref<1x384xf32, #tpu.memory_space<vmem>>, %arg4: memref<384x768xbf16, #tpu.memory_space<vmem>>, %arg5: memref<1x768xf32, #tpu.memory_space<vmem>>, %arg6: memref<196x768xf32, #tpu.memory_space<vmem>>) attributes {dimension_semantics = [#tpu.dimension_semantics<parallel>], iteration_bounds = array<i64: 2>, scalar_prefetch = 0 : i64, scratch_operands = 0 : i64, tpu.core_type = #tpu.core_type<tc>, window_params = [{pipeline_mode = #tpu.pipeline_mode<synchronous>, transform_indices = @transform_0, window_bounds = array<i64: 196, 384>}, {pipeline_mode = #tpu.pipeline_mode<synchronous>, transform_indices = @transform_1, window_bounds = array<i64: 1, 384>}, {pipeline_mode = #tpu.pipeline_mode<synchronous>, transform_indices = @transform_2, window_bounds = array<i64: 1, 384>}, {transform_indices = @transform_3, window_bounds = array<i64: 384, 768>}, {transform_indices = @transform_4, window_bounds = array<i64: 1, 768>}, {transform_indices = @transform_5, window_bounds = array<i64: 196, 768>}]} {
    %c0 = arith.constant 0 : index
    %c0_0 = arith.constant 0 : index
    %0 = vector.load %arg1[%c0, %c0_0] : memref<196x384xf32, #tpu.memory_space<vmem>>, vector<196x384xf32>
    %cst = arith.constant dense<0.000000e+00> : vector<196xf32>
    %1 = vector.multi_reduction <add>, %0, %cst [1] : vector<196x384xf32> to vector<196xf32>
    %2 = vector.shape_cast %1 : vector<196xf32> to vector<196x1xf32>
    %cst_1 = arith.constant 3.840000e+02 : f32
    %3 = vector.broadcast %cst_1 : f32 to vector<196x1xf32>
    %4 = arith.divf %2, %3 : vector<196x1xf32>
    %5 = vector.broadcast %4 : vector<196x1xf32> to vector<196x384xf32>
    %6 = arith.subf %0, %5 : vector<196x384xf32>
    %7 = arith.mulf %6, %6 : vector<196x384xf32>
    %cst_2 = arith.constant dense<0.000000e+00> : vector<196xf32>
    %8 = vector.multi_reduction <add>, %7, %cst_2 [1] : vector<196x384xf32> to vector<196xf32>
    %9 = vector.shape_cast %8 : vector<196xf32> to vector<196x1xf32>
    %cst_3 = arith.constant 3.840000e+02 : f32
    %10 = vector.broadcast %cst_3 : f32 to vector<196x1xf32>
    %11 = arith.divf %9, %10 : vector<196x1xf32>
    %cst_4 = arith.constant 9.99999974E-6 : f32
    %12 = vector.broadcast %cst_4 : f32 to vector<196x1xf32>
    %13 = arith.addf %11, %12 : vector<196x1xf32>
    %14 = math.rsqrt %13 : vector<196x1xf32>
    %15 = vector.broadcast %14 : vector<196x1xf32> to vector<196x384xf32>
    %16 = arith.mulf %6, %15 : vector<196x384xf32>
    %c0_5 = arith.constant 0 : index
    %c0_6 = arith.constant 0 : index
    %17 = vector.load %arg2[%c0_5, %c0_6] : memref<1x384xf32, #tpu.memory_space<vmem>>, vector<1x384xf32>
    %18 = vector.broadcast %17 : vector<1x384xf32> to vector<196x384xf32>
    %19 = arith.mulf %16, %18 : vector<196x384xf32>
    %c0_7 = arith.constant 0 : index
    %c0_8 = arith.constant 0 : index
    %20 = vector.load %arg3[%c0_7, %c0_8] : memref<1x384xf32, #tpu.memory_space<vmem>>, vector<1x384xf32>
    %21 = vector.broadcast %20 : vector<1x384xf32> to vector<196x384xf32>
    %22 = arith.addf %19, %21 : vector<196x384xf32>
    %23 = arith.truncf %22 : vector<196x384xf32> to vector<196x384xbf16>
    %c0_9 = arith.constant 0 : index
    %c0_10 = arith.constant 0 : index
    %24 = vector.load %arg4[%c0_9, %c0_10] : memref<384x768xbf16, #tpu.memory_space<vmem>>, vector<384x768xbf16>
    %cst_11 = arith.constant dense<0.000000e+00> : vector<196x768xf32>
    %25 = tpu.matmul %23, %24, %cst_11 {dimension_numbers = #tpu.dot_dimension_numbers<[1], [0], [0], [1], [0, 0, 1, 1], [], []>} : vector<196x384xbf16>, vector<384x768xbf16>, vector<196x768xf32> -> vector<196x768xf32>
    %c0_12 = arith.constant 0 : index
    %c0_13 = arith.constant 0 : index
    %26 = vector.load %arg5[%c0_12, %c0_13] : memref<1x768xf32, #tpu.memory_space<vmem>>, vector<1x768xf32>
    %27 = vector.broadcast %26 : vector<1x768xf32> to vector<196x768xf32>
    %28 = arith.addf %25, %27 : vector<196x768xf32>
    %c0_14 = arith.constant 0 : index
    %c0_15 = arith.constant 0 : index
    %29 = vector.load %arg6[%c0_14, %c0_15] : memref<196x768xf32, #tpu.memory_space<vmem>>, vector<196x768xf32>
    tpu.vector_store %arg6[%c0_14, %c0_15], %28 {strides = array<i32>} : memref<196x768xf32, #tpu.memory_space<vmem>>, vector<196x768xf32>,
    return
  }
  func.func @transform_0(%arg0: i32) -> (i32, i32) {
    %c0_i32 = arith.constant 0 : i32
    %c0_i32_0 = arith.constant 0 : i32
    %c0_i32_1 = arith.constant 0 : i32
    return %c0_i32, %c0_i32_0 : i32, i32
  }
  func.func @transform_1(%arg0: i32) -> (i32, i32) {
    %c0_i32 = arith.constant 0 : i32
    %c0_i32_0 = arith.constant 0 : i32
    %c0_i32_1 = arith.constant 0 : i32
    return %c0_i32, %c0_i32_0 : i32, i32
  }
  func.func @transform_2(%arg0: i32) -> (i32, i32) {
    %c0_i32 = arith.constant 0 : i32
    %c0_i32_0 = arith.constant 0 : i32
    %c0_i32_1 = arith.constant 0 : i32
    return %c0_i32, %c0_i32_0 : i32, i32
  }
  func.func @transform_3(%arg0: i32) -> (i32, i32) {
    %c0_i32 = arith.constant 0 : i32
    %c0_i32_0 = arith.constant 0 : i32
    return %c0_i32, %arg0 : i32, i32
  }
  func.func @transform_4(%arg0: i32) -> (i32, i32) {
    %c0_i32 = arith.constant 0 : i32
    %c0_i32_0 = arith.constant 0 : i32
    return %c0_i32, %arg0 : i32, i32
  }
  func.func @transform_5(%arg0: i32) -> (i32, i32) {
    %c0_i32 = arith.constant 0 : i32
    %c0_i32_0 = arith.constant 0 : i32
    return %c0_i32, %arg0 : i32, i32
  }
}

</mosaic_0001>

<bundles_post_ra>
// kernel: layernorm_linear.1
= control target key start
LH: loop header
LB: loop body
LE: loop exit
PB: predicated region body
PF: predicated region fallthrough
CT: control target
= control target key end

     0   :  { %s4301_s18 = smov 0   ;;  %s4303_s19 = smov 0   ;;  %s6869_s0 = inlined_call_operand.vmem [shape: f32[196,384], index: 0, kind: input, shape index: {}]   ;;  %s6870_s1 = inlined_call_operand.vmem [shape: f32[1,384], index: 1, kind: input, shape index: {}]   ;;  %s6871_s2 = inlined_call_operand.vmem [shape: f32[1,384], index: 2, kind: input, shape index: {}]   ;;  %s6872_s3 = inlined_call_operand.vmem [shape: bf16[384,1536], index: 3, kind: input, shape index: {}]   ;;  %s6873_s4 = inlined_call_operand.vmem [shape: f32[1,1536], index: 4, kind: input, shape index: {}]   ;;  %s6874_s5 = inlined_call_operand.vmem [shape: f32[196,1536], index: 5, kind: output, shape index: {}]  }
   0x1   :  { %s4305_s20 = smov 0  }
   0x2 LB: > { %s4317_s21 = sadd.s32 4294967295, %s4268_s20   ;;  %s4320_s22 = sadd.s32 1, %s4268_s20   ;;  %s4268_s20 = sphi %s4305_s20, %s7147_s20   ;;  %s4264_s19 = sphi %s4303_s19, %s7146_s19   ;;  %s4260_s18 = sphi %s4301_s18, %s7145_s18  }
   0x3   : > { %s82_s23 = ssub.s32 %s4268_s20, %s4320_s22  ;;  %s85_s24 = sadd.s32 1, %s4264_s19 }
   0x4   : > { %p83_p0 = scmp.eq.s32.totalorder %s82_s23, 0  ;;  %p92_p1 = scmp.ne.s32.totalorder %s4264_s19, %s4260_s18 }
   0x5   : > { %p93_p2 = scmp.eq.s32.totalorder %s4268_s20, 0  ;;  %p148_p3 = scmp.eq.s32.totalorder %s4317_s21, 1 }
   0x6   : > { %s4330_s25 = scalar_select %p83_p0, %s4264_s19, %s85_s24  }
   0x7   : > { %p94_p4 = por %p93_p2, %p92_p1  ;;  %p4332_p5 = por %p148_p3, %p92_p1 }
   0x8   : > { %p3783_p6 = scmp.ge.s32.totalorder %s4268_s20, 2 }
   0xa   : > { %179 = sbr.rel (%p3783_p6) target bundleno = 92 (0x5c), region = 28 }
   0xf   : > { %182 = sbr.rel (!%p94_p4) target bundleno = 92 (0x5c), region = 32  ;;  %s184_s27 = sand.u32 (%p94_p4), 1, %s4264_s19  }
  0x10   : > { %s3933_s28 = smul.u32 (%p94_p4), 24, %s4268_s20 }
  0x11   : > { %s3951_s29 = smul.u32 (%p94_p4), 1152, %s184_s27 }
  0x12   : > { %s4342_s7 = scalar_lea.vmem (%p94_p4), %s6872_s3, %s3933_s28 }
  0x13   : > { %v202_v0 = vld [vmem:[%s4342_s7] sm:$0xff] (%p94_p4)  ;;  %v204_v1 = vld [vmem:[%s4342_s7 + $0x8] sm:$0xff] (%p94_p4)  ;;  %v206_v2 = vld [vmem:[%s4342_s7 + $0x10] sm:$0xff] (%p94_p4)  ;;  %s4347_s8 = scalar_lea.vmem (%p94_p4), [#allocation2], %s3951_s29 }
  0x14   : > { %203 = vst [vmem:[%s4347_s8] sm:$0xff] %v202_v0  ;;  %205 = vst [vmem:[%s4347_s8 + $0x8] sm:$0xff] %v204_v1  ;;  %v208_v3 = vld [vmem:[%s4342_s7 + $0x30] sm:$0xff]  ;;  %v210_v4 = vld [vmem:[%s4342_s7 + $0x38] sm:$0xff] }
  0x15   : > { %207 = vst [vmem:[%s4347_s8 + $0x10] sm:$0xff] %v206_v2  ;;  %v212_v5 = vld [vmem:[%s4342_s7 + $0x40] sm:$0xff]  ;;  %209 = vst [vmem:[%s4347_s8 + $0x18] sm:$0xff] %v208_v3  ;;  %v216_v7 = vld [vmem:[%s4342_s7 + $0x68] sm:$0xff] }
  0x16   : > { %211 = vst [vmem:[%s4347_s8 + $0x20] sm:$0xff] %v210_v4  ;;  %213 = vst [vmem:[%s4347_s8 + $0x28] sm:$0xff] %v212_v5  ;;  %v214_v6 = vld [vmem:[%s4342_s7 + $0x60] sm:$0xff]  ;;  %v218_v8 = vld [vmem:[%s4342_s7 + $0x70] sm:$0xff] }
  0x17   : > { %215 = vst [vmem:[%s4347_s8 + $0x30] sm:$0xff] %v214_v6  ;;  %217 = vst [vmem:[%s4347_s8 + $0x38] sm:$0xff] %v216_v7  ;;  %v220_v9 = vld [vmem:[%s4342_s7 + $0x90] sm:$0xff]  ;;  %v222_v10 = vld [vmem:[%s4342_s7 + $0x98] sm:$0xff] }
  0x18   : > { %219 = vst [vmem:[%s4347_s8 + $0x40] sm:$0xff] %v218_v8  ;;  %v224_v11 = vld [vmem:[%s4342_s7 + $0xa0] sm:$0xff]  ;;  %221 = vst [vmem:[%s4347_s8 + $0x48] sm:$0xff] %v220_v9  ;;  %v228_v13 = vld [vmem:[%s4342_s7 + $0xc8] sm:$0xff] }
  0x19   : > { %223 = vst [vmem:[%s4347_s8 + $0x50] sm:$0xff] %v222_v10  ;;  %225 = vst [vmem:[%s4347_s8 + $0x58] sm:$0xff] %v224_v11  ;;  %v226_v12 = vld [vmem:[%s4342_s7 + $0xc0] sm:$0xff]  ;;  %v230_v14 = vld [vmem:[%s4342_s7 + $0xd0] sm:$0xff] }
  0x1a   : > { %227 = vst [vmem:[%s4347_s8 + $0x60] sm:$0xff] %v226_v12  ;;  %229 = vst [vmem:[%s4347_s8 + $0x68] sm:$0xff] %v228_v13  ;;  %v232_v15 = vld [vmem:[%s4342_s7 + $0xf0] sm:$0xff]  ;;  %v234_v16 = vld [vmem:[%s4342_s7 + $0xf8] sm:$0xff] }
  0x1b   : > { %231 = vst [vmem:[%s4347_s8 + $0x70] sm:$0xff] %v230_v14  ;;  %v236_v17 = vld [vmem:[%s4342_s7 + $0x100] sm:$0xff]  ;;  %233 = vst [vmem:[%s4347_s8 + $0x78] sm:$0xff] %v232_v15  ;;  %v240_v19 = vld [vmem:[%s4342_s7 + $0x128] sm:$0xff] }
  0x1c   : > { %235 = vst [vmem:[%s4347_s8 + $0x80] sm:$0xff] %v234_v16  ;;  %237 = vst [vmem:[%s4347_s8 + $0x88] sm:$0xff] %v236_v17  ;;  %v238_v18 = vld [vmem:[%s4342_s7 + $0x120] sm:$0xff]  ;;  %v242_v20 = vld [vmem:[%s4342_s7 + $0x130] sm:$0xff] }
  0x1d   : > { %239 = vst [vmem:[%s4347_s8 + $0x90] sm:$0xff] %v238_v18  ;;  %241 = vst [vmem:[%s4347_s8 + $0x98] sm:$0xff] %v240_v19  ;;  %v244_v21 = vld [vmem:[%s4342_s7 + $0x150] sm:$0xff]  ;;  %v246_v22 = vld [vmem:[%s4342_s7 + $0x158] sm:$0xff] }
  0x1e   : > { %243 = vst [vmem:[%s4347_s8 + $0xa0] sm:$0xff] %v242_v20  ;;  %v248_v23 = vld [vmem:[%s4342_s7 + $0x160] sm:$0xff]  ;;  %245 = vst [vmem:[%s4347_s8 + $0xa8] sm:$0xff] %v244_v21  ;;  %v252_v25 = vld [vmem:[%s4342_s7 + $0x188] sm:$0xff] }
  0x1f   : > { %247 = vst [vmem:[%s4347_s8 + $0xb0] sm:$0xff] %v246_v22  ;;  %249 = vst [vmem:[%s4347_s8 + $0xb8] sm:$0xff] %v248_v23  ;;  %v250_v24 = vld [vmem:[%s4342_s7 + $0x180] sm:$0xff]  ;;  %v254_v26 = vld [vmem:[%s4342_s7 + $0x190] sm:$0xff] }
  0x20   : > { %251 = vst [vmem:[%s4347_s8 + $0xc0] sm:$0xff] %v250_v24  ;;  %253 = vst [vmem:[%s4347_s8 + $0xc8] sm:$0xff] %v252_v25  ;;  %v256_v27 = vld [vmem:[%s4342_s7 + $0x1b0] sm:$0xff]  ;;  %v258_v28 = vld [vmem:[%s4342_s7 + $0x1b8] sm:$0xff] }
  0x21   : > { %255 = vst [vmem:[%s4347_s8 + $0xd0] sm:$0xff] %v254_v26  ;;  %v260_v29 = vld [vmem:[%s4342_s7 + $0x1c0] sm:$0xff]  ;;  %257 = vst [vmem:[%s4347_s8 + $0xd8] sm:$0xff] %v256_v27  ;;  %v264_v31 = vld [vmem:[%s4342_s7 + $0x1e8] sm:$0xff] }
  0x22   : > { %259 = vst [vmem:[%s4347_s8 + $0xe0] sm:$0xff] %v258_v28  ;;  %261 = vst [vmem:[%s4347_s8 + $0xe8] sm:$0xff] %v260_v29  ;;  %v262_v30 = vld [vmem:[%s4342_s7 + $0x1e0] sm:$0xff]  ;;  %v266_v32 = vld [vmem:[%s4342_s7 + $0x1f0] sm:$0xff] }
  0x23   : > { %263 = vst [vmem:[%s4347_s8 + $0xf0] sm:$0xff] %v262_v30  ;;  %265 = vst [vmem:[%s4347_s8 + $0xf8] sm:$0xff] %v264_v31  ;;  %v268_v33 = vld [vmem:[%s4342_s7 + $0x210] sm:$0xff]  ;;  %v270_v34 = vld [vmem:[%s4342_s7 + $0x218] sm:$0xff] }
  0x24   : > { %267 = vst [vmem:[%s4347_s8 + $0x100] sm:$0xff] %v266_v32  ;;  %v272_v35 = vld [vmem:[%s4342_s7 + $0x220] sm:$0xff]  ;;  %269 = vst [vmem:[%s4347_s8 + $0x108] sm:$0xff] %v268_v33  ;;  %v276_v37 = vld [vmem:[%s4342_s7 + $0x248] sm:$0xff] }
  0x25   : > { %271 = vst [vmem:[%s4347_s8 + $0x110] sm:$0xff] %v270_v34  ;;  %273 = vst [vmem:[%s4347_s8 + $0x118] sm:$0xff] %v272_v35  ;;  %v274_v36 = vld [vmem:[%s4342_s7 + $0x240] sm:$0xff]  ;;  %v278_v38 = vld [vmem:[%s4342_s7 + $0x250] sm:$0xff] }
  0x26   : > { %275 = vst [vmem:[%s4347_s8 + $0x120] sm:$0xff] %v274_v36  ;;  %277 = vst [vmem:[%s4347_s8 + $0x128] sm:$0xff] %v276_v37  ;;  %v280_v39 = vld [vmem:[%s4342_s7 + $0x270] sm:$0xff]  ;;  %v282_v40 = vld [vmem:[%s4342_s7 + $0x278] sm:$0xff] }
  0x27   : > { %279 = vst [vmem:[%s4347_s8 + $0x130] sm:$0xff] %v278_v38  ;;  %v284_v41 = vld [vmem:[%s4342_s7 + $0x280] sm:$0xff]  ;;  %281 = vst [vmem:[%s4347_s8 + $0x138] sm:$0xff] %v280_v39  ;;  %v288_v43 = vld [vmem:[%s4342_s7 + $0x2a8] sm:$0xff] }
  0x28   : > { %283 = vst [vmem:[%s4347_s8 + $0x140] sm:$0xff] %v282_v40  ;;  %285 = vst [vmem:[%s4347_s8 + $0x148] sm:$0xff] %v284_v41  ;;  %v286_v42 = vld [vmem:[%s4342_s7 + $0x2a0] sm:$0xff]  ;;  %v290_v44 = vld [vmem:[%s4342_s7 + $0x2b0] sm:$0xff] }
  0x29   : > { %287 = vst [vmem:[%s4347_s8 + $0x150] sm:$0xff] %v286_v42  ;;  %289 = vst [vmem:[%s4347_s8 + $0x158] sm:$0xff] %v288_v43  ;;  %v292_v45 = vld [vmem:[%s4342_s7 + $0x2d0] sm:$0xff]  ;;  %v294_v46 = vld [vmem:[%s4342_s7 + $0x2d8] sm:$0xff] }
  0x2a   : > { %291 = vst [vmem:[%s4347_s8 + $0x160] sm:$0xff] %v290_v44  ;;  %v296_v47 = vld [vmem:[%s4342_s7 + $0x2e0] sm:$0xff]  ;;  %293 = vst [vmem:[%s4347_s8 + $0x168] sm:$0xff] %v292_v45  ;;  %v300_v49 = vld [vmem:[%s4342_s7 + $0x308] sm:$0xff] }
  0x2b   : > { %295 = vst [vmem:[%s4347_s8 + $0x170] sm:$0xff] %v294_v46  ;;  %297 = vst [vmem:[%s4347_s8 + $0x178] sm:$0xff] %v296_v47  ;;  %v298_v48 = vld [vmem:[%s4342_s7 + $0x300] sm:$0xff]  ;;  %v302_v50 = vld [vmem:[%s4342_s7 + $0x310] sm:$0xff] }
  0x2c   : > { %299 = vst [vmem:[%s4347_s8 + $0x180] sm:$0xff] %v298_v48  ;;  %301 = vst [vmem:[%s4347_s8 + $0x188] sm:$0xff] %v300_v49  ;;  %v304_v51 = vld [vmem:[%s4342_s7 + $0x330] sm:$0xff]  ;;  %v306_v52 = vld [vmem:[%s4342_s7 + $0x338] sm:$0xff] }
  0x2d   : > { %303 = vst [vmem:[%s4347_s8 + $0x190] sm:$0xff] %v302_v50  ;;  %v308_v53 = vld [vmem:[%s4342_s7 + $0x340] sm:$0xff]  ;;  %305 = vst [vmem:[%s4347_s8 + $0x198] sm:$0xff] %v304_v51  ;;  %v312_v55 = vld [vmem:[%s4342_s7 + $0x368] sm:$0xff] }
  0x2e   : > { %307 = vst [vmem:[%s4347_s8 + $0x1a0] sm:$0xff] %v306_v52  ;;  %309 = vst [vmem:[%s4347_s8 + $0x1a8] sm:$0xff] %v308_v53  ;;  %v310_v54 = vld [vmem:[%s4342_s7 + $0x360] sm:$0xff]  ;;  %v314_v56 = vld [vmem:[%s4342_s7 + $0x370] sm:$0xff] }
  0x2f   : > { %311 = vst [vmem:[%s4347_s8 + $0x1b0] sm:$0xff] %v310_v54  ;;  %313 = vst [vmem:[%s4347_s8 + $0x1b8] sm:$0xff] %v312_v55  ;;  %v316_v57 = vld [vmem:[%s4342_s7 + $0x390] sm:$0xff]  ;;  %v318_v58 = vld [vmem:[%s4342_s7 + $0x398] sm:$0xff] }
  0x30   : > { %315 = vst [vmem:[%s4347_s8 + $0x1c0] sm:$0xff] %v314_v56  ;;  %v320_v59 = vld [vmem:[%s4342_s7 + $0x3a0] sm:$0xff]  ;;  %317 = vst [vmem:[%s4347_s8 + $0x1c8] sm:$0xff] %v316_v57  ;;  %v324_v61 = vld [vmem:[%s4342_s7 + $0x3c8] sm:$0xff] }
  0x31   : > { %319 = vst [vmem:[%s4347_s8 + $0x1d0] sm:$0xff] %v318_v58  ;;  %321 = vst [vmem:[%s4347_s8 + $0x1d8] sm:$0xff] %v320_v59  ;;  %v322_v60 = vld [vmem:[%s4342_s7 + $0x3c0] sm:$0xff]  ;;  %v326_v62 = vld [vmem:[%s4342_s7 + $0x3d0] sm:$0xff] }
  0x32   : > { %323 = vst [vmem:[%s4347_s8 + $0x1e0] sm:$0xff] %v322_v60  ;;  %325 = vst [vmem:[%s4347_s8 + $0x1e8] sm:$0xff] %v324_v61  ;;  %v328_v63 = vld [vmem:[%s4342_s7 + $0x3f0] sm:$0xff]  ;;  %v330_v0 = vld [vmem:[%s4342_s7 + $0x3f8] sm:$0xff] }
  0x33   : > { %327 = vst [vmem:[%s4347_s8 + $0x1f0] sm:$0xff] %v326_v62  ;;  %v332_v1 = vld [vmem:[%s4342_s7 + $0x400] sm:$0xff]  ;;  %329 = vst [vmem:[%s4347_s8 + $0x1f8] sm:$0xff] %v328_v63  ;;  %v336_v3 = vld [vmem:[%s4342_s7 + $0x428] sm:$0xff] }
  0x34   : > { %331 = vst [vmem:[%s4347_s8 + $0x200] sm:$0xff] %v330_v0  ;;  %333 = vst [vmem:[%s4347_s8 + $0x208] sm:$0xff] %v332_v1  ;;  %v334_v2 = vld [vmem:[%s4342_s7 + $0x420] sm:$0xff]  ;;  %v338_v4 = vld [vmem:[%s4342_s7 + $0x430] sm:$0xff] }
  0x35   : > { %335 = vst [vmem:[%s4347_s8 + $0x210] sm:$0xff] %v334_v2  ;;  %337 = vst [vmem:[%s4347_s8 + $0x218] sm:$0xff] %v336_v3  ;;  %v340_v5 = vld [vmem:[%s4342_s7 + $0x450] sm:$0xff]  ;;  %v342_v6 = vld [vmem:[%s4342_s7 + $0x458] sm:$0xff] }
  0x36   : > { %339 = vst [vmem:[%s4347_s8 + $0x220] sm:$0xff] %v338_v4  ;;  %v344_v7 = vld [vmem:[%s4342_s7 + $0x460] sm:$0xff]  ;;  %341 = vst [vmem:[%s4347_s8 + $0x228] sm:$0xff] %v340_v5  ;;  %v348_v9 = vld [vmem:[%s4342_s7 + $0x488] sm:$0xff] }
  0x37   : > { %343 = vst [vmem:[%s4347_s8 + $0x230] sm:$0xff] %v342_v6  ;;  %345 = vst [vmem:[%s4347_s8 + $0x238] sm:$0xff] %v344_v7  ;;  %v346_v8 = vld [vmem:[%s4342_s7 + $0x480] sm:$0xff]  ;;  %v350_v10 = vld [vmem:[%s4342_s7 + $0x490] sm:$0xff] }
  0x38   : > { %347 = vst [vmem:[%s4347_s8 + $0x240] sm:$0xff] %v346_v8  ;;  %349 = vst [vmem:[%s4347_s8 + $0x248] sm:$0xff] %v348_v9  ;;  %v352_v11 = vld [vmem:[%s4342_s7 + $0x4b0] sm:$0xff]  ;;  %v354_v12 = vld [vmem:[%s4342_s7 + $0x4b8] sm:$0xff] }
  0x39   : > { %351 = vst [vmem:[%s4347_s8 + $0x250] sm:$0xff] %v350_v10  ;;  %v356_v13 = vld [vmem:[%s4342_s7 + $0x4c0] sm:$0xff]  ;;  %353 = vst [vmem:[%s4347_s8 + $0x258] sm:$0xff] %v352_v11  ;;  %v360_v15 = vld [vmem:[%s4342_s7 + $0x4e8] sm:$0xff] }
  0x3a   : > { %355 = vst [vmem:[%s4347_s8 + $0x260] sm:$0xff] %v354_v12  ;;  %357 = vst [vmem:[%s4347_s8 + $0x268] sm:$0xff] %v356_v13  ;;  %v358_v14 = vld [vmem:[%s4342_s7 + $0x4e0] sm:$0xff]  ;;  %v362_v16 = vld [vmem:[%s4342_s7 + $0x4f0] sm:$0xff] }
  0x3b   : > { %359 = vst [vmem:[%s4347_s8 + $0x270] sm:$0xff] %v358_v14  ;;  %361 = vst [vmem:[%s4347_s8 + $0x278] sm:$0xff] %v360_v15  ;;  %v364_v17 = vld [vmem:[%s4342_s7 + $0x510] sm:$0xff]  ;;  %v366_v18 = vld [vmem:[%s4342_s7 + $0x518] sm:$0xff] }
  0x3c   : > { %363 = vst [vmem:[%s4347_s8 + $0x280] sm:$0xff] %v362_v16  ;;  %v368_v19 = vld [vmem:[%s4342_s7 + $0x520] sm:$0xff]  ;;  %365 = vst [vmem:[%s4347_s8 + $0x288] sm:$0xff] %v364_v17  ;;  %v372_v21 = vld [vmem:[%s4342_s7 + $0x548] sm:$0xff] }
  0x3d   : > { %367 = vst [vmem:[%s4347_s8 + $0x290] sm:$0xff] %v366_v18  ;;  %369 = vst [vmem:[%s4347_s8 + $0x298] sm:$0xff] %v368_v19  ;;  %v370_v20 = vld [vmem:[%s4342_s7 + $0x540] sm:$0xff]  ;;  %v374_v22 = vld [vmem:[%s4342_s7 + $0x550] sm:$0xff] }
  0x3e   : > { %371 = vst [vmem:[%s4347_s8 + $0x2a0] sm:$0xff] %v370_v20  ;;  %373 = vst [vmem:[%s4347_s8 + $0x2a8] sm:$0xff] %v372_v21  ;;  %v376_v23 = vld [vmem:[%s4342_s7 + $0x570] sm:$0xff]  ;;  %v378_v24 = vld [vmem:[%s4342_s7 + $0x578] sm:$0xff] }
  0x3f   : > { %375 = vst [vmem:[%s4347_s8 + $0x2b0] sm:$0xff] %v374_v22  ;;  %v380_v25 = vld [vmem:[%s4342_s7 + $0x580] sm:$0xff]  ;;  %377 = vst [vmem:[%s4347_s8 + $0x2b8] sm:$0xff] %v376_v23  ;;  %v384_v27 = vld [vmem:[%s4342_s7 + $0x5a8] sm:$0xff] }
  0x40   : > { %379 = vst [vmem:[%s4347_s8 + $0x2c0] sm:$0xff] %v378_v24  ;;  %381 = vst [vmem:[%s4347_s8 + $0x2c8] sm:$0xff] %v380_v25  ;;  %v382_v26 = vld [vmem:[%s4342_s7 + $0x5a0] sm:$0xff]  ;;  %v386_v28 = vld [vmem:[%s4342_s7 + $0x5b0] sm:$0xff] }
  0x41   : > { %383 = vst [vmem:[%s4347_s8 + $0x2d0] sm:$0xff] %v382_v26  ;;  %385 = vst [vmem:[%s4347_s8 + $0x2d8] sm:$0xff] %v384_v27  ;;  %v388_v29 = vld [vmem:[%s4342_s7 + $0x5d0] sm:$0xff]  ;;  %v390_v30 = vld [vmem:[%s4342_s7 + $0x5d8] sm:$0xff] }
  0x42   : > { %387 = vst [vmem:[%s4347_s8 + $0x2e0] sm:$0xff] %v386_v28  ;;  %v392_v31 = vld [vmem:[%s4342_s7 + $0x5e0] sm:$0xff]  ;;  %389 = vst [vmem:[%s4347_s8 + $0x2e8] sm:$0xff] %v388_v29  ;;  %v396_v33 = vld [vmem:[%s4342_s7 + $0x608] sm:$0xff] }
  0x43   : > { %391 = vst [vmem:[%s4347_s8 + $0x2f0] sm:$0xff] %v390_v30  ;;  %393 = vst [vmem:[%s4347_s8 + $0x2f8] sm:$0xff] %v392_v31  ;;  %v394_v32 = vld [vmem:[%s4342_s7 + $0x600] sm:$0xff]  ;;  %v398_v34 = vld [vmem:[%s4342_s7 + $0x610] sm:$0xff] }
  0x44   : > { %395 = vst [vmem:[%s4347_s8 + $0x300] sm:$0xff] %v394_v32  ;;  %397 = vst [vmem:[%s4347_s8 + $0x308] sm:$0xff] %v396_v33  ;;  %v400_v35 = vld [vmem:[%s4342_s7 + $0x630] sm:$0xff]  ;;  %v402_v36 = vld [vmem:[%s4342_s7 + $0x638] sm:$0xff] }
  0x45   : > { %399 = vst [vmem:[%s4347_s8 + $0x310] sm:$0xff] %v398_v34  ;;  %v404_v37 = vld [vmem:[%s4342_s7 + $0x640] sm:$0xff]  ;;  %401 = vst [vmem:[%s4347_s8 + $0x318] sm:$0xff] %v400_v35  ;;  %v408_v39 = vld [vmem:[%s4342_s7 + $0x668] sm:$0xff] }
  0x46   : > { %403 = vst [vmem:[%s4347_s8 + $0x320] sm:$0xff] %v402_v36  ;;  %405 = vst [vmem:[%s4347_s8 + $0x328] sm:$0xff] %v404_v37  ;;  %v406_v38 = vld [vmem:[%s4342_s7 + $0x660] sm:$0xff]  ;;  %v410_v40 = vld [vmem:[%s4342_s7 + $0x670] sm:$0xff] }
  0x47   : > { %407 = vst [vmem:[%s4347_s8 + $0x330] sm:$0xff] %v406_v38  ;;  %409 = vst [vmem:[%s4347_s8 + $0x338] sm:$0xff] %v408_v39  ;;  %v412_v41 = vld [vmem:[%s4342_s7 + $0x690] sm:$0xff]  ;;  %v414_v42 = vld [vmem:[%s4342_s7 + $0x698] sm:$0xff] }
  0x48   : > { %411 = vst [vmem:[%s4347_s8 + $0x340] sm:$0xff] %v410_v40  ;;  %v416_v43 = vld [vmem:[%s4342_s7 + $0x6a0] sm:$0xff]  ;;  %413 = vst [vmem:[%s4347_s8 + $0x348] sm:$0xff] %v412_v41  ;;  %v420_v45 = vld [vmem:[%s4342_s7 + $0x6c8] sm:$0xff] }
  0x49   : > { %415 = vst [vmem:[%s4347_s8 + $0x350] sm:$0xff] %v414_v42  ;;  %417 = vst [vmem:[%s4347_s8 + $0x358] sm:$0xff] %v416_v43  ;;  %v418_v44 = vld [vmem:[%s4342_s7 + $0x6c0] sm:$0xff]  ;;  %v422_v46 = vld [vmem:[%s4342_s7 + $0x6d0] sm:$0xff] }
  0x4a   : > { %419 = vst [vmem:[%s4347_s8 + $0x360] sm:$0xff] %v418_v44  ;;  %421 = vst [vmem:[%s4347_s8 + $0x368] sm:$0xff] %v420_v45  ;;  %v424_v47 = vld [vmem:[%s4342_s7 + $0x6f0] sm:$0xff]  ;;  %v426_v48 = vld [vmem:[%s4342_s7 + $0x6f8] sm:$0xff] }
  0x4b   : > { %423 = vst [vmem:[%s4347_s8 + $0x370] sm:$0xff] %v422_v46  ;;  %v428_v49 = vld [vmem:[%s4342_s7 + $0x700] sm:$0xff]  ;;  %425 = vst [vmem:[%s4347_s8 + $0x378] sm:$0xff] %v424_v47  ;;  %v432_v51 = vld [vmem:[%s4342_s7 + $0x728] sm:$0xff] }
  0x4c   : > { %427 = vst [vmem:[%s4347_s8 + $0x380] sm:$0xff] %v426_v48  ;;  %429 = vst [vmem:[%s4347_s8 + $0x388] sm:$0xff] %v428_v49  ;;  %v430_v50 = vld [vmem:[%s4342_s7 + $0x720] sm:$0xff]  ;;  %v434_v52 = vld [vmem:[%s4342_s7 + $0x730] sm:$0xff] }
  0x4d   : > { %431 = vst [vmem:[%s4347_s8 + $0x390] sm:$0xff] %v430_v50  ;;  %433 = vst [vmem:[%s4347_s8 + $0x398] sm:$0xff] %v432_v51  ;;  %v436_v53 = vld [vmem:[%s4342_s7 + $0x750] sm:$0xff]  ;;  %v438_v54 = vld [vmem:[%s4342_s7 + $0x758] sm:$0xff] }
  0x4e   : > { %435 = vst [vmem:[%s4347_s8 + $0x3a0] sm:$0xff] %v434_v52  ;;  %v440_v55 = vld [vmem:[%s4342_s7 + $0x760] sm:$0xff]  ;;  %437 = vst [vmem:[%s4347_s8 + $0x3a8] sm:$0xff] %v436_v53  ;;  %v444_v57 = vld [vmem:[%s4342_s7 + $0x788] sm:$0xff] }
  0x4f   : > { %439 = vst [vmem:[%s4347_s8 + $0x3b0] sm:$0xff] %v438_v54  ;;  %441 = vst [vmem:[%s4347_s8 + $0x3b8] sm:$0xff] %v440_v55  ;;  %v442_v56 = vld [vmem:[%s4342_s7 + $0x780] sm:$0xff]  ;;  %v446_v58 = vld [vmem:[%s4342_s7 + $0x790] sm:$0xff] }
  0x50   : > { %443 = vst [vmem:[%s4347_s8 + $0x3c0] sm:$0xff] %v442_v56  ;;  %445 = vst [vmem:[%s4347_s8 + $0x3c8] sm:$0xff] %v444_v57  ;;  %v448_v59 = vld [vmem:[%s4342_s7 + $0x7b0] sm:$0xff]  ;;  %v450_v60 = vld [vmem:[%s4342_s7 + $0x7b8] sm:$0xff] }
  0x51   : > { %447 = vst [vmem:[%s4347_s8 + $0x3d0] sm:$0xff] %v446_v58  ;;  %v452_v61 = vld [vmem:[%s4342_s7 + $0x7c0] sm:$0xff]  ;;  %449 = vst [vmem:[%s4347_s8 + $0x3d8] sm:$0xff] %v448_v59  ;;  %v456_v63 = vld [vmem:[%s4342_s7 + $0x7e8] sm:$0xff] }
  0x52   : > { %451 = vst [vmem:[%s4347_s8 + $0x3e0] sm:$0xff] %v450_v60  ;;  %453 = vst [vmem:[%s4347_s8 + $0x3e8] sm:$0xff] %v452_v61  ;;  %v454_v62 = vld [vmem:[%s4342_s7 + $0x7e0] sm:$0xff]  ;;  %v458_v0 = vld [vmem:[%s4342_s7 + $0x7f0] sm:$0xff] }
  0x53   : > { %455 = vst [vmem:[%s4347_s8 + $0x3f0] sm:$0xff] %v454_v62  ;;  %457 = vst [vmem:[%s4347_s8 + $0x3f8] sm:$0xff] %v456_v63  ;;  %v460_v1 = vld [vmem:[%s4342_s7 + $0x810] sm:$0xff]  ;;  %v462_v2 = vld [vmem:[%s4342_s7 + $0x818] sm:$0xff] }
  0x54   : > { %459 = vst [vmem:[%s4347_s8 + $0x400] sm:$0xff] %v458_v0  ;;  %v464_v3 = vld [vmem:[%s4342_s7 + $0x820] sm:$0xff]  ;;  %461 = vst [vmem:[%s4347_s8 + $0x408] sm:$0xff] %v460_v1  ;;  %v468_v5 = vld [vmem:[%s4342_s7 + $0x848] sm:$0xff] }
  0x55   : > { %463 = vst [vmem:[%s4347_s8 + $0x410] sm:$0xff] %v462_v2  ;;  %465 = vst [vmem:[%s4347_s8 + $0x418] sm:$0xff] %v464_v3  ;;  %v466_v4 = vld [vmem:[%s4342_s7 + $0x840] sm:$0xff]  ;;  %v470_v6 = vld [vmem:[%s4342_s7 + $0x850] sm:$0xff] }
  0x56   : > { %467 = vst [vmem:[%s4347_s8 + $0x420] sm:$0xff] %v466_v4  ;;  %469 = vst [vmem:[%s4347_s8 + $0x428] sm:$0xff] %v468_v5  ;;  %v472_v7 = vld [vmem:[%s4342_s7 + $0x870] sm:$0xff]  ;;  %v474_v8 = vld [vmem:[%s4342_s7 + $0x878] sm:$0xff] }
  0x57   : > { %471 = vst [vmem:[%s4347_s8 + $0x430] sm:$0xff] %v470_v6  ;;  %v476_v9 = vld [vmem:[%s4342_s7 + $0x880] sm:$0xff]  ;;  %473 = vst [vmem:[%s4347_s8 + $0x438] sm:$0xff] %v472_v7  ;;  %v480_v11 = vld [vmem:[%s4342_s7 + $0x8a8] sm:$0xff] }
  0x58   : > { %475 = vst [vmem:[%s4347_s8 + $0x440] sm:$0xff] %v474_v8  ;;  %477 = vst [vmem:[%s4347_s8 + $0x448] sm:$0xff] %v476_v9  ;;  %v478_v10 = vld [vmem:[%s4342_s7 + $0x8a0] sm:$0xff]  ;;  %v482_v12 = vld [vmem:[%s4342_s7 + $0x8b0] sm:$0xff] }
  0x59   : > { %479 = vst [vmem:[%s4347_s8 + $0x450] sm:$0xff] %v478_v10  ;;  %481 = vst [vmem:[%s4347_s8 + $0x458] sm:$0xff] %v480_v11  ;;  %v484_v13 = vld [vmem:[%s4342_s7 + $0x8d0] sm:$0xff]  ;;  %v486_v14 = vld [vmem:[%s4342_s7 + $0x8d8] sm:$0xff] }
  0x5a   : > { %483 = vst [vmem:[%s4347_s8 + $0x460] sm:$0xff] %v482_v12  ;;  %v488_v15 = vld [vmem:[%s4342_s7 + $0x8e0] sm:$0xff]  ;;  %485 = vst [vmem:[%s4347_s8 + $0x468] sm:$0xff] %v484_v13 }
  0x5b   : > { %487 = vst [vmem:[%s4347_s8 + $0x470] sm:$0xff] %v486_v14  ;;  %489 = vst [vmem:[%s4347_s8 + $0x478] sm:$0xff] %v488_v15 }
  0x5c PF: > { %p3785_p7 = scmp.ge.s32.totalorder %s4268_s20, 1  ;;  %p502_p8 = scmp.lt.s32.totalorder %s4268_s20, 3 }
  0x5e   : > { %p503_p9 = pnand %p3785_p7, %p502_p8 }
  0x60   : > { %506 = sbr.rel (%p503_p9) target bundleno = 1046 (0x416), region = 59 }
  0x65   : > { %v4639_v16 = vld [vmem:[%s6869_s0] sm:$0xff]  ;;  %v4644_v17 = vld [vmem:[%s6869_s0 + $0x8] sm:$0xff]  ;;  %v4649_v18 = vld [vmem:[%s6869_s0 + $0x10] sm:$0xff]  ;;  %s509_s8 = sand.u32 1, %s4260_s18   ;;  %vm718_vm0 = vcmask 1043456   ;;  %s540_s16 = smul.u32 6, %s4317_s21 }
  0x66   : > { %v622_v19 = vadd.f32 %v4644_v17, %v4639_v16  ;;  %v4656_v20 = vld [vmem:[%s6869_s0 + $0x18] sm:$0xff]  ;;  %v4661_v21 = vld [vmem:[%s6869_s0 + $0x20] sm:$0xff]  ;;  %v4666_v22 = vld [vmem:[%s6869_s0 + $0x28] sm:$0xff]  ;;  %s3952_s9 = smul.u32 1152, %s509_s8 }
  0x67   : > { %v626_v23 = vadd.f32 %v4661_v21, %v4656_v20  ;;  %v4673_v24 = vld [vmem:[%s6869_s0 + $0x30] sm:$0xff]  ;;  %v4678_v25 = vld [vmem:[%s6869_s0 + $0x38] sm:$0xff]  ;;  %v4683_v26 = vld [vmem:[%s6869_s0 + $0x40] sm:$0xff]  ;;  %p541_p10 = scmp.lt.s32.totalorder %s540_s16, 11  ;;  %s3953_s24 = smul.u32 1200, %s509_s8 }
  0x68   : > { %v623_v27 = vadd.f32 %v622_v19, %v4649_v18  ;;  %v630_v28 = vadd.f32 %v4678_v25, %v4673_v24  ;;  %v4691_v29 = vld [vmem:[%s6869_s0 + $0x48] sm:$0xff]  ;;  %v4696_v30 = vld [vmem:[%s6869_s0 + $0x50] sm:$0xff]  ;;  %v4701_v31 = vld [vmem:[%s6869_s0 + $0x58] sm:$0xff]  ;;  %s5035_s10 = scalar_lea.vmem [#allocation2], %s3952_s9  ;;  %s3934_s8 = smul.u32 (%p4332_p5), 48, %s4317_s21 }
  0x69   : > { %v634_v32 = vadd.f32 %v4696_v30, %v4691_v29  ;;  %v4708_v33 = vld [vmem:[%s6869_s0 + $0x78] sm:$0xff]  ;;  %v4713_v34 = vld [vmem:[%s6869_s0 + $0x80] sm:$0xff]  ;;  %v627_v35 = vadd.f32 %v626_v23, %v4666_v22  ;;  %v4725_v38 = vld [vmem:[%s6869_s0 + $0x68] sm:$0xff]  ;;  %s7149_s16 = smov (!%p541_p10, %s540_s16), 11  ;;  %s6118_s18 = scalar_lea.vmem [#allocation3], %s3953_s24 }
  0x6a   : > { %624 = vadd.xlane.f32.xlu0 %v623_v27  ;;  %v631_v36 = vadd.f32 %v630_v28, %v4683_v26  ;;  %v4720_v37 = vld [vmem:[%s6869_s0 + $0x60] sm:$0xff]  ;;  %v4730_v39 = vld [vmem:[%s6869_s0 + $0x70] sm:$0xff]  ;;  %v642_v42 = vadd.f32 %v4713_v34, %v4708_v33  ;;  %v4745_v44 = vld [vmem:[%s6869_s0 + $0x98] sm:$0xff]  ;;  %s6058_s23 = scalar_lea.vmem %s6873_s4, %s7149_s16  ;;  %s6563_s27 = scalar_lea.vmem (%p4332_p5), %s6874_s5, %s3934_s8 }
  0x6b   : > { %v638_v40 = vadd.f32 %v4725_v38, %v4720_v37  ;;  %v635_v41 = vadd.f32 %v634_v32, %v4701_v31  ;;  %v4740_v43 = vld [vmem:[%s6869_s0 + $0x90] sm:$0xff]  ;;  %v4750_v45 = vld [vmem:[%s6869_s0 + $0x88] sm:$0xff]  ;;  %v4768_v50 = vld [vmem:[%s6869_s0 + $0xa0] sm:$0xff] }
  0x6c   : > { %632 = vadd.xlane.f32.xlu1 %v631_v36  ;;  %v4755_v46 = vld [vmem:[%s6869_s0 + $0xa8] sm:$0xff]  ;;  %v4760_v47 = vld [vmem:[%s6869_s0 + $0xb0] sm:$0xff]  ;;  %v646_v49 = vadd.f32 %v4745_v44, %v4740_v43  ;;  %v4773_v51 = vld [vmem:[%s6869_s0 + $0xc0] sm:$0xff]  ;;  %v643_v53 = vadd.f32 %v642_v42, %v4750_v45 }
  0x6d   : > { %v639_v48 = vadd.f32 %v638_v40, %v4730_v39  ;;  %v4778_v52 = vld [vmem:[%s6869_s0 + $0xc8] sm:$0xff]  ;;  %v650_v54 = vadd.f32 %v4760_v47, %v4755_v46  ;;  %v4786_v55 = vld [vmem:[%s6869_s0 + $0xb8] sm:$0xff]  ;;  %v4796_v57 = vld [vmem:[%s6869_s0 + $0xe0] sm:$0xff] }
  0x6e   : > { %628 = vadd.xlane.f32.xlu0 %v627_v35  ;;  %v4791_v56 = vld [vmem:[%s6869_s0 + $0xd8] sm:$0xff]  ;;  %v647_v58 = vadd.f32 %v646_v49, %v4768_v50  ;;  %v654_v59 = vadd.f32 %v4778_v52, %v4773_v51  ;;  %v4804_v60 = vld [vmem:[%s6869_s0 + $0xd0] sm:$0xff]  ;;  %v4822_v1 = vld [vmem:[%s6869_s0 + $0xe8] sm:$0xff] }
  0x6f   : > { %v4809_v61 = vld [vmem:[%s6869_s0 + $0xf0] sm:$0xff]  ;;  %v4814_v62 = vld [vmem:[%s6869_s0 + $0xf8] sm:$0xff]  ;;  %v651_v63 = vadd.f32 %v650_v54, %v4786_v55  ;;  %v658_v0 = vadd.f32 %v4796_v57, %v4791_v56  ;;  %v4827_v2 = vld [vmem:[%s6869_s0 + $0x108] sm:$0xff] }
  0x70   : > { %636 = vadd.xlane.f32.xlu1 %v635_v41  ;;  %v4832_v3 = vld [vmem:[%s6869_s0 + $0x110] sm:$0xff]  ;;  %v655_v4 = vadd.f32 %v654_v59, %v4804_v60  ;;  %v662_v5 = vadd.f32 %v4814_v62, %v4809_v61  ;;  %v4840_v6 = vld [vmem:[%s6869_s0 + $0x100] sm:$0xff]  ;;  %v4850_v8 = vld [vmem:[%s6869_s0 + $0x128] sm:$0xff] }
  0x71   : > { %v4845_v7 = vld [vmem:[%s6869_s0 + $0x120] sm:$0xff]  ;;  %v659_v9 = vadd.f32 %v658_v0, %v4822_v1  ;;  %v666_v10 = vadd.f32 %v4832_v3, %v4827_v2  ;;  %v4858_v11 = vld [vmem:[%s6869_s0 + $0x118] sm:$0xff]  ;;  %v4876_v19 = vld [vmem:[%s6869_s0 + $0x130] sm:$0xff] }
  0x72   : > { %640 = vadd.xlane.f32.xlu0 %v639_v48  ;;  %v4863_v12 = vld [vmem:[%s6869_s0 + $0x138] sm:$0xff]  ;;  %v4868_v13 = vld [vmem:[%s6869_s0 + $0x140] sm:$0xff]  ;;  %v663_v14 = vadd.f32 %v662_v5, %v4840_v6  ;;  %v670_v15 = vadd.f32 %v4850_v8, %v4845_v7  ;;  %v4881_v23 = vld [vmem:[%s6869_s0 + $0x150] sm:$0xff] }
  0x73   : > { %v4886_v27 = vld [vmem:[%s6869_s0 + $0x158] sm:$0xff]  ;;  %v667_v28 = vadd.f32 %v666_v10, %v4858_v11  ;;  %v674_v32 = vadd.f32 %v4868_v13, %v4863_v12  ;;  %v4894_v35 = vld [vmem:[%s6869_s0 + $0x148] sm:$0xff]  ;;  %v4904_v40 = vld [vmem:[%s6869_s0 + $0x170] sm:$0xff] }
  0x74   : > { %644 = vadd.xlane.f32.xlu1 %v643_v53  ;;  %6970 = vst [vmem:[#allocation4_spill] sm:$0xff] %v4886_v27  ;;  %v4899_v36 = vld [vmem:[%s6869_s0 + $0x168] sm:$0xff]  ;;  %v671_v41 = vadd.f32 %v670_v15, %v4876_v19  ;;  %v678_v42 = vadd.f32 %v4886_v27, %v4881_v23  ;;  %v4912_v48 = vld [vmem:[%s6869_s0 + $0x160] sm:$0xff]  ;;  %v4930_v59 = vld [vmem:[%s6869_s0 + $0x178] sm:$0xff] }
  0x75   : > { %6971 = vst [vmem:[#allocation5_spill] sm:$0xff] %v4912_v48  ;;  %v4917_v49 = vld [vmem:[%s6869_s0 + $0x180] sm:$0xff]  ;;  %v4922_v53 = vld [vmem:[%s6869_s0 + $0x188] sm:$0xff]  ;;  %v675_v54 = vadd.f32 %v674_v32, %v4894_v35  ;;  %v4953_v10 = vld [vmem:[%s6869_s0 + $0x1b0] sm:$0xff] }
  0x76   : > { %648 = vadd.xlane.f32.xlu0 %v647_v58  ;;  %6972 = vst [vmem:[#allocation6_spill] sm:$0xff] %v4917_v49  ;;  %6973 = vst [vmem:[#allocation7_spill] sm:$0xff] %v4922_v53  ;;  %v682_v58 = vadd.f32 %v4904_v40, %v4899_v36  ;;  %v4940_v0 = vld [vmem:[%s6869_s0 + $0x1a0] sm:$0xff]  ;;  %v686_v5 = vadd.f32 %v4922_v53, %v4917_v49  ;;  %v4966_v32 = vld [vmem:[%s6869_s0 + $0x1a8] sm:$0xff] }
  0x77   : > { %6975 = vst [vmem:[#allocation9_spill] sm:$0xff] %v4940_v0  ;;  %6977 = vst [vmem:[#allocation11_spill] sm:$0xff] %v4953_v10  ;;  %v4984_v53 = vld [vmem:[%s6869_s0 + $0x1c0] sm:$0xff] }
  0x78   : > { %652 = vadd.xlane.f32.xlu1 %v651_v63  ;;  %v4935_v63 = vld [vmem:[%s6869_s0 + $0x198] sm:$0xff]  ;;  %v683_v15 = vadd.f32 %v682_v58, %v4930_v59  ;;  %6979 = vst [vmem:[#allocation13_spill] sm:$0xff] %v4966_v32  ;;  %6982 = vst [vmem:[#allocation16_spill] sm:$0xff] %v4984_v53  ;;  %v4989_v49 = vld [vmem:[%s6869_s0 + $0x1e0] sm:$0xff] }
  0x79   : > { %6974 = vst [vmem:[#allocation8_spill] sm:$0xff] %v4935_v63  ;;  %6983 = vst [vmem:[#allocation17_spill] sm:$0xff] %v4989_v49 }
  0x7a   : > { %656 = vadd.xlane.f32.xlu0 %v655_v4  ;;  %v679_v4 = vadd.f32 %v678_v42, %v4912_v48  ;;  %v4976_v42 = vld [vmem:[%s6869_s0 + $0x1d0] sm:$0xff] }
  0x7b   : > { %6981 = vst [vmem:[#allocation15_spill] sm:$0xff] %v4976_v42 }
  0x7c   : > { %660 = vadd.xlane.f32.xlu1 %v659_v9  ;;  %v4948_v9 = vld [vmem:[%s6869_s0 + $0x190] sm:$0xff] }
  0x7d   : > { %6976 = vst [vmem:[#allocation10_spill] sm:$0xff] %v4948_v9 }
  0x7e   : > { %664 = vadd.xlane.f32.xlu0 %v663_v14  ;;  %v4958_v14 = vld [vmem:[%s6869_s0 + $0x1b8] sm:$0xff] }
  0x7f   : > { %6978 = vst [vmem:[#allocation12_spill] sm:$0xff] %v4958_v14  ;;  %v694_v58 = vadd.f32 %v4958_v14, %v4953_v10  ;;  %v5002_v14 = vld [vmem:[%s6869_s0 + $0x1d8] sm:$0xff] }
  0x80   : > { %668 = vadd.xlane.f32.xlu1 %v667_v28  ;;  %v690_v28 = vadd.f32 %v4940_v0, %v4935_v63  ;;  %v4994_v0 = vld [vmem:[%s6869_s0 + $0x1e8] sm:$0xff]  ;;  %6985 = vst [vmem:[#allocation19_spill] sm:$0xff] %v5002_v14  ;;  %v5007_v10 = vld [vmem:[%s6869_s0 + $0x1f8] sm:$0xff] }
  0x81   : > { %6984 = vst [vmem:[#allocation18_spill] sm:$0xff] %v4994_v0  ;;  %6986 = vst [vmem:[#allocation20_spill] sm:$0xff] %v5007_v10 }
  0x82   : > { %672 = vadd.xlane.f32.xlu0 %v671_v41  ;;  %v4971_v41 = vld [vmem:[%s6869_s0 + $0x1c8] sm:$0xff] }
  0x83   : > { %6980 = vst [vmem:[#allocation14_spill] sm:$0xff] %v4971_v41 }
  0x84   : > { %676 = vadd.xlane.f32.xlu1 %v675_v54  ;;  %v687_v54 = vadd.f32 %v686_v5, %v4948_v9  ;;  %v698_v5 = vadd.f32 %v4976_v42, %v4971_v41  ;;  %v702_v42 = vadd.f32 %v4994_v0, %v4989_v49  ;;  %v5020_v41 = vld [vmem:[%s6869_s0 + $0x1f0] sm:$0xff] }
  0x85   : > { %6988 = vst [vmem:[#allocation22_spill] sm:$0xff] %v5020_v41  ;;  %v4003_v49 = vld [vmem:[%s5035_s10 + $0x454] ss:$24 sps:$4 sm:$0xff]  }
  0x86   : > { %680 = vadd.xlane.f32.xlu0 %v679_v4  ;;  %v691_v4 = vadd.f32 %v690_v28, %v4966_v32  ;;  %v695_v28 = vadd.f32 %v694_v58, %v4984_v53  ;;  %v699_v9 = vadd.f32 %v698_v5, %v5002_v14  ;;  %v703_v58 = vadd.f32 %v702_v42, %v5020_v41  ;;  %v3981_v42 = vld [vmem:[%s5035_s10 + $0x150] ss:$24 sps:$4 sm:$0xff]   ;;  %v3991_v41 = vld [vmem:[%s5035_s10 + $0x94] ss:$24 sps:$4 sm:$0xff]   ;;  %v5100_v53 = vld [vmem:[%s6869_s0 + $0x220] sm:$0xff] }
  0x87   : > { %v3987_v5 = vld [vmem:[%s5035_s10 + $0xf0] ss:$24 sps:$4 sm:$0xff]   ;;  %2435 = vmatprep.subr.bf16.mxu1 %v4003_v49  ;;  %v5062_v49 = vld [vmem:[%s6869_s0 + $0x240] sm:$0xf] }
  0x88   : > { %684 = vadd.xlane.f32.xlu1 %v683_v15  ;;  %v5012_v15 = vld [vmem:[%s6869_s0 + $0x200] sm:$0xff]  ;;  %6991 = vst [vmem:[#allocation25_spill] sm:$0xff] %v5062_v49 }
  0x89   : > { %6987 = vst [vmem:[#allocation21_spill] sm:$0xff] %v5012_v15  ;;  %v706_v32 = vadd.f32 %v5012_v15, %v5007_v10  ;;  %v4002_v15 = vld [vmem:[%s5035_s10] ss:$24 sps:$4 sm:$0xff]  }
  0x8a   : > { %688 = vadd.xlane.f32.xlu0 %v687_v54  ;;  %v5028_v54 = vld [vmem:[%s6869_s0 + $0x208] sm:$0xff] }
  0x8b   : > { %6989 = vst [vmem:[#allocation23_spill] sm:$0xff] %v5028_v54  ;;  %v707_v0 = vadd.f32 %v706_v32, %v5028_v54  ;;  %v3984_v32 = vld [vmem:[%s5035_s10 + $0x120] ss:$24 sps:$4 sm:$0xff]   ;;  %v3997_v54 = vld [vmem:[%s5035_s10 + $0x34] ss:$24 sps:$4 sm:$0xff]  }
  0x8c   : > { %692 = vadd.xlane.f32.xlu1 %v691_v4  ;;  %v3985_v4 = vld [vmem:[%s5035_s10 + $0xf4] ss:$24 sps:$4 sm:$0xff]  }
  0x8e   : > { %696 = vadd.xlane.f32.xlu0 %v695_v28  ;;  %v3988_v28 = vld [vmem:[%s5035_s10 + $0xc4] ss:$24 sps:$4 sm:$0xff]  }
  0x90   : > { %700 = vadd.xlane.f32.xlu1 %v699_v9  ;;  %v3979_v9 = vld [vmem:[%s5035_s10 + $0x154] ss:$24 sps:$4 sm:$0xff]  }
  0x91   : > { %2274 = vmatprep.subr.bf16.mxu0 %v3979_v9  ;;  %v3993_v9 = vld [vmem:[%s5035_s10 + $0x90] ss:$24 sps:$4 sm:$0xff]  }
  0x92   : > { %704 = vadd.xlane.f32.xlu0 %v703_v58  ;;  %2275 = vmatpush1.bf16.msra.mxu0 %v3981_v42  ;;  %v3990_v58 = vld [vmem:[%s5035_s10 + $0xc0] ss:$24 sps:$4 sm:$0xff]   ;;  %v3994_v42 = vld [vmem:[%s5035_s10 + $0x64] ss:$24 sps:$4 sm:$0xff]  }
  0x94   : > { %708 = vadd.xlane.f32.xlu1 %v707_v0  ;;  %v3982_v0 = vld [vmem:[%s5035_s10 + $0x124] ss:$24 sps:$4 sm:$0xff]  }
  0x95   : > { %2276 = vmatprep.subr.bf16.mxu0 %v3982_v0  ;;  %v3996_v0 = vld [vmem:[%s5035_s10 + $0x60] ss:$24 sps:$4 sm:$0xff]  }
  0x96   : > { %2277 = vmatpush1.bf16.msra.mxu0 %v3984_v32  ;;  %v3999_v32 = vld [vmem:[%s5035_s10 + $0x30] ss:$24 sps:$4 sm:$0xff]  }
  0x97   : > { %2278 = vmatprep.subr.bf16.mxu0 %v3985_v4  ;;  %v4000_v4 = vld [vmem:[%s5035_s10 + $0x4] ss:$24 sps:$4 sm:$0xff]  }
  0x9a   : > { %2279 = vmatpush1.bf16.msra.mxu0 %v3987_v5  ;;  %v5057_v5 = vld [vmem:[%s6869_s0 + $0x210] sm:$0xff] }
  0x9b   : > { %2280 = vmatprep.subr.bf16.mxu0 %v3988_v28  ;;  %6990 = vst [vmem:[#allocation24_spill] sm:$0xff] %v5057_v5  ;;  %v5082_v28 = vld [vmem:[%s6869_s0 + $0x230] sm:$0xff] }
  0x9c   : > { %6995 = vst [vmem:[#allocation29_spill] sm:$0xff] %v5082_v28 }
  0x9e   : > { %2281 = vmatpush1.bf16.msra.mxu0 %v3990_v58  ;;  %v5087_v58 = vld [vmem:[%s6869_s0 + $0x250] sm:$0xf] }
  0x9f   : > { %2282 = vmatprep.subr.bf16.mxu0 %v3991_v41  ;;  %v5067_v41 = vld [vmem:[%s6869_s0 + $0x248] sm:$0xf]  ;;  %v722_v63 = vsel %vm718_vm0, %v5087_v58, 0.0 }
  0xa0   : > { %6992 = vst [vmem:[#allocation26_spill] sm:$0xff] %v5067_v41 }
  0xa2   : > { %2283 = vmatpush1.bf16.msra.mxu0 %v3993_v9  ;;  %v719_v9 = vsel %vm718_vm0, %v5062_v49, 0.0  ;;  %v5105_v49 = vld [vmem:[%s6869_s0 + $0x238] sm:$0xff] }
  0xa3   : > { %2284 = vmatprep.subr.bf16.mxu0 %v3994_v42  ;;  %v720_v42 = vsel %vm718_vm0, %v5067_v41, 0.0 }
  0xa4   : > { %v721_v41 = vadd.f32 %v720_v42, %v719_v9 }
  0xa6   : > { %2285 = vmatpush1.bf16.msra.mxu0 %v3996_v0 }
  0xa7   : > { %2286 = vmatprep.subr.bf16.mxu0 %v3997_v54  ;;  %v5077_v54 = vld [vmem:[%s6869_s0 + $0x228] sm:$0xff] }
  0xa8   : > { %6994 = vst [vmem:[#allocation28_spill] sm:$0xff] %v5077_v54 }
  0xaa   : > { %2287 = vmatpush1.bf16.msra.mxu0 %v3999_v32 }
  0xab   : > { %2288 = vmatprep.subr.bf16.mxu0 %v4000_v4  ;;  %v714_v4 = vadd.f32 %v5082_v28, %v5077_v54 }
  0xad   : > { %v5120_v27 = vadd.f32 %v714_v4, %v5105_v49 }
  0xae   : > { %2289 = vmatpush1.bf16.msra.mxu0 %v4002_v15  ;;  %v5072_v15 = vld [vmem:[%s6869_s0 + $0x218] sm:$0xff] }
  0xaf   : > { %6993 = vst [vmem:[#allocation27_spill] sm:$0xff] %v5072_v15  ;;  %v710_v32 = vadd.f32 %v5072_v15, %v5057_v5 }
  0xb1   : > { %v711_v48 = vadd.f32 %v710_v32, %v5100_v53 }
  0xf3   : > { %v625_v0 = vpop.xlane.xlu0 %624 }
  0xf4   : > { %v727_v10 = vmul.f32 0.0026041667, %v625_v0 }
  0xf5   : > { %v633_v14 = vpop.xlane.xlu1 %632 }
  0xf6   : > { %v5110_v15 = vsub.f32 %v4639_v16, %v727_v10  ;;  %v5113_v0 = vsub.f32 %v4644_v17, %v727_v10  ;;  %v5116_v28 = vsub.f32 %v4649_v18, %v727_v10  ;;  %v729_v54 = vmul.f32 0.0026041667, %v633_v14 }
  0xf7   : > { %v629_v5 = vpop.xlane.xlu0 %628 }
  0xf8   : > { %6996 = vst [vmem:[#allocation30_spill] sm:$0xff] %v5110_v15  ;;  %6997 = vst [vmem:[#allocation31_spill] sm:$0xff] %v5113_v0  ;;  %v728_v9 = vmul.f32 0.0026041667, %v629_v5  ;;  %v5123_v42 = vsub.f32 %v4673_v24, %v729_v54  ;;  %v5126_v16 = vsub.f32 %v4678_v25, %v729_v54  ;;  %v5129_v17 = vsub.f32 %v4683_v26, %v729_v54 }
  0xf9   : > { %6998 = vst [vmem:[#allocation32_spill] sm:$0xff] %v5116_v28  ;;  %v827_v18 = vmul.f32 %v5110_v15, %v5110_v15  ;;  %v828_v10 = vmul.f32 %v5113_v0, %v5113_v0  ;;  %v829_v14 = vmul.f32 %v5116_v28, %v5116_v28  ;;  %v637_v32 = vpop.xlane.xlu1 %636  ;;  %v5137_v5 = vadd.f32 %v722_v63, %v721_v41 }
  0xfa   : > { %6999 = vst [vmem:[#allocation33_spill] sm:$0xff] %v5123_v42  ;;  %7000 = vst [vmem:[#allocation34_spill] sm:$0xff] %v5126_v16  ;;  %v5140_v24 = vsub.f32 %v4656_v20, %v728_v9  ;;  %v5143_v25 = vsub.f32 %v4661_v21, %v728_v9  ;;  %v5146_v26 = vsub.f32 %v4666_v22, %v728_v9  ;;  %v730_v54 = vmul.f32 0.0026041667, %v637_v32 }
  0xfb   : > { %7001 = vst [vmem:[#allocation35_spill] sm:$0xff] %v5129_v17  ;;  %v902_v4 = vadd.f32 %v828_v10, %v827_v18  ;;  %v641_v15 = vpop.xlane.xlu0 %640  ;;  %v833_v0 = vmul.f32 %v5123_v42, %v5123_v42  ;;  %v834_v28 = vmul.f32 %v5126_v16, %v5126_v16  ;;  %v835_v63 = vmul.f32 %v5129_v17, %v5129_v17 }
  0xfc   : > { %v5155_v20 = vsub.f32 %v4691_v29, %v730_v54  ;;  %v5158_v21 = vsub.f32 %v4696_v30, %v730_v54  ;;  %v5161_v22 = vsub.f32 %v4701_v31, %v730_v54  ;;  %v830_v41 = vmul.f32 %v5140_v24, %v5140_v24 }
  0xfd   : > { %v903_v9 = vadd.f32 %v902_v4, %v829_v14  ;;  %v831_v18 = vmul.f32 %v5143_v25, %v5143_v25  ;;  %v832_v10 = vmul.f32 %v5146_v26, %v5146_v26  ;;  %v645_v32 = vpop.xlane.xlu1 %644  ;;  %v731_v42 = vmul.f32 0.0026041667, %v641_v15 }
  0xfe   : > { %7002 = vst [vmem:[#allocation36_spill] sm:$0xff] %v5155_v20  ;;  %v732_v29 = vmul.f32 0.0026041667, %v645_v32  ;;  %v910_v17 = vadd.f32 %v834_v28, %v833_v0  ;;  %v836_v30 = vmul.f32 %v5155_v20, %v5155_v20  ;;  %v837_v31 = vmul.f32 %v5158_v21, %v5158_v21 }
  0xff   : > { %904 = vadd.xlane.f32.xlu0 %v903_v9  ;;  %v906_v54 = vadd.f32 %v831_v18, %v830_v41  ;;  %v5174_v14 = vsub.f32 %v4720_v37, %v731_v42  ;;  %v5177_v4 = vsub.f32 %v4725_v38, %v731_v42  ;;  %v5180_v16 = vsub.f32 %v4730_v39, %v731_v42  ;;  %v649_v15 = vpop.xlane.xlu0 %648 }
 0x100   : > { %v5183_v28 = vsub.f32 %v4708_v33, %v732_v29  ;;  %v5186_v0 = vsub.f32 %v4713_v34, %v732_v29  ;;  %v5189_v32 = vsub.f32 %v4750_v45, %v732_v29  ;;  %v911_v41 = vadd.f32 %v910_v17, %v835_v63 }
 0x101   : > { %v907_v9 = vadd.f32 %v906_v54, %v832_v10  ;;  %v653_v37 = vpop.xlane.xlu1 %652  ;;  %v733_v18 = vmul.f32 0.0026041667, %v649_v15  ;;  %v838_v38 = vmul.f32 %v5161_v22, %v5161_v22  ;;  %v914_v20 = vadd.f32 %v837_v31, %v836_v30 }
 0x102   : > { %v734_v39 = vmul.f32 0.0026041667, %v653_v37  ;;  %v842_v42 = vmul.f32 %v5183_v28, %v5183_v28  ;;  %v843_v33 = vmul.f32 %v5186_v0, %v5186_v0  ;;  %v844_v34 = vmul.f32 %v5189_v32, %v5189_v32 }
 0x103   : > { %712 = vadd.xlane.f32.xlu0 %v711_v48  ;;  %908 = vadd.xlane.f32.xlu1 %v907_v9  ;;  %v5200_v45 = vsub.f32 %v4740_v43, %v733_v18  ;;  %v5203_v17 = vsub.f32 %v4745_v44, %v733_v18  ;;  %v5206_v63 = vsub.f32 %v4768_v50, %v733_v18  ;;  %v657_v10 = vpop.xlane.xlu0 %656 }
 0x104   : > { %v5209_v29 = vsub.f32 %v4755_v46, %v734_v39  ;;  %v5212_v30 = vsub.f32 %v4760_v47, %v734_v39  ;;  %v5215_v31 = vsub.f32 %v4786_v55, %v734_v39  ;;  %v915_v48 = vadd.f32 %v914_v20, %v838_v38 }
 0x105   : > { %v661_v54 = vpop.xlane.xlu1 %660  ;;  %v735_v43 = vmul.f32 0.0026041667, %v657_v10  ;;  %v922_v15 = vadd.f32 %v843_v33, %v842_v42  ;;  %v839_v44 = vmul.f32 %v5174_v14, %v5174_v14  ;;  %v840_v50 = vmul.f32 %v5177_v4, %v5177_v4  ;;  %v4005_v33 = vld [vmem:[%s5035_s10 + $0x2d4] ss:$24 sps:$4 sm:$0xff]  }
 0x106   : > { %7003 = vst [vmem:[#allocation37_spill] sm:$0xff] %v5209_v29  ;;  %v736_v46 = vmul.f32 0.0026041667, %v661_v54  ;;  %v841_v47 = vmul.f32 %v5180_v16, %v5180_v16  ;;  %v848_v55 = vmul.f32 %v5209_v29, %v5209_v29  ;;  %v849_v20 = vmul.f32 %v5212_v30, %v5212_v30  ;;  %v4008_v29 = vld [vmem:[%s5035_s10 + $0x2d0] ss:$24 sps:$4 sm:$0xff]   ;;  %2290 = vmatprep.subr.bf16.mxu0 %v4005_v33 }
 0x107   : > { %912 = vadd.xlane.f32.xlu0 %v911_v41  ;;  %716 = vadd.xlane.f32.xlu1 %v5120_v27  ;;  %v5229_v9 = vsub.f32 %v4773_v51, %v735_v43  ;;  %v5232_v37 = vsub.f32 %v4778_v52, %v735_v43  ;;  %v5235_v18 = vsub.f32 %v4804_v60, %v735_v43  ;;  %v665_v38 = vpop.xlane.xlu0 %664  ;;  %v4007_v51 = vld [vmem:[%s5035_s10 + $0x450] ss:$24 sps:$4 sm:$0xff]  }
 0x108   : > { %v5238_v39 = vsub.f32 %v4791_v56, %v736_v46  ;;  %v5241_v42 = vsub.f32 %v4796_v57, %v736_v46  ;;  %v5244_v41 = vsub.f32 %v4822_v1, %v736_v46  ;;  %v923_v27 = vadd.f32 %v922_v15, %v844_v34  ;;  %2436 = vmatpush1.bf16.msra.mxu1 %v4007_v51 }
 0x109   : > { %v918_v10 = vadd.f32 %v840_v50, %v839_v44  ;;  %v669_v54 = vpop.xlane.xlu1 %668  ;;  %v737_v52 = vmul.f32 0.0026041667, %v665_v38  ;;  %v850_v60 = vmul.f32 %v5215_v31, %v5215_v31  ;;  %v930_v43 = vadd.f32 %v849_v20, %v848_v55  ;;  %v4009_v55 = vld [vmem:[%s5035_s10 + $0x424] ss:$24 sps:$4 sm:$0xff]   ;;  %2291 = vmatpush2.bf16.msra.mxu0 %v4008_v29 }
 0x10a   : > { %v738_v56 = vmul.f32 0.0026041667, %v669_v54  ;;  %v845_v57 = vmul.f32 %v5200_v45, %v5200_v45  ;;  %v846_v1 = vmul.f32 %v5203_v17, %v5203_v17  ;;  %v847_v34 = vmul.f32 %v5206_v63, %v5206_v63  ;;  %2437 = vmatprep.subr.bf16.mxu1 %v4009_v55 }
 0x10b   : > { %724 = vadd.xlane.f32.xlu0 %v5137_v5  ;;  %916 = vadd.xlane.f32.xlu1 %v915_v48  ;;  %v919_v15 = vadd.f32 %v918_v10, %v841_v47  ;;  %v5259_v44 = vsub.f32 %v4809_v61, %v737_v52  ;;  %v5262_v50 = vsub.f32 %v4814_v62, %v737_v52  ;;  %v673_v46 = vpop.xlane.xlu0 %672  ;;  %v4011_v61 = vld [vmem:[%s5035_s10 + $0x2a4] ss:$24 sps:$4 sm:$0xff]   ;;  %v4013_v48 = vld [vmem:[%s5035_s10 + $0x420] ss:$24 sps:$4 sm:$0xff]  }
 0x10c   : > { %v5266_v20 = vsub.f32 %v4827_v2, %v738_v56  ;;  %v5269_v38 = vsub.f32 %v4832_v3, %v738_v56  ;;  %v5272_v33 = vsub.f32 %v4858_v11, %v738_v56  ;;  %v5275_v5 = vsub.f32 %v4840_v6, %v737_v52  ;;  %v4014_v3 = vld [vmem:[%s5035_s10 + $0x2a0] ss:$24 sps:$4 sm:$0xff]   ;;  %2292 = vmatprep.subr.bf16.mxu0 %v4011_v61 }
 0x10d   : > { %7004 = vst [vmem:[#allocation38_spill] sm:$0xff] %v5259_v44  ;;  %v931_v62 = vadd.f32 %v930_v43, %v850_v60  ;;  %v926_v47 = vadd.f32 %v846_v1, %v845_v57  ;;  %v677_v51 = vpop.xlane.xlu1 %676  ;;  %v739_v10 = vmul.f32 0.0026041667, %v673_v46  ;;  %v854_v2 = vmul.f32 %v5238_v39, %v5238_v39  ;;  %2438 = vmatpush1.bf16.msra.mxu1 %v4013_v48  ;;  %v4015_v57 = vld [vmem:[%s5035_s10 + $0x3f4] ss:$24 sps:$4 sm:$0xff]  }
 0x10e   : > { %7005 = vst [vmem:[#allocation39_spill] sm:$0xff] %v5266_v20  ;;  %7006 = vst [vmem:[#allocation40_spill] sm:$0xff] %v5272_v33  ;;  %v740_v54 = vmul.f32 0.0026041667, %v677_v51  ;;  %v855_v11 = vmul.f32 %v5241_v42, %v5241_v42  ;;  %v856_v6 = vmul.f32 %v5244_v41, %v5244_v41  ;;  %v851_v29 = vmul.f32 %v5229_v9, %v5229_v9  ;;  %v4020_v48 = vld [vmem:[%s5035_s10 + $0x270] ss:$24 sps:$4 sm:$0xff]  }
 0x10f   : > { %924 = vadd.xlane.f32.xlu0 %v923_v27  ;;  %920 = vadd.xlane.f32.xlu1 %v919_v15  ;;  %v927_v52 = vadd.f32 %v926_v47, %v847_v34  ;;  %v5289_v60 = vsub.f32 %v4845_v7, %v739_v10  ;;  %v5292_v43 = vsub.f32 %v4850_v8, %v739_v10  ;;  %v681_v56 = vpop.xlane.xlu0 %680  ;;  %v4017_v7 = vld [vmem:[%s5035_s10 + $0x274] ss:$24 sps:$4 sm:$0xff]   ;;  %v4019_v34 = vld [vmem:[%s5035_s10 + $0x3f0] ss:$24 sps:$4 sm:$0xff]  }
 0x110   : > { %v5296_v1 = vsub.f32 %v4863_v12, %v740_v54  ;;  %v5299_v46 = vsub.f32 %v4868_v13, %v740_v54  ;;  %v5302_v55 = vsub.f32 %v4894_v35, %v740_v54  ;;  %v5305_v27 = vsub.f32 %v4876_v19, %v739_v10  ;;  %2293 = vmatpush2.bf16.msra.mxu0 %v4014_v3 }
 0x111   : > { %7007 = vst [vmem:[#allocation41_spill] sm:$0xff] %v5289_v60  ;;  %7008 = vst [vmem:[#allocation42_spill] sm:$0xff] %v5292_v43  ;;  %v938_v8 = vadd.f32 %v855_v11, %v854_v2  ;;  %v852_v15 = vmul.f32 %v5232_v37, %v5232_v37  ;;  %v853_v12 = vmul.f32 %v5235_v18, %v5235_v18  ;;  %v685_v61 = vpop.xlane.xlu1 %684  ;;  %v741_v13 = vmul.f32 0.0026041667, %v681_v56  ;;  %v4021_v11 = vld [vmem:[%s5035_s10 + $0x3c4] ss:$24 sps:$4 sm:$0xff]  }
 0x112   : > { %7009 = vst [vmem:[#allocation43_spill] sm:$0xff] %v5296_v1  ;;  %7010 = vst [vmem:[#allocation44_spill] sm:$0xff] %v5299_v46  ;;  %2439 = vmatprep.subr.bf16.mxu1 %v4015_v57  ;;  %v742_v35 = vmul.f32 0.0026041667, %v685_v61  ;;  %v860_v19 = vmul.f32 %v5266_v20, %v5266_v20  ;;  %v861_v47 = vmul.f32 %v5269_v38, %v5269_v38  ;;  %2294 = vmatprep.subr.bf16.mxu0 %v4017_v7  ;;  %v7017_v7 = vld [vmem:[#allocation4_spill] sm:$0xff] }
 0x113   : > { %7011 = vst [vmem:[#allocation45_spill] sm:$0xff] %v5302_v55  ;;  %7012 = vst [vmem:[#allocation46_spill] sm:$0xff] %v5305_v27  ;;  %v862_v51 = vmul.f32 %v5272_v33, %v5272_v33  ;;  %2440 = vmatpush1.bf16.msra.mxu1 %v4019_v34  ;;  %932 = vadd.xlane.f32.xlu0 %v931_v62  ;;  %v939_v10 = vadd.f32 %v938_v8, %v856_v6  ;;  %v689_v54 = vpop.xlane.xlu0 %688  ;;  %v4023_v6 = vld [vmem:[%s5035_s10 + $0x244] ss:$24 sps:$4 sm:$0xff]  }
 0x114   : > { %928 = vadd.xlane.f32.xlu1 %v927_v52  ;;  %v934_v2 = vadd.f32 %v852_v15, %v851_v29  ;;  %v5321_v3 = vsub.f32 %v4881_v23, %v741_v13  ;;  %v5325_v56 = vsub.f32 %v4899_v36, %v742_v35  ;;  %v5328_v57 = vsub.f32 %v4904_v40, %v742_v35  ;;  %v4025_v29 = vld [vmem:[%s5035_s10 + $0x3c0] ss:$24 sps:$4 sm:$0xff]   ;;  %v7018_v52 = vld [vmem:[#allocation5_spill] sm:$0xff] }
 0x115   : > { %v5331_v61 = vsub.f32 %v4930_v59, %v742_v35  ;;  %v5334_v62 = vsub.f32 %v7017_v7, %v741_v13  ;;  %2295 = vmatpush2.bf16.msra.mxu0 %v4020_v48  ;;  %v5339_v34 = vsub.f32 %v7018_v52, %v741_v13  ;;  %v946_v8 = vadd.f32 %v861_v47, %v860_v19  ;;  %v693_v40 = vpop.xlane.xlu1 %692  ;;  %v4026_v15 = vld [vmem:[%s5035_s10 + $0x240] ss:$24 sps:$4 sm:$0xff]  }
 0x116   : > { %7013 = vst [vmem:[#allocation47_spill] sm:$0xff] %v5321_v3  ;;  %7014 = vst [vmem:[#allocation48_spill] sm:$0xff] %v5325_v56  ;;  %v935_v23 = vadd.f32 %v934_v2, %v853_v12  ;;  %v857_v36 = vmul.f32 %v5259_v44, %v5259_v44  ;;  %2441 = vmatprep.subr.bf16.mxu1 %v4021_v11  ;;  %v858_v59 = vmul.f32 %v5262_v50, %v5262_v50  ;;  %v4027_v11 = vld [vmem:[%s5035_s10 + $0x394] ss:$24 sps:$4 sm:$0xff]   ;;  %v7019_v52 = vld [vmem:[#allocation8_spill] sm:$0xff] }
 0x117   : > { %7015 = vst [vmem:[#allocation49_spill] sm:$0xff] %v5328_v57  ;;  %7016 = vst [vmem:[#allocation50_spill] sm:$0xff] %v5331_v61  ;;  %v859_v48 = vmul.f32 %v5275_v5, %v5275_v5  ;;  %v744_v35 = vmul.f32 0.0026041667, %v693_v40  ;;  %v743_v12 = vmul.f32 0.0026041667, %v689_v54  ;;  %2296 = vmatprep.subr.bf16.mxu0 %v4023_v6  ;;  %2442 = vmatpush1.bf16.msra.mxu1 %v4025_v29  ;;  %v697_v2 = vpop.xlane.xlu0 %696 }
 0x118   : > { %940 = vadd.xlane.f32.xlu0 %v939_v10  ;;  %936 = vadd.xlane.f32.xlu1 %v935_v23  ;;  %v947_v13 = vadd.f32 %v946_v8, %v862_v51  ;;  %v866_v19 = vmul.f32 %v5296_v1, %v5296_v1  ;;  %v867_v47 = vmul.f32 %v5299_v46, %v5299_v46  ;;  %v7021_v54 = vld [vmem:[#allocation9_spill] sm:$0xff]  ;;  %v7024_v23 = vld [vmem:[#allocation6_spill] sm:$0xff]  ;;  %v7025_v1 = vld [vmem:[#allocation7_spill] sm:$0xff] }
 0x119   : > { %v942_v7 = vadd.f32 %v858_v59, %v857_v36  ;;  %v5354_v40 = vsub.f32 %v7019_v52, %v744_v35  ;;  %v5357_v20 = vsub.f32 %v7021_v54, %v744_v35  ;;  %v7023_v6 = vld [vmem:[#allocation13_spill] sm:$0xff]  ;;  %2297 = vmatpush2.bf16.msra.mxu0 %v4026_v15  ;;  %v5365_v8 = vsub.f32 %v7024_v23, %v743_v12  ;;  %v7026_v44 = vld [vmem:[#allocation10_spill] sm:$0xff]  ;;  %v701_v52 = vpop.xlane.xlu1 %700 }
 0x11a   : > { %v5360_v10 = vsub.f32 %v7023_v6, %v744_v35  ;;  %v4029_v51 = vld [vmem:[%s5035_s10 + $0x214] ss:$24 sps:$4 sm:$0xff]   ;;  %v4031_v29 = vld [vmem:[%s5035_s10 + $0x390] ss:$24 sps:$4 sm:$0xff]   ;;  %v5368_v46 = vsub.f32 %v7025_v1, %v743_v12  ;;  %v5371_v36 = vsub.f32 %v7026_v44, %v743_v12  ;;  %v868_v59 = vmul.f32 %v5302_v55, %v5302_v55  ;;  %2443 = vmatprep.subr.bf16.mxu1 %v4027_v11 }
 0x11b   : > { %7020 = vst [vmem:[#allocation4_spill] sm:$0xff] %v5354_v40  ;;  %7022 = vst [vmem:[#allocation5_spill] sm:$0xff] %v5357_v20  ;;  %v4032_v35 = vld [vmem:[%s5035_s10 + $0x210] ss:$24 sps:$4 sm:$0xff]   ;;  %v943_v54 = vadd.f32 %v942_v7, %v859_v48  ;;  %v954_v15 = vadd.f32 %v867_v47, %v866_v19  ;;  %v863_v6 = vmul.f32 %v5289_v60, %v5289_v60  ;;  %2298 = vmatprep.subr.bf16.mxu0 %v4029_v51  ;;  %v4033_v48 = vld [vmem:[%s5035_s10 + $0x364] ss:$24 sps:$4 sm:$0xff]  }
 0x11c   : > { %v864_v1 = vmul.f32 %v5292_v43, %v5292_v43  ;;  %948 = vadd.xlane.f32.xlu0 %v947_v13  ;;  %v865_v44 = vmul.f32 %v5305_v27, %v5305_v27  ;;  %v746_v12 = vmul.f32 0.0026041667, %v701_v52  ;;  %v745_v23 = vmul.f32 0.0026041667, %v697_v2  ;;  %2444 = vmatpush1.bf16.msra.mxu1 %v4031_v29  ;;  %v4035_v51 = vld [vmem:[%s5035_s10 + $0x1e4] ss:$24 sps:$4 sm:$0xff]  }
 0x11d   : > { %v872_v11 = vmul.f32 %v5325_v56, %v5325_v56  ;;  %944 = vadd.xlane.f32.xlu1 %v943_v54  ;;  %v955_v19 = vadd.f32 %v954_v15, %v868_v59  ;;  %v873_v7 = vmul.f32 %v5328_v57, %v5328_v57  ;;  %v874_v13 = vmul.f32 %v5331_v61, %v5331_v61  ;;  %v4037_v60 = vld [vmem:[%s5035_s10 + $0x360] ss:$24 sps:$4 sm:$0xff]   ;;  %v7027_v55 = vld [vmem:[#allocation14_spill] sm:$0xff]  ;;  %v709_v15 = vpop.xlane.xlu1 %708 }
 0x11e   : > { %v950_v47 = vadd.f32 %v864_v1, %v863_v6  ;;  %v5392_v52 = vsub.f32 %v7027_v55, %v746_v12  ;;  %v7029_v2 = vld [vmem:[#allocation15_spill] sm:$0xff]  ;;  %v705_v6 = vpop.xlane.xlu0 %704  ;;  %2299 = vmatpush2.bf16.msra.mxu0 %v4032_v35  ;;  %v7034_v57 = vld [vmem:[#allocation12_spill] sm:$0xff]  ;;  %2445 = vmatprep.subr.bf16.mxu1 %v4033_v48  ;;  %v871_v35 = vmul.f32 %v5339_v34, %v5339_v34 }
 0x11f   : > { %v5395_v27 = vsub.f32 %v7029_v2, %v746_v12  ;;  %v7030_v29 = vld [vmem:[#allocation19_spill] sm:$0xff]  ;;  %v5405_v43 = vsub.f32 %v7034_v57, %v745_v23  ;;  %v7035_v55 = vld [vmem:[#allocation16_spill] sm:$0xff]  ;;  %v962_v2 = vadd.f32 %v873_v7, %v872_v11  ;;  %2300 = vmatprep.subr.bf16.mxu0 %v4035_v51  ;;  %v4039_v57 = vld [vmem:[%s5035_s10 + $0x334] ss:$24 sps:$4 sm:$0xff]   ;;  %v878_v11 = vmul.f32 %v5354_v40, %v5354_v40 }
 0x120   : > { %7028 = vst [vmem:[#allocation8_spill] sm:$0xff] %v5392_v52  ;;  %v5398_v56 = vsub.f32 %v7030_v29, %v746_v12  ;;  %v7032_v54 = vld [vmem:[#allocation11_spill] sm:$0xff]  ;;  %v951_v61 = vadd.f32 %v950_v47, %v865_v44  ;;  %v5408_v33 = vsub.f32 %v7035_v55, %v745_v23  ;;  %956 = vadd.xlane.f32.xlu0 %v955_v19  ;;  %v748_v44 = vmul.f32 0.0026041667, %v709_v15  ;;  %v4041_v19 = vld [vmem:[%s5035_s10 + $0x1b4] ss:$24 sps:$4 sm:$0xff]  }
 0x121   : > { %v5401_v59 = vsub.f32 %v7032_v54, %v745_v23  ;;  %v4038_v1 = vld [vmem:[%s5035_s10 + $0x1e0] ss:$24 sps:$4 sm:$0xff]   ;;  %v869_v12 = vmul.f32 %v5321_v3, %v5321_v3  ;;  %v870_v29 = vmul.f32 %v5334_v62, %v5334_v62  ;;  %v963_v47 = vadd.f32 %v962_v2, %v874_v13  ;;  %2446 = vmatpush1.bf16.msra.mxu1 %v4037_v60  ;;  %v7039_v3 = vld [vmem:[#allocation21_spill] sm:$0xff]  ;;  %v7045_v2 = vld [vmem:[#allocation18_spill] sm:$0xff] }
 0x122   : > { %7031 = vst [vmem:[#allocation9_spill] sm:$0xff] %v5398_v56  ;;  %7036 = vst [vmem:[#allocation6_spill] sm:$0xff] %v5408_v33  ;;  %952 = vadd.xlane.f32.xlu1 %v951_v61  ;;  %v747_v23 = vmul.f32 0.0026041667, %v705_v6  ;;  %v879_v48 = vmul.f32 %v5357_v20, %v5357_v20  ;;  %v7037_v54 = vld [vmem:[#allocation20_spill] sm:$0xff]  ;;  %v5426_v15 = vsub.f32 %v7039_v3, %v748_v44  ;;  %v7041_v51 = vld [vmem:[#allocation23_spill] sm:$0xff]  ;;  %2301 = vmatpush2.bf16.msra.mxu0 %v4038_v1 }
 0x123   : > { %7033 = vst [vmem:[#allocation13_spill] sm:$0xff] %v5401_v59  ;;  %v958_v7 = vadd.f32 %v870_v29, %v869_v12  ;;  %v5423_v55 = vsub.f32 %v7037_v54, %v748_v44  ;;  %v5429_v61 = vsub.f32 %v7041_v51, %v748_v44  ;;  %v7043_v13 = vld [vmem:[#allocation17_spill] sm:$0xff]  ;;  %v7046_v60 = vld [vmem:[#allocation22_spill] sm:$0xff]  ;;  %v880_v12 = vmul.f32 %v5360_v10, %v5360_v10 }
 0x124   : > { %7040 = vst [vmem:[#allocation10_spill] sm:$0xff] %v5426_v15  ;;  %v5432_v6 = vsub.f32 %v7043_v13, %v747_v23  ;;  %v5435_v40 = vsub.f32 %v7045_v2, %v747_v23  ;;  %v5438_v20 = vsub.f32 %v7046_v60, %v747_v23  ;;  %2447 = vmatprep.subr.bf16.mxu1 %v4039_v57  ;;  %v4043_v3 = vld [vmem:[%s5035_s10 + $0x330] ss:$24 sps:$4 sm:$0xff]   ;;  %v4045_v2 = vld [vmem:[%s5035_s10 + $0x304] ss:$24 sps:$4 sm:$0xff]  }
 0x125   : > { %7038 = vst [vmem:[#allocation7_spill] sm:$0xff] %v5423_v55  ;;  %7042 = vst [vmem:[#allocation14_spill] sm:$0xff] %v5429_v61  ;;  %964 = vadd.xlane.f32.xlu0 %v963_v47  ;;  %v959_v29 = vadd.f32 %v958_v7, %v871_v35  ;;  %v970_v44 = vadd.f32 %v879_v48, %v878_v11  ;;  %v875_v1 = vmul.f32 %v5365_v8, %v5365_v8  ;;  %v4044_v47 = vld [vmem:[%s5035_s10 + $0x1b0] ss:$24 sps:$4 sm:$0xff]  }
 0x126   : > { %7044 = vst [vmem:[#allocation15_spill] sm:$0xff] %v5432_v6  ;;  %7047 = vst [vmem:[#allocation19_spill] sm:$0xff] %v5438_v20  ;;  %v876_v54 = vmul.f32 %v5368_v46, %v5368_v46  ;;  %v877_v51 = vmul.f32 %v5371_v36, %v5371_v36  ;;  %v884_v23 = vmul.f32 %v5392_v52, %v5392_v52  ;;  %2302 = vmatprep.subr.bf16.mxu0 %v4041_v19 }
 0x127   : > { %v885_v57 = vmul.f32 %v5395_v27, %v5395_v27  ;;  %v886_v35 = vmul.f32 %v5398_v56, %v5398_v56  ;;  %960 = vadd.xlane.f32.xlu1 %v959_v29  ;;  %v971_v11 = vadd.f32 %v970_v44, %v880_v12  ;;  %v881_v7 = vmul.f32 %v5401_v59, %v5401_v59  ;;  %v4047_v12 = vld [vmem:[%s5035_s10 + $0x184] ss:$24 sps:$4 sm:$0xff]   ;;  %v4049_v29 = vld [vmem:[%s5035_s10 + $0x300] ss:$24 sps:$4 sm:$0xff]  }
 0x128   : > { %v966_v48 = vadd.f32 %v876_v54, %v875_v1  ;;  %v882_v13 = vmul.f32 %v5405_v43, %v5405_v43  ;;  %v883_v52 = vmul.f32 %v5408_v33, %v5408_v33  ;;  %v890_v56 = vmul.f32 %v5423_v55, %v5423_v55  ;;  %2448 = vmatpush1.bf16.msra.mxu1 %v4043_v3  ;;  %v4050_v33 = vld [vmem:[%s5035_s10 + $0x180] ss:$24 sps:$4 sm:$0xff]  }
 0x129   : > { %v978_v60 = vadd.f32 %v885_v57, %v884_v23  ;;  %v891_v19 = vmul.f32 %v5426_v15, %v5426_v15  ;;  %972 = vadd.xlane.f32.xlu0 %v971_v11  ;;  %v892_v54 = vmul.f32 %v5429_v61, %v5429_v61  ;;  %v887_v23 = vmul.f32 %v5432_v6, %v5432_v6  ;;  %v7069_v61 = vld [vmem:[#allocation30_spill] sm:$0xff] }
 0x12a   : > { %v967_v44 = vadd.f32 %v966_v48, %v877_v51  ;;  %v974_v1 = vadd.f32 %v882_v13, %v881_v7  ;;  %v888_v55 = vmul.f32 %v5435_v40, %v5435_v40  ;;  %2303 = vmatpush2.bf16.msra.mxu0 %v4044_v47  ;;  %v889_v51 = vmul.f32 %v5438_v20, %v5438_v20  ;;  %v4053_v47 = vld [vmem:[%s5035_s10 + $0x15c] ss:$24 sps:$4 sm:$0xff]  }
 0x12b   : > { %v979_v57 = vadd.f32 %v978_v60, %v886_v35  ;;  %v986_v59 = vadd.f32 %v891_v19, %v890_v56  ;;  %2449 = vmatprep.subr.bf16.mxu1 %v4045_v2  ;;  %2304 = vmatprep.subr.bf16.mxu0 %v4047_v12  ;;  %v6929_v35 = vmov 0   ;;  %v1157_v2 = vlaneseq }
 0x12c   : > { %968 = vadd.xlane.f32.xlu1 %v967_v44  ;;  %v975_v3 = vadd.f32 %v974_v1, %v883_v52  ;;  %v982_v11 = vadd.f32 %v888_v55, %v887_v23  ;;  %2450 = vmatpush1.bf16.msra.mxu1 %v4049_v29  ;;  %v4068_v52 = vld [vmem:[%s5035_s10 + $0x45c] ss:$24 sps:$4 sm:$0xff]   ;;  %v7049_v44 = vld [vmem:[#allocation24_spill] sm:$0xff] }
 0x12d   : > { %980 = vadd.xlane.f32.xlu0 %v979_v57  ;;  %v987_v48 = vadd.f32 %v986_v59, %v892_v54  ;;  %2467 = vmatprep.mubr.bf16.mxu1 %v6929_v35  ;;  %v5481_v29 = vshrl.u32 %v1157_v2, 7  ;;  %v7051_v54 = vld [vmem:[#allocation27_spill] sm:$0xff]  ;;  %v7057_v2 = vld [vmem:[#allocation29_spill] sm:$0xff] }
 0x12e   : > { %2305 = vmatpush2.bf16.msra.mxu0 %v4050_v33  ;;  %v983_v56 = vadd.f32 %v982_v11, %v889_v51  ;;  %2596 = vmatprep.subr.bf16.mxu1 %v4053_v47 }
 0x12f   : > { %2757 = vmatprep.subr.bf16.mxu0 %v4068_v52  ;;  %7048 = vst [vmem:[#allocation11_spill] sm:$0xff] %v5481_v29 }
 0x130   : > { %976 = vadd.xlane.f32.xlu1 %v975_v3 }
 0x131   : > { %988 = vadd.xlane.f32.xlu0 %v987_v48 }
 0x134   : > { %984 = vadd.xlane.f32.xlu1 %v983_v56 }
 0x188   : > { %v905_v7 = vpop.xlane.xlu0 %904 }
 0x189   : > { %v1005_v13 = vmul.f32 0.0026041667, %v905_v7  ;;  %v5499_v7 = vsub.s32 1, %v5481_v29 }
 0x18b   : > { %v1030_v55 = vadd.f32 1e-05, %v1005_v13  ;;  %7054 = vst [vmem:[#allocation21_spill] sm:$0xff] %v5499_v7  ;;  %v7055_v13 = vld [vmem:[#allocation28_spill] sm:$0xff] }
 0x18c   : > { %v909_v60 = vpop.xlane.xlu1 %908  ;;  %v713_v19 = vpop.xlane.xlu0 %712 }
 0x18d   : > { %4195 = vrsqrt.f32 %v1030_v55  ;;  %v1006_v59 = vmul.f32 0.0026041667, %v909_v60  ;;  %v749_v12 = vmul.f32 0.0026041667, %v713_v19  ;;  %v1155_v19 = vld [vmem:[%s6870_s1] sm:$0x7] }
 0x18f   : > { %v1031_v33 = vadd.f32 1e-05, %v1006_v59  ;;  %v5484_v1 = vsub.f32 %v7049_v44, %v749_v12  ;;  %v5487_v23 = vsub.f32 %v7051_v54, %v749_v12  ;;  %v5490_v57 = vsub.f32 %v5100_v53, %v749_v12  ;;  %v1247_v59 = vld [vmem:[%s6871_s2] sm:$0x7] }
 0x190   : > { %v717_v3 = vpop.xlane.xlu1 %716  ;;  %v913_v51 = vpop.xlane.xlu0 %912 }
 0x191   : > { %7050 = vst [vmem:[#allocation12_spill] sm:$0xff] %v5484_v1  ;;  %7052 = vst [vmem:[#allocation16_spill] sm:$0xff] %v5487_v23  ;;  %4197 = vrsqrt.f32 %v1031_v33  ;;  %v750_v11 = vmul.f32 0.0026041667, %v717_v3  ;;  %v1007_v48 = vmul.f32 0.0026041667, %v913_v51  ;;  %v893_v56 = vmul.f32 %v5484_v1, %v5484_v1 }
 0x192   : > { %7053 = vst [vmem:[#allocation20_spill] sm:$0xff] %v5490_v57  ;;  %v894_v47 = vmul.f32 %v5487_v23, %v5487_v23  ;;  %v895_v52 = vmul.f32 %v5490_v57, %v5490_v57  ;;  %v5517_v3 = vsub.s32 2, %v5481_v29  ;;  %v5520_v51 = vsub.s32 0, %v5481_v29  ;;  %v7062_v1 = vld [vmem:[#allocation25_spill] sm:$0xff] }
 0x193   : > { %v5502_v53 = vsub.f32 %v7055_v13, %v750_v11  ;;  %v5505_v55 = vsub.f32 %v7057_v2, %v750_v11  ;;  %v1032_v60 = vadd.f32 1e-05, %v1007_v48  ;;  %v5514_v12 = vsub.f32 %v5105_v49, %v750_v11 }
 0x194   : > { %v917_v33 = vpop.xlane.xlu1 %916  ;;  %v725_v44 = vpop.xlane.xlu0 %724  ;;  %v990_v54 = vadd.f32 %v894_v47, %v893_v56  ;;  %7060 = vst [vmem:[#allocation22_spill] sm:$0xff] %v5517_v3  ;;  %7061 = vst [vmem:[#allocation24_spill] sm:$0xff] %v5520_v51  ;;  %v5527_v11 = vrot.slane %v1155_v19, %v5499_v7  ;;  %v5530_v56 = vrot.slane %v1247_v59, %v5499_v7 }
 0x195   : > { %7056 = vst [vmem:[#allocation23_spill] sm:$0xff] %v5502_v53  ;;  %7058 = vst [vmem:[#allocation17_spill] sm:$0xff] %v5505_v55  ;;  %4199 = vrsqrt.f32 %v1032_v60  ;;  %v1008_v48 = vmul.f32 0.0026041667, %v917_v33  ;;  %v751_v13 = vmul.f32 0.0026041667, %v725_v44  ;;  %v896_v2 = vmul.f32 %v5502_v53, %v5502_v53 }
 0x196   : > { %7059 = vst [vmem:[#allocation18_spill] sm:$0xff] %v5514_v12  ;;  %v991_v35 = vadd.f32 %v990_v54, %v895_v52  ;;  %v897_v49 = vmul.f32 %v5505_v55, %v5505_v55  ;;  %v7064_v60 = vld [vmem:[#allocation26_spill] sm:$0xff]  ;;  %v898_v53 = vmul.f32 %v5514_v12, %v5514_v12  ;;  %v5544_v7 = vrot.slane %v1155_v19, %v5517_v3 }
 0x197   : > { %v1033_v47 = vadd.f32 1e-05, %v1008_v48  ;;  %v5533_v29 = vsub.f32 %v7062_v1, %v751_v13  ;;  %v5536_v33 = vsub.f32 %v7064_v60, %v751_v13  ;;  %v5539_v44 = vsub.f32 %v5087_v58, %v751_v13 }
 0x198   : > { %992 = vadd.xlane.f32.xlu1 %v991_v35  ;;  %v921_v52 = vpop.xlane.xlu1 %920  ;;  %v925_v54 = vpop.xlane.xlu0 %924  ;;  %v994_v55 = vadd.f32 %v897_v49, %v896_v2  ;;  %v5547_v48 = vrot.slane %v1247_v59, %v5517_v3  ;;  %v5556_v49 = vrot.slane %v1155_v19, %v5520_v51 }
 0x199   : > { %7063 = vst [vmem:[#allocation27_spill] sm:$0xff] %v5533_v29  ;;  %7065 = vst [vmem:[#allocation28_spill] sm:$0xff] %v5536_v33  ;;  %4201 = vrsqrt.f32 %v1033_v47  ;;  %v1009_v1 = vmul.f32 0.0026041667, %v921_v52  ;;  %v1010_v60 = vmul.f32 0.0026041667, %v925_v54  ;;  %v899_v58 = vmul.f32 %v5533_v29, %v5533_v29 }
 0x19a   : > { %7066 = vst [vmem:[#allocation29_spill] sm:$0xff] %v5539_v44  ;;  %v4196_v13 = vpop.eup %4195  ;;  %v995_v35 = vadd.f32 %v994_v55, %v898_v53  ;;  %v900_v57 = vmul.f32 %v5536_v33, %v5536_v33  ;;  %v901_v2 = vmul.f32 %v5539_v44, %v5539_v44  ;;  %v7067_v52 = vld [vmem:[#allocation31_spill] sm:$0xff]  ;;  %v7068_v33 = vld [vmem:[#allocation32_spill] sm:$0xff] }
 0x19b   : > { %v1034_v12 = vadd.f32 1e-05, %v1009_v1  ;;  %v1035_v3 = vadd.f32 1e-05, %v1010_v60  ;;  %v998_v47 = vsel %vm718_vm0, %v899_v58, 0.0  ;;  %v1081_v54 = vmul.f32 %v4196_v13, %v7067_v52 }
 0x19c   : > { %996 = vadd.xlane.f32.xlu0 %v995_v35  ;;  %v933_v29 = vpop.xlane.xlu0 %932  ;;  %v999_v53 = vsel %vm718_vm0, %v900_v57, 0.0  ;;  %v1001_v55 = vsel %vm718_vm0, %v901_v2, 0.0  ;;  %v1082_v6 = vmul.f32 %v4196_v13, %v7068_v33  ;;  %v1080_v44 = vmul.f32 %v4196_v13, %v7069_v61 }
 0x19d   : > { %v929_v23 = vpop.xlane.xlu1 %928  ;;  %4203 = vrsqrt.f32 %v1034_v12  ;;  %v1012_v20 = vmul.f32 0.0026041667, %v933_v29  ;;  %v1000_v1 = vadd.f32 %v999_v53, %v998_v47  ;;  %v1173_v58 = vmul.f32 %v5527_v11, %v1081_v54 }
 0x19e   : > { %v1011_v19 = vmul.f32 0.0026041667, %v929_v23  ;;  %v4198_v60 = vpop.eup %4197  ;;  %4205 = vrsqrt.f32 %v1035_v3  ;;  %v1174_v35 = vmul.f32 %v5544_v7, %v1082_v6  ;;  %v5567_v52 = vrot.slane %v1247_v59, %v5520_v51 }
 0x19f   : > { %v1002_v15 = vadd.f32 %v1001_v55, %v1000_v1  ;;  %v1084_v2 = vmul.f32 %v4198_v60, %v5143_v25  ;;  %v1172_v33 = vmul.f32 %v5556_v49, %v1080_v44  ;;  %v1085_v29 = vmul.f32 %v4198_v60, %v5146_v26 }
 0x1a0   : > { %v1036_v57 = vadd.f32 1e-05, %v1011_v19  ;;  %v1083_v23 = vmul.f32 %v4198_v60, %v5140_v24  ;;  %v1037_v3 = vadd.f32 1e-05, %v1012_v20  ;;  %v1265_v59 = vadd.f32 %v5530_v56, %v1173_v58  ;;  %v7070_v20 = vld [vmem:[#allocation34_spill] sm:$0xff]  ;;  %v7071_v60 = vld [vmem:[#allocation35_spill] sm:$0xff] }
 0x1a1   : > { %v937_v61 = vpop.xlane.xlu1 %936  ;;  %v941_v12 = vpop.xlane.xlu0 %940  ;;  %1003 = vadd.xlane.f32.xlu1 %v1002_v15  ;;  %v1176_v6 = vmul.f32 %v5527_v11, %v1084_v2  ;;  %v1177_v53 = vmul.f32 %v5544_v7, %v1085_v29  ;;  %v1266_v25 = vadd.f32 %v5547_v48, %v1174_v35  ;;  %v1264_v26 = vadd.f32 %v5567_v52, %v1172_v33  ;;  %v7072_v2 = vld [vmem:[#allocation33_spill] sm:$0xff]  ;;  %v4051_v29 = vld [vmem:[%s5035_s10 + $0x158] ss:$24 sps:$4 sm:$0xff]  }
 0x1a2   : > { %v1013_v13 = vmul.f32 0.0026041667, %v937_v61  ;;  %v4200_v47 = vpop.eup %4199  ;;  %v1014_v54 = vmul.f32 0.0026041667, %v941_v12  ;;  %v1175_v44 = vmul.f32 %v5556_v49, %v1083_v23  ;;  %4207 = vrsqrt.f32 %v1036_v57  ;;  %v4056_v33 = vld [vmem:[%s5035_s10 + $0x12c] ss:$24 sps:$4 sm:$0xff]  }
 0x1a3   : > { %v1268_v24 = vadd.f32 %v5530_v56, %v1176_v6  ;;  %v1087_v15 = vmul.f32 %v4200_v47, %v7070_v20  ;;  %v1269_v19 = vadd.f32 %v5547_v48, %v1177_v53  ;;  %v1088_v58 = vmul.f32 %v4200_v47, %v7071_v60  ;;  %v4054_v60 = vld [vmem:[%s5035_s10 + $0x128] ss:$24 sps:$4 sm:$0xff]  }
 0x1a4   : > { %v1267_v1 = vadd.f32 %v5567_v52, %v1175_v44  ;;  %v1086_v35 = vmul.f32 %v4200_v47, %v7072_v2  ;;  %4209 = vrsqrt.f32 %v1037_v3  ;;  %v1038_v61 = vadd.f32 1e-05, %v1013_v13  ;;  %v4066_v44 = vld [vmem:[%s5035_s10 + $0x458] ss:$24 sps:$4 sm:$0xff]  }
 0x1a5   : > { %v949_v55 = vpop.xlane.xlu0 %948  ;;  %v5585_v12 = vpack.c.bf16 %v1268_v24, %v1265_v59  ;;  %v1039_v6 = vadd.f32 1e-05, %v1014_v54  ;;  %v5589_v51 = vpack.c.bf16 %v1269_v19, %v1266_v25  ;;  %v1179_v3 = vmul.f32 %v5527_v11, %v1087_v15  ;;  %v4077_v59 = vld [vmem:[%s5035_s10 + $0x42c] ss:$24 sps:$4 sm:$0xff]  }
 0x1a6   : > { %v945_v57 = vpop.xlane.xlu1 %944  ;;  %v4202_v23 = vpop.eup %4201  ;;  %v1016_v20 = vmul.f32 0.0026041667, %v949_v55  ;;  %v5591_v53 = vpack.c.bf16 %v1267_v1, %v1264_v26  ;;  %v1180_v54 = vmul.f32 %v5544_v7, %v1088_v58  ;;  %v7076_v25 = vld [vmem:[#allocation36_spill] sm:$0xff]  ;;  %v1178_v55 = vmul.f32 %v5556_v49, %v1086_v35  ;;  %v4059_v35 = vld [vmem:[%s5035_s10 + $0xfc] ss:$24 sps:$4 sm:$0xff]  }
 0x1a7   : > { %7073 = vst [vmem:[#allocation25_spill] sm:$0xff] %v5585_v12  ;;  %7074 = vst [vmem:[#allocation26_spill] sm:$0xff] %v5589_v51  ;;  %2306 = vmatprep.mubr.bf16.mxu0 %v5585_v12  ;;  %v1090_v47 = vmul.f32 %v4202_v23, %v5158_v21  ;;  %v1091_v13 = vmul.f32 %v4202_v23, %v5161_v22  ;;  %2468 = vmatmul.mubr.bf16.vlgmr.msra.gmra.mxu1 %v5589_v51  ;;  %4211 = vrsqrt.f32 %v1038_v61  ;;  %v7077_v19 = vmov 0   ;;  %v4075_v61 = vld [vmem:[%s5035_s10 + $0x428] ss:$24 sps:$4 sm:$0xff]  }
 0x1a8   : > { %7075 = vst [vmem:[#allocation31_spill] sm:$0xff] %v5591_v53  ;;  %2307 = vmatmul.mubr.bf16.vlgmr.msra.gmra.mxu0 %v5591_v53  ;;  %v1089_v26 = vmul.f32 %v4202_v23, %v7076_v25  ;;  %v1015_v21 = vmul.f32 0.0026041667, %v945_v57  ;;  %2477 = vmatprep.mubr.bf16.mxu1 %v7077_v19  ;;  %4213 = vrsqrt.f32 %v1039_v6  ;;  %v1041_v58 = vadd.f32 1e-05, %v1016_v20 }
 0x1a9   : > { %v957_v24 = vpop.xlane.xlu0 %956  ;;  %v1182_v22 = vmul.f32 %v5527_v11, %v1090_v47  ;;  %v1183_v1 = vmul.f32 %v5544_v7, %v1091_v13  ;;  %2597 = vmatpush1.bf16.msra.mxu1 %v4051_v29  ;;  %2758 = vmatpush1.bf16.msra.mxu0 %v4066_v44  ;;  %v1271_v25 = vadd.f32 %v5530_v56, %v1179_v3  ;;  %v4086_v51 = vld [vmem:[%s5035_s10 + $0x3fc] ss:$24 sps:$4 sm:$0xff]  }
 0x1aa   : > { %v4204_v2 = vpop.eup %4203  ;;  %v1181_v23 = vmul.f32 %v5556_v49, %v1089_v26  ;;  %2598 = vmatprep.subr.bf16.mxu1 %v4056_v33  ;;  %v1272_v13 = vadd.f32 %v5547_v48, %v1180_v54  ;;  %2759 = vmatprep.subr.bf16.mxu0 %v4077_v59  ;;  %v1270_v20 = vadd.f32 %v5567_v52, %v1178_v55  ;;  %v1040_v3 = vadd.f32 1e-05, %v1015_v21  ;;  %v4057_v59 = vld [vmem:[%s5035_s10 + $0xf8] ss:$24 sps:$4 sm:$0xff]  }
 0x1ab   : > { %v953_v15 = vpop.xlane.xlu1 %952  ;;  %v4206_v57 = vpop.eup %4205  ;;  %v1274_v47 = vadd.f32 %v5530_v56, %v1182_v22  ;;  %v1275_v29 = vadd.f32 %v5547_v48, %v1183_v1  ;;  %v1093_v44 = vmul.f32 %v4204_v2, %v5177_v4  ;;  %v1018_v53 = vmul.f32 0.0026041667, %v957_v24  ;;  %v4062_v4 = vld [vmem:[%s5035_s10 + $0xcc] ss:$24 sps:$4 sm:$0xff]  }
 0x1ac   : > { %v1273_v33 = vadd.f32 %v5567_v52, %v1181_v23  ;;  %v1096_v26 = vmul.f32 %v4206_v57, %v5186_v0  ;;  %v1017_v0 = vmul.f32 0.0026041667, %v953_v15  ;;  %v1094_v24 = vmul.f32 %v4204_v2, %v5180_v16  ;;  %v4060_v16 = vld [vmem:[%s5035_s10 + $0xc8] ss:$24 sps:$4 sm:$0xff]  }
 0x1ad   : > { %v5620_v22 = vpack.c.bf16 %v1274_v47, %v1271_v25  ;;  %v5622_v54 = vpack.c.bf16 %v1275_v29, %v1272_v13  ;;  %2599 = vmatpush1.bf16.msra.mxu1 %v4054_v60  ;;  %v1185_v55 = vmul.f32 %v5527_v11, %v1093_v44  ;;  %2760 = vmatpush1.bf16.msra.mxu0 %v4075_v61  ;;  %v4084_v60 = vld [vmem:[%s5035_s10 + $0x3f8] ss:$24 sps:$4 sm:$0xff]   ;;  %4215 = vrsqrt.f32 %v1041_v58  ;;  %v4095_v58 = vld [vmem:[%s5035_s10 + $0x3cc] ss:$24 sps:$4 sm:$0xff]  }
 0x1ae   : > { %v965_v6 = vpop.xlane.xlu0 %964  ;;  %v5625_v12 = vpack.c.bf16 %v1273_v33, %v1270_v20  ;;  %v1188_v23 = vmul.f32 %v5527_v11, %v1096_v26  ;;  %2600 = vmatprep.subr.bf16.mxu1 %v4059_v35  ;;  %v1097_v21 = vmul.f32 %v4206_v57, %v5189_v32  ;;  %2761 = vmatprep.subr.bf16.mxu0 %v4086_v51  ;;  %4217 = vrsqrt.f32 %v1040_v3  ;;  %v4093_v3 = vld [vmem:[%s5035_s10 + $0x3c8] ss:$24 sps:$4 sm:$0xff]  }
 0x1af   : > { %2316 = vmatprep.mubr.bf16.mxu0 %v5620_v22  ;;  %v5634_v25 = vpop.eup %4207  ;;  %2478 = vmatmul.mubr.bf16.gmra.mxu1 %v5622_v54  ;;  %v1277_v35 = vadd.f32 %v5530_v56, %v1185_v55  ;;  %v1092_v61 = vmul.f32 %v4204_v2, %v5174_v14  ;;  %v1043_v32 = vadd.f32 1e-05, %v1018_v53  ;;  %v1020_v47 = vmul.f32 0.0026041667, %v965_v6  ;;  %v4065_v53 = vld [vmem:[%s5035_s10 + $0x9c] ss:$24 sps:$4 sm:$0xff]  }
 0x1b0   : > { %v961_v1 = vpop.xlane.xlu1 %960  ;;  %2317 = vmatmul.mubr.bf16.gmra.mxu0 %v5625_v12  ;;  %v1280_v15 = vadd.f32 %v5530_v56, %v1188_v23  ;;  %2487 = vmatprep.mubr.bf16.mxu1 %v7077_v19  ;;  %v1186_v51 = vmul.f32 %v5544_v7, %v1094_v24  ;;  %v1189_v33 = vmul.f32 %v5544_v7, %v1097_v21  ;;  %v1042_v6 = vadd.f32 1e-05, %v1017_v0  ;;  %v4063_v24 = vld [vmem:[%s5035_s10 + $0x98] ss:$24 sps:$4 sm:$0xff]  }
 0x1b1   : > { %2601 = vmatpush1.bf16.msra.mxu1 %v4057_v59  ;;  %v4210_v13 = vpop.eup %4209  ;;  %v1095_v14 = vmul.f32 %v4206_v57, %v5183_v28  ;;  %v1184_v2 = vmul.f32 %v5556_v49, %v1092_v61  ;;  %v1019_v44 = vmul.f32 0.0026041667, %v961_v1  ;;  %2762 = vmatpush1.bf16.msra.mxu0 %v4084_v60  ;;  %v1099_v57 = vmul.f32 %v5634_v25, %v5203_v17  ;;  %v4071_v61 = vld [vmem:[%s5035_s10 + $0x6c] ss:$24 sps:$4 sm:$0xff]  }
 0x1b2   : > { %v973_v29 = vpop.xlane.xlu0 %972  ;;  %v5645_v20 = vpack.c.bf16 %v1280_v15, %v1277_v35  ;;  %2602 = vmatprep.subr.bf16.mxu1 %v4062_v4  ;;  %v1278_v26 = vadd.f32 %v5547_v48, %v1186_v51  ;;  %v1281_v55 = vadd.f32 %v5547_v48, %v1189_v33  ;;  %4219 = vrsqrt.f32 %v1043_v32  ;;  %2763 = vmatprep.subr.bf16.mxu0 %v4095_v58  ;;  %v4104_v51 = vld [vmem:[%s5035_s10 + $0x39c] ss:$24 sps:$4 sm:$0xff]  }
 0x1b3   : > { %v1187_v23 = vmul.f32 %v5556_v49, %v1095_v14  ;;  %v1276_v28 = vadd.f32 %v5567_v52, %v1184_v2  ;;  %v1045_v4 = vadd.f32 1e-05, %v1020_v47  ;;  %v1022_v1 = vmul.f32 0.0026041667, %v973_v29  ;;  %v4102_v14 = vld [vmem:[%s5035_s10 + $0x398] ss:$24 sps:$4 sm:$0xff]  }
 0x1b4   : > { %2326 = vmatprep.mubr.bf16.mxu0 %v5645_v20  ;;  %v1102_v0 = vmul.f32 %v4210_v13, %v5212_v30  ;;  %v5661_v21 = vpop.eup %4211  ;;  %v5663_v60 = vpack.c.bf16 %v1281_v55, %v1278_v26  ;;  %v1191_v15 = vmul.f32 %v5527_v11, %v1099_v57  ;;  %v1100_v17 = vmul.f32 %v5634_v25, %v5206_v63 }
 0x1b5   : > { %v969_v59 = vpop.xlane.xlu1 %968  ;;  %2603 = vmatpush1.bf16.msra.mxu1 %v4060_v16  ;;  %v1279_v35 = vadd.f32 %v5567_v52, %v1187_v23  ;;  %v4214_v32 = vpop.eup %4213  ;;  %4221 = vrsqrt.f32 %v1042_v6  ;;  %v1044_v30 = vadd.f32 1e-05, %v1019_v44  ;;  %2764 = vmatpush1.bf16.msra.mxu0 %v4093_v3  ;;  %v1103_v63 = vmul.f32 %v4210_v13, %v5215_v31  ;;  %v4069_v6 = vld [vmem:[%s5035_s10 + $0x68] ss:$24 sps:$4 sm:$0xff]   ;;  %v4074_v23 = vld [vmem:[%s5035_s10 + $0x3c] ss:$24 sps:$4 sm:$0xff]  }
 0x1b6   : > { %7078 = vst [vmem:[#allocation32_spill] sm:$0xff] %v5663_v60  ;;  %2604 = vmatprep.subr.bf16.mxu1 %v4065_v53  ;;  %v1021_v16 = vmul.f32 0.0026041667, %v969_v59  ;;  %v1194_v47 = vmul.f32 %v5527_v11, %v1102_v0  ;;  %v1283_v29 = vadd.f32 %v5530_v56, %v1191_v15  ;;  %v1192_v33 = vmul.f32 %v5544_v7, %v1100_v17  ;;  %v981_v44 = vpop.xlane.xlu0 %980  ;;  %v7079_v59 = vld [vmem:[#allocation37_spill] sm:$0xff] }
 0x1b7   : > { %2488 = vmatmul.mubr.bf16.gmra.mxu1 %v5663_v60  ;;  %v5673_v58 = vpack.c.bf16 %v1279_v35, %v1276_v28  ;;  %4223 = vrsqrt.f32 %v1045_v4  ;;  %v1047_v2 = vadd.f32 1e-05, %v1022_v1  ;;  %v1195_v26 = vmul.f32 %v5544_v7, %v1103_v63  ;;  %2765 = vmatprep.subr.bf16.mxu0 %v4104_v51 }
 0x1b8   : > { %v1286_v53 = vadd.f32 %v5530_v56, %v1194_v47  ;;  %2497 = vmatprep.mubr.bf16.mxu1 %v7077_v19  ;;  %v1284_v3 = vadd.f32 %v5547_v48, %v1192_v33  ;;  %v1098_v31 = vmul.f32 %v5634_v25, %v5200_v45  ;;  %v1101_v55 = vmul.f32 %v4210_v13, %v7079_v59 }
 0x1b9   : > { %2605 = vmatpush1.bf16.msra.mxu1 %v4063_v24  ;;  %2327 = vmatmul.mubr.bf16.gmra.mxu0 %v5673_v58  ;;  %4225 = vrsqrt.f32 %v1044_v30  ;;  %v1046_v28 = vadd.f32 1e-05, %v1021_v16  ;;  %v977_v4 = vpop.xlane.xlu1 %976  ;;  %v1287_v1 = vadd.f32 %v5547_v48, %v1195_v26  ;;  %v1105_v35 = vmul.f32 %v5661_v21, %v5232_v37 }
 0x1ba   : > { %v5689_v57 = vpack.c.bf16 %v1286_v53, %v1283_v29  ;;  %2606 = vmatprep.subr.bf16.mxu1 %v4071_v61  ;;  %v1190_v0 = vmul.f32 %v5556_v49, %v1098_v31  ;;  %v1193_v24 = vmul.f32 %v5556_v49, %v1101_v55  ;;  %2766 = vmatpush1.bf16.msra.mxu0 %v4102_v14  ;;  %v4216_v45 = vpop.eup %4215  ;;  %4227 = vrsqrt.f32 %v1047_v2  ;;  %v4080_v53 = vld [vmem:[%s5035_s10 + $0xc] ss:$24 sps:$4 sm:$0xff]  }
 0x1bb   : > { %v1024_v25 = vmul.f32 0.0026041667, %v981_v44  ;;  %v1108_v13 = vmul.f32 %v4214_v32, %v5241_v42  ;;  %v1106_v15 = vmul.f32 %v5661_v21, %v5235_v18  ;;  %v4218_v17 = vpop.eup %4217  ;;  %v5700_v61 = vpack.c.bf16 %v1287_v1, %v1284_v3  ;;  %v4072_v18 = vld [vmem:[%s5035_s10 + $0x38] ss:$24 sps:$4 sm:$0xff]  }
 0x1bc   : > { %2336 = vmatprep.mubr.bf16.mxu0 %v5689_v57  ;;  %v1282_v30 = vadd.f32 %v5567_v52, %v1190_v0  ;;  %v1285_v37 = vadd.f32 %v5567_v52, %v1193_v24  ;;  %v1197_v16 = vmul.f32 %v5527_v11, %v1105_v35  ;;  %v1023_v47 = vmul.f32 0.0026041667, %v977_v4  ;;  %v989_v0 = vpop.xlane.xlu0 %988 }
 0x1bd   : > { %2607 = vmatpush1.bf16.msra.mxu1 %v4069_v6  ;;  %7080 = vst [vmem:[#allocation30_spill] sm:$0xff] %v5700_v61  ;;  %v1200_v51 = vmul.f32 %v5527_v11, %v1108_v13  ;;  %v1109_v42 = vmul.f32 %v4214_v32, %v5244_v41  ;;  %v1198_v29 = vmul.f32 %v5544_v7, %v1106_v15  ;;  %4229 = vrsqrt.f32 %v1046_v28 }
 0x1be   : > { %2608 = vmatprep.subr.bf16.mxu1 %v4074_v23  ;;  %v5710_v63 = vpack.c.bf16 %v1285_v37, %v1282_v30  ;;  %v1289_v33 = vadd.f32 %v5530_v56, %v1197_v16  ;;  %v1104_v14 = vmul.f32 %v5661_v21, %v5229_v9  ;;  %v1107_v2 = vmul.f32 %v4214_v32, %v5238_v39  ;;  %v7083_v23 = vld [vmem:[#allocation40_spill] sm:$0xff]  ;;  %v7084_v30 = vld [vmem:[#allocation38_spill] sm:$0xff] }
 0x1bf   : > { %2498 = vmatmul.mubr.bf16.gmra.mxu1 %v5700_v61  ;;  %v1292_v6 = vadd.f32 %v5530_v56, %v1200_v51  ;;  %v1201_v41 = vmul.f32 %v5544_v7, %v1109_v42  ;;  %v1290_v44 = vadd.f32 %v5547_v48, %v1198_v29  ;;  %v1111_v26 = vmul.f32 %v4218_v17, %v5262_v50  ;;  %v4220_v3 = vpop.eup %4219  ;;  %v4078_v50 = vld [vmem:[%s5035_s10 + $0x8] ss:$24 sps:$4 sm:$0xff]   ;;  %v7086_v29 = vld [vmem:[#allocation39_spill] sm:$0xff] }
 0x1c0   : > { %7081 = vst [vmem:[#allocation34_spill] sm:$0xff] %v5710_v63  ;;  %2507 = vmatprep.mubr.bf16.mxu1 %v7077_v19  ;;  %v1196_v31 = vmul.f32 %v5556_v49, %v1104_v14  ;;  %v1199_v9 = vmul.f32 %v5556_v49, %v1107_v2  ;;  %v1114_v39 = vmul.f32 %v4216_v45, %v5269_v38  ;;  %v7087_v14 = vld [vmem:[#allocation42_spill] sm:$0xff] }
 0x1c1   : > { %2337 = vmatmul.mubr.bf16.gmra.mxu0 %v5710_v63  ;;  %v1112_v21 = vmul.f32 %v4218_v17, %v5275_v5  ;;  %v5727_v32 = vpack.c.bf16 %v1292_v6, %v1289_v33  ;;  %v1293_v59 = vadd.f32 %v5547_v48, %v1201_v41  ;;  %v1203_v55 = vmul.f32 %v5527_v11, %v1111_v26  ;;  %v985_v41 = vpop.xlane.xlu1 %984 }
 0x1c2   : > { %v1115_v4 = vmul.f32 %v4216_v45, %v7083_v23  ;;  %2609 = vmatpush1.bf16.msra.mxu1 %v4072_v18  ;;  %v4222_v1 = vpop.eup %4221  ;;  %v1288_v24 = vadd.f32 %v5567_v52, %v1196_v31  ;;  %v1291_v35 = vadd.f32 %v5567_v52, %v1199_v9  ;;  %v1206_v38 = vmul.f32 %v5527_v11, %v1114_v39 }
 0x1c3   : > { %7082 = vst [vmem:[#allocation35_spill] sm:$0xff] %v5727_v32  ;;  %2610 = vmatprep.subr.bf16.mxu1 %v4080_v53  ;;  %v1049_v5 = vadd.f32 1e-05, %v1024_v25  ;;  %2346 = vmatprep.mubr.bf16.mxu0 %v5727_v32  ;;  %v1295_v13 = vadd.f32 %v5530_v56, %v1203_v55  ;;  %v1204_v15 = vmul.f32 %v5544_v7, %v1112_v21  ;;  %v1048_v25 = vadd.f32 1e-05, %v1023_v47  ;;  %v7088_v53 = vld [vmem:[#allocation44_spill] sm:$0xff] }
 0x1c4   : > { %v1110_v37 = vmul.f32 %v4218_v17, %v7084_v30  ;;  %v5740_v16 = vpop.eup %4223  ;;  %v5742_v28 = vpack.c.bf16 %v1293_v59, %v1290_v44  ;;  %v1298_v51 = vadd.f32 %v5530_v56, %v1206_v38  ;;  %v1207_v42 = vmul.f32 %v5544_v7, %v1115_v4  ;;  %v4083_v47 = vld [vmem:[%s5035_s10 + $0x2dc] ss:$24 sps:$4 sm:$0xff]   ;;  %v4081_v21 = vld [vmem:[%s5035_s10 + $0x2d8] ss:$24 sps:$4 sm:$0xff]  }
 0x1c5   : > { %v1113_v18 = vmul.f32 %v4216_v45, %v7086_v29  ;;  %v1026_v33 = vmul.f32 0.0026041667, %v989_v0  ;;  %v1117_v2 = vmul.f32 %v4222_v1, %v7087_v14  ;;  %v1120_v6 = vmul.f32 %v4220_v3, %v7088_v53  ;;  %v7089_v4 = vld [vmem:[#allocation46_spill] sm:$0xff]  ;;  %v7090_v0 = vld [vmem:[#allocation45_spill] sm:$0xff] }
 0x1c6   : > { %7085 = vst [vmem:[#allocation33_spill] sm:$0xff] %v5742_v28  ;;  %2611 = vmatpush1.bf16.msra.mxu1 %v4078_v50  ;;  %v5749_v17 = vpop.eup %4225  ;;  %v5752_v44 = vpack.c.bf16 %v1291_v35, %v1288_v24  ;;  %v1202_v26 = vmul.f32 %v5556_v49, %v1110_v37  ;;  %4231 = vrsqrt.f32 %v1049_v5  ;;  %v5757_v31 = vpack.c.bf16 %v1298_v51, %v1295_v13  ;;  %v4089_v35 = vld [vmem:[%s5035_s10 + $0x2ac] ss:$24 sps:$4 sm:$0xff]  }
 0x1c7   : > { %2508 = vmatmul.mubr.bf16.gmra.mxu1 %v5742_v28  ;;  %v1205_v45 = vmul.f32 %v5556_v49, %v1113_v18  ;;  %v1209_v9 = vmul.f32 %v5527_v11, %v1117_v2  ;;  %v1212_v39 = vmul.f32 %v5527_v11, %v1120_v6  ;;  %v5763_v59 = vpop.eup %4227  ;;  %v1296_v55 = vadd.f32 %v5547_v48, %v1204_v15  ;;  %v4113_v13 = vld [vmem:[%s5035_s10 + $0x36c] ss:$24 sps:$4 sm:$0xff]   ;;  %v7092_v15 = vld [vmem:[#allocation43_spill] sm:$0xff] }
 0x1c8   : > { %2517 = vmatprep.mubr.bf16.mxu1 %v7077_v19  ;;  %v1299_v23 = vadd.f32 %v5547_v48, %v1207_v42  ;;  %v1118_v50 = vmul.f32 %v4222_v1, %v7089_v4  ;;  %v1121_v24 = vmul.f32 %v4220_v3, %v7090_v0  ;;  %4233 = vrsqrt.f32 %v1048_v25  ;;  %v7091_v51 = vld [vmem:[#allocation41_spill] sm:$0xff]  ;;  %2612 = vmatprep.subr.bf16.mxu1 %v4083_v47  ;;  %v7095_v0 = vld [vmem:[#allocation50_spill] sm:$0xff] }
 0x1c9   : > { %2347 = vmatmul.mubr.bf16.gmra.mxu0 %v5752_v44  ;;  %v1025_v38 = vmul.f32 0.0026041667, %v985_v41  ;;  %v1051_v5 = vadd.f32 1e-05, %v1026_v33  ;;  %v1294_v30 = vadd.f32 %v5567_v52, %v1202_v26  ;;  %v1297_v37 = vadd.f32 %v5567_v52, %v1205_v45  ;;  %v7093_v33 = vld [vmem:[#allocation49_spill] sm:$0xff]  ;;  %2767 = vmatprep.subr.bf16.mxu0 %v4113_v13 }
 0x1ca   : > { %2356 = vmatprep.mubr.bf16.mxu0 %v5757_v31  ;;  %v1116_v29 = vmul.f32 %v4222_v1, %v7091_v51  ;;  %v1119_v18 = vmul.f32 %v4220_v3, %v7092_v15  ;;  %v1301_v42 = vadd.f32 %v5530_v56, %v1209_v9  ;;  %v1304_v14 = vadd.f32 %v5530_v56, %v1212_v39  ;;  %v4087_v45 = vld [vmem:[%s5035_s10 + $0x2a8] ss:$24 sps:$4 sm:$0xff]   ;;  %v4230_v47 = vpop.eup %4229 }
 0x1cb   : > { %v1123_v25 = vmul.f32 %v5749_v17, %v5334_v62  ;;  %v1126_v2 = vmul.f32 %v5740_v16, %v7093_v33  ;;  %2613 = vmatpush2.bf16.msra.mxu1 %v4081_v21  ;;  %v5783_v53 = vpack.c.bf16 %v1299_v23, %v1296_v55  ;;  %v1210_v6 = vmul.f32 %v5544_v7, %v1118_v50  ;;  %v4092_v55 = vld [vmem:[%s5035_s10 + $0x27c] ss:$24 sps:$4 sm:$0xff]   ;;  %v7097_v51 = vld [vmem:[#allocation48_spill] sm:$0xff] }
 0x1cc   : > { %v1213_v3 = vmul.f32 %v5544_v7, %v1121_v24  ;;  %2614 = vmatprep.subr.bf16.mxu1 %v4089_v35  ;;  %v1050_v1 = vadd.f32 1e-05, %v1025_v38  ;;  %v5788_v41 = vpack.c.bf16 %v1297_v37, %v1294_v30  ;;  %v1208_v62 = vmul.f32 %v5556_v49, %v1116_v29  ;;  %v4111_v35 = vld [vmem:[%s5035_s10 + $0x368] ss:$24 sps:$4 sm:$0xff]   ;;  %v4119_v38 = vld [vmem:[%s5035_s10 + $0x33c] ss:$24 sps:$4 sm:$0xff]  }
 0x1cd   : > { %7094 = vst [vmem:[#allocation36_spill] sm:$0xff] %v5783_v53  ;;  %v1211_v26 = vmul.f32 %v5556_v49, %v1119_v18  ;;  %4235 = vrsqrt.f32 %v1051_v5  ;;  %v5793_v9 = vpack.c.bf16 %v1304_v14, %v1301_v42  ;;  %v1215_v39 = vmul.f32 %v5527_v11, %v1123_v25  ;;  %v7096_v30 = vld [vmem:[#allocation47_spill] sm:$0xff]  ;;  %v7098_v42 = vld [vmem:[#allocation5_spill] sm:$0xff]  ;;  %2768 = vmatpush1.bf16.msra.mxu0 %v4111_v35 }
 0x1ce   : > { %v1218_v21 = vmul.f32 %v5527_v11, %v1126_v2  ;;  %v1302_v23 = vadd.f32 %v5547_v48, %v1210_v6  ;;  %v1305_v4 = vadd.f32 %v5547_v48, %v1213_v3  ;;  %v1124_v50 = vmul.f32 %v5749_v17, %v5339_v34  ;;  %2769 = vmatprep.subr.bf16.mxu0 %v4119_v38  ;;  %v4122_v38 = vld [vmem:[%s5035_s10 + $0x30c] ss:$24 sps:$4 sm:$0xff]  }
 0x1cf   : > { %2518 = vmatmul.mubr.bf16.gmra.mxu1 %v5783_v53  ;;  %v1127_v24 = vmul.f32 %v5740_v16, %v7095_v0  ;;  %4237 = vrsqrt.f32 %v1050_v1  ;;  %v1300_v5 = vadd.f32 %v5567_v52, %v1208_v62  ;;  %v1303_v13 = vadd.f32 %v5567_v52, %v1211_v26  ;;  %v4090_v1 = vld [vmem:[%s5035_s10 + $0x278] ss:$24 sps:$4 sm:$0xff]  }
 0x1d0   : > { %2527 = vmatprep.mubr.bf16.mxu1 %v7077_v19  ;;  %v1122_v37 = vmul.f32 %v5749_v17, %v7096_v30  ;;  %v1125_v29 = vmul.f32 %v5740_v16, %v7097_v51  ;;  %2615 = vmatpush2.bf16.msra.mxu1 %v4087_v45  ;;  %v1307_v34 = vadd.f32 %v5530_v56, %v1215_v39  ;;  %v4098_v39 = vld [vmem:[%s5035_s10 + $0x24c] ss:$24 sps:$4 sm:$0xff]  }
 0x1d1   : > { %2357 = vmatmul.mubr.bf16.gmra.mxu0 %v5788_v41  ;;  %v1310_v15 = vadd.f32 %v5530_v56, %v1218_v21  ;;  %v1129_v18 = vmul.f32 %v4230_v47, %v5368_v46  ;;  %v1132_v14 = vmul.f32 %v5763_v59, %v7098_v42  ;;  %2616 = vmatprep.subr.bf16.mxu1 %v4092_v55 }
 0x1d2   : > { %2366 = vmatprep.mubr.bf16.mxu0 %v5793_v9  ;;  %v5822_v33 = vpack.c.bf16 %v1305_v4, %v1302_v23  ;;  %v1216_v17 = vmul.f32 %v5544_v7, %v1124_v50  ;;  %v1219_v16 = vmul.f32 %v5544_v7, %v1127_v24  ;;  %v5827_v46 = vpack.c.bf16 %v1303_v13, %v1300_v5  ;;  %v4117_v50 = vld [vmem:[%s5035_s10 + $0x338] ss:$24 sps:$4 sm:$0xff]   ;;  %v7100_v24 = vld [vmem:[#allocation4_spill] sm:$0xff] }
 0x1d3   : > { %v5820_v25 = vpop.eup %4231  ;;  %v1214_v6 = vmul.f32 %v5556_v49, %v1122_v37  ;;  %v1217_v3 = vmul.f32 %v5556_v49, %v1125_v29  ;;  %v5832_v62 = vpack.c.bf16 %v1310_v15, %v1307_v34  ;;  %v1221_v26 = vmul.f32 %v5527_v11, %v1129_v18  ;;  %2770 = vmatpush1.bf16.msra.mxu0 %v4117_v50  ;;  %v4120_v15 = vld [vmem:[%s5035_s10 + $0x308] ss:$24 sps:$4 sm:$0xff]  }
 0x1d4   : > { %7099 = vst [vmem:[#allocation37_spill] sm:$0xff] %v5822_v33  ;;  %v1224_v45 = vmul.f32 %v5527_v11, %v1132_v14  ;;  %v1308_v21 = vadd.f32 %v5547_v48, %v1216_v17  ;;  %v1311_v55 = vadd.f32 %v5547_v48, %v1219_v16  ;;  %v1130_v23 = vmul.f32 %v4230_v47, %v5371_v36 }
 0x1d5   : > { %v4234_v2 = vpop.eup %4233  ;;  %v1133_v4 = vmul.f32 %v5763_v59, %v5360_v10  ;;  %v1128_v0 = vmul.f32 %v4230_v47, %v5365_v8  ;;  %v1131_v35 = vmul.f32 %v5763_v59, %v7100_v24  ;;  %v1306_v5 = vadd.f32 %v5567_v52, %v1214_v6  ;;  %2617 = vmatpush2.bf16.msra.mxu1 %v4090_v1  ;;  %v4096_v47 = vld [vmem:[%s5035_s10 + $0x248] ss:$24 sps:$4 sm:$0xff]   ;;  %v7101_v6 = vld [vmem:[#allocation6_spill] sm:$0xff] }
 0x1d6   : > { %v1309_v13 = vadd.f32 %v5567_v52, %v1217_v3  ;;  %v1135_v36 = vmul.f32 %v4234_v2, %v5405_v43  ;;  %v1138_v10 = vmul.f32 %v5820_v25, %v5395_v27  ;;  %v1313_v30 = vadd.f32 %v5530_v56, %v1221_v26  ;;  %2618 = vmatprep.subr.bf16.mxu1 %v4098_v39  ;;  %v4101_v43 = vld [vmem:[%s5035_s10 + $0x21c] ss:$24 sps:$4 sm:$0xff]   ;;  %v4099_v1 = vld [vmem:[%s5035_s10 + $0x218] ss:$24 sps:$4 sm:$0xff]   ;;  %v7102_v39 = vld [vmem:[#allocation9_spill] sm:$0xff] }
 0x1d7   : > { %2528 = vmatmul.mubr.bf16.gmra.mxu1 %v5822_v33  ;;  %v1316_v8 = vadd.f32 %v5530_v56, %v1224_v45  ;;  %v5860_v59 = vpack.c.bf16 %v1311_v55, %v1308_v21  ;;  %v1222_v51 = vmul.f32 %v5544_v7, %v1130_v23  ;;  %v1225_v29 = vmul.f32 %v5544_v7, %v1133_v4  ;;  %v4107_v55 = vld [vmem:[%s5035_s10 + $0x1ec] ss:$24 sps:$4 sm:$0xff]  }
 0x1d8   : > { %2537 = vmatprep.mubr.bf16.mxu1 %v7077_v19  ;;  %v1220_v27 = vmul.f32 %v5556_v49, %v1128_v0  ;;  %v1223_v34 = vmul.f32 %v5556_v49, %v1131_v35  ;;  %2771 = vmatprep.subr.bf16.mxu0 %v4122_v38  ;;  %v5869_v42 = vpack.c.bf16 %v1309_v13, %v1306_v5  ;;  %v7103_v24 = vld [vmem:[#allocation13_spill] sm:$0xff]  ;;  %v7104_v38 = vld [vmem:[#allocation8_spill] sm:$0xff] }
 0x1d9   : > { %2367 = vmatmul.mubr.bf16.gmra.mxu0 %v5827_v46  ;;  %v1227_v14 = vmul.f32 %v5527_v11, %v1135_v36  ;;  %v1230_v17 = vmul.f32 %v5527_v11, %v1138_v10  ;;  %v5873_v16 = vpack.c.bf16 %v1316_v8, %v1313_v30  ;;  %v1136_v3 = vmul.f32 %v4234_v2, %v7101_v6  ;;  %v7105_v10 = vld [vmem:[#allocation10_spill] sm:$0xff]  ;;  %v4105_v8 = vld [vmem:[%s5035_s10 + $0x1e8] ss:$24 sps:$4 sm:$0xff]   ;;  %v7106_v6 = vld [vmem:[#allocation19_spill] sm:$0xff] }
 0x1da   : > { %2376 = vmatprep.mubr.bf16.mxu0 %v5832_v62  ;;  %v5858_v37 = vpop.eup %4235  ;;  %2619 = vmatpush2.bf16.msra.mxu1 %v4096_v47  ;;  %v1314_v26 = vadd.f32 %v5547_v48, %v1222_v51  ;;  %v1317_v45 = vadd.f32 %v5547_v48, %v1225_v29  ;;  %v1139_v21 = vmul.f32 %v5820_v25, %v7102_v39  ;;  %v4110_v29 = vld [vmem:[%s5035_s10 + $0x1bc] ss:$24 sps:$4 sm:$0xff]  }
 0x1db   : > { %2620 = vmatprep.subr.bf16.mxu1 %v4101_v43  ;;  %v1312_v23 = vadd.f32 %v5567_v52, %v1220_v27  ;;  %v1315_v4 = vadd.f32 %v5567_v52, %v1223_v34  ;;  %2772 = vmatpush1.bf16.msra.mxu0 %v4120_v15  ;;  %v1319_v50 = vadd.f32 %v5530_v56, %v1227_v14  ;;  %v4108_v14 = vld [vmem:[%s5035_s10 + $0x1b8] ss:$24 sps:$4 sm:$0xff]  }
 0x1dc   : > { %v4238_v18 = vpop.eup %4237  ;;  %v1322_v0 = vadd.f32 %v5530_v56, %v1230_v17  ;;  %v1134_v35 = vmul.f32 %v4234_v2, %v7103_v24  ;;  %v1137_v5 = vmul.f32 %v5820_v25, %v7104_v38  ;;  %v1228_v13 = vmul.f32 %v5544_v7, %v1136_v3 }
 0x1dd   : > { %v1141_v36 = vmul.f32 %v4238_v18, %v5435_v40  ;;  %v1144_v30 = vmul.f32 %v5858_v37, %v7105_v10  ;;  %v5897_v47 = vpack.c.bf16 %v1317_v45, %v1314_v26  ;;  %v1231_v51 = vmul.f32 %v5544_v7, %v1139_v21  ;;  %v4116_v45 = vld [vmem:[%s5035_s10 + $0x18c] ss:$24 sps:$4 sm:$0xff]  }
 0x1de   : > { %2621 = vmatpush2.bf16.msra.mxu1 %v4099_v1  ;;  %v5902_v25 = vpack.c.bf16 %v1315_v4, %v1312_v23  ;;  %v5904_v2 = vpack.c.bf16 %v1322_v0, %v1319_v50  ;;  %v1226_v40 = vmul.f32 %v5556_v49, %v1134_v35  ;;  %v1229_v43 = vmul.f32 %v5556_v49, %v1137_v5  ;;  %v7107_v1 = vld [vmem:[#allocation14_spill] sm:$0xff]  ;;  %v7109_v4 = vld [vmem:[#allocation7_spill] sm:$0xff]  ;;  %v4114_v35 = vld [vmem:[%s5035_s10 + $0x188] ss:$24 sps:$4 sm:$0xff]  }
 0x1df   : > { %2538 = vmatmul.mubr.bf16.gmra.mxu1 %v5860_v59  ;;  %2622 = vmatprep.subr.bf16.mxu1 %v4107_v55  ;;  %v1320_v27 = vadd.f32 %v5547_v48, %v1228_v13  ;;  %v1233_v34 = vmul.f32 %v5527_v11, %v1141_v36  ;;  %v1236_v15 = vmul.f32 %v5527_v11, %v1144_v30  ;;  %v7108_v55 = vld [vmem:[#allocation15_spill] sm:$0xff] }
 0x1e0   : > { %2547 = vmatprep.mubr.bf16.mxu1 %v7077_v19  ;;  %v1323_v17 = vadd.f32 %v5547_v48, %v1231_v51  ;;  %v1142_v3 = vmul.f32 %v4238_v18, %v7106_v6  ;;  %v1145_v26 = vmul.f32 %v5858_v37, %v7107_v1  ;;  %v1318_v39 = vadd.f32 %v5567_v52, %v1226_v40  ;;  %v4125_v36 = vld [vmem:[%s5035_s10 + $0x164] ss:$24 sps:$4 sm:$0xff]  }
 0x1e1   : > { %2377 = vmatmul.mubr.bf16.gmra.mxu0 %v5869_v42  ;;  %v1321_v21 = vadd.f32 %v5567_v52, %v1229_v43  ;;  %v1140_v23 = vmul.f32 %v4238_v18, %v7108_v55  ;;  %v1143_v50 = vmul.f32 %v5858_v37, %v7109_v4  ;;  %v1325_v0 = vadd.f32 %v5530_v56, %v1233_v34  ;;  %v5934_v10 = vld [vmem:[%s5035_s10 + $0x464] ss:$24 sps:$4 sm:$0xff]  }
 0x1e2   : > { %2386 = vmatprep.mubr.bf16.mxu0 %v5873_v16  ;;  %2623 = vmatpush2.bf16.msra.mxu1 %v4105_v8  ;;  %v1328_v24 = vadd.f32 %v5530_v56, %v1236_v15  ;;  %v5928_v38 = vpack.c.bf16 %v1323_v17, %v1320_v27  ;;  %v1234_v5 = vmul.f32 %v5544_v7, %v1142_v3  ;;  %v7110_v55 = vld [vmem:[#allocation16_spill] sm:$0xff] }
 0x1e3   : > { %2624 = vmatprep.subr.bf16.mxu1 %v4110_v29  ;;  %v1237_v13 = vmul.f32 %v5544_v7, %v1145_v26  ;;  %v5937_v18 = vpack.c.bf16 %v1321_v21, %v1318_v39  ;;  %v1232_v37 = vmul.f32 %v5556_v49, %v1140_v23  ;;  %v1235_v30 = vmul.f32 %v5556_v49, %v1143_v50  ;;  %v7111_v4 = vld [vmem:[#allocation20_spill] sm:$0xff] }
 0x1e4   : > { %v5941_v8 = vpack.c.bf16 %v1328_v24, %v1325_v0  ;;  %v1326_v51 = vadd.f32 %v5547_v48, %v1234_v5  ;;  %3079 = vmatprep.subr.bf16.mxu0 %v5934_v10  ;;  %v7112_v0 = vld [vmem:[#allocation12_spill] sm:$0xff] }
 0x1e5   : > { %v1329_v29 = vadd.f32 %v5547_v48, %v1237_v13  ;;  %v1324_v40 = vadd.f32 %v5567_v52, %v1232_v37  ;;  %v1327_v43 = vadd.f32 %v5567_v52, %v1235_v30  ;;  %v7113_v13 = vld [vmem:[#allocation17_spill] sm:$0xff]  ;;  %v7114_v37 = vld [vmem:[#allocation18_spill] sm:$0xff] }
 0x1e6   : > { %2625 = vmatpush2.bf16.msra.mxu1 %v4108_v14 }
 0x1e7   : > { %2548 = vmatmul.mubr.bf16.gmra.mxu1 %v5897_v47  ;;  %2626 = vmatprep.subr.bf16.mxu1 %v4116_v45  ;;  %v5951_v27 = vpack.c.bf16 %v1329_v29, %v1326_v51  ;;  %v5954_v34 = vpack.c.bf16 %v1327_v43, %v1324_v40  ;;  %v7115_v40 = vld [vmem:[#allocation23_spill] sm:$0xff] }
 0x1e8   : > { %2557 = vmatprep.mubr.bf16.mxu1 %v7077_v19 }
 0x1e9   : > { %2387 = vmatmul.mubr.bf16.gmra.mxu0 %v5902_v25 }
 0x1ea   : > { %2396 = vmatprep.mubr.bf16.mxu0 %v5904_v2  ;;  %2627 = vmatpush2.bf16.msra.mxu1 %v4114_v35 }
 0x1eb   : > { %2918 = vmatprep.subr.bf16.mxu1 %v4125_v36 }
 0x1ef   : > { %2558 = vmatmul.mubr.bf16.gmra.mxu1 %v5928_v38 }
 0x1f0   : > { %2567 = vmatprep.mubr.bf16.mxu1 %v7077_v19 }
 0x1f1   : > { %2397 = vmatmul.mubr.bf16.gmra.mxu0 %v5937_v18 }
 0x1f2   : > { %2406 = vmatprep.mubr.bf16.mxu0 %v5941_v8 }
 0x1f7   : > { %2568 = vmatmul.mubr.bf16.gmra.mxu1 %v5951_v27 }
 0x1f8   : > { %2577 = vmatprep.mubr.bf16.mxu1 %v7077_v19 }
 0x1f9   : > { %2407 = vmatmul.mubr.bf16.gmra.mxu0 %v5954_v34 }
 0x221   : > { %v993_v15 = vpop.xlane.xlu1 %992 }
 0x222   : > { %v1027_v14 = vmul.f32 0.0026041667, %v993_v15 }
 0x224   : > { %v1052_v17 = vadd.f32 1e-05, %v1027_v14 }
 0x225   : > { %v997_v6 = vpop.xlane.xlu0 %996 }
 0x226   : > { %4239 = vrsqrt.f32 %v1052_v17  ;;  %v1028_v3 = vmul.f32 0.0026041667, %v997_v6 }
 0x228   : > { %v1053_v1 = vadd.f32 1e-05, %v1028_v3 }
 0x22a   : > { %4241 = vrsqrt.f32 %v1053_v1  ;;  %v1004_v26 = vpop.xlane.xlu1 %1003 }
 0x22b   : > { %v1029_v45 = vmul.f32 0.0026041667, %v1004_v26 }
 0x22d   : > { %v1054_v39 = vadd.f32 1e-05, %v1029_v45 }
 0x22f   : > { %4243 = vrsqrt.f32 %v1054_v39 }
 0x233   : > { %v4240_v21 = vpop.eup %4239 }
 0x234   : > { %v1147_v23 = vmul.f32 %v4240_v21, %v7110_v55  ;;  %v1148_v50 = vmul.f32 %v4240_v21, %v7111_v4  ;;  %v1146_v24 = vmul.f32 %v4240_v21, %v7112_v0  ;;  %v7116_v55 = vld [vmem:[#allocation28_spill] sm:$0xff]  ;;  %v7117_v4 = vld [vmem:[#allocation29_spill] sm:$0xff]  ;;  %v7118_v0 = vld [vmem:[#allocation27_spill] sm:$0xff] }
 0x236   : > { %v1239_v5 = vmul.f32 %v5527_v11, %v1147_v23  ;;  %v1240_v51 = vmul.f32 %v5544_v7, %v1148_v50  ;;  %v1238_v29 = vmul.f32 %v5556_v49, %v1146_v24 }
 0x237   : > { %v4242_v35 = vpop.eup %4241 }
 0x238   : > { %v1150_v36 = vmul.f32 %v4242_v35, %v7113_v13  ;;  %v1151_v30 = vmul.f32 %v4242_v35, %v7114_v37  ;;  %v1149_v43 = vmul.f32 %v4242_v35, %v7115_v40  ;;  %v1331_v17 = vadd.f32 %v5530_v56, %v1239_v5 }
 0x239   : > { %v1332_v26 = vadd.f32 %v5547_v48, %v1240_v51  ;;  %v1330_v39 = vadd.f32 %v5567_v52, %v1238_v29 }
 0x23a   : > { %v1242_v15 = vmul.f32 %v5527_v11, %v1150_v36  ;;  %v1243_v14 = vmul.f32 %v5544_v7, %v1151_v30  ;;  %v1241_v6 = vmul.f32 %v5556_v49, %v1149_v43  ;;  %v6009_v43 = vld [vmem:[%s5035_s10 + $0x460] ss:$24 sps:$4 sm:$0xff]  }
 0x23c   : > { %v4244_v3 = vpop.eup %4243  ;;  %v1334_v1 = vadd.f32 %v5530_v56, %v1242_v15  ;;  %v1335_v45 = vadd.f32 %v5547_v48, %v1243_v14  ;;  %v1333_v21 = vadd.f32 %v5567_v52, %v1241_v6  ;;  %v7120_v15 = vld [vmem:[#allocation31_spill] sm:$0xff]  ;;  %v6013_v14 = vld [vmem:[%s5035_s10 + $0x434] ss:$24 sps:$4 sm:$0xff]  }
 0x23d   : > { %v1153_v23 = vmul.f32 %v4244_v3, %v7116_v55  ;;  %v1154_v50 = vmul.f32 %v4244_v3, %v7117_v4  ;;  %v1152_v24 = vmul.f32 %v4244_v3, %v7118_v0  ;;  %v7121_v6 = vld [vmem:[#allocation26_spill] sm:$0xff]  ;;  %v4131_v3 = vld [vmem:[%s5035_s10 + $0x104] ss:$24 sps:$4 sm:$0xff]  }
 0x23e   : > { %v5979_v35 = vpack.c.bf16 %v1334_v1, %v1331_v17  ;;  %v5981_v5 = vpack.c.bf16 %v1335_v45, %v1332_v26  ;;  %v5983_v13 = vpack.c.bf16 %v1333_v21, %v1330_v39  ;;  %v4126_v17 = vld [vmem:[%s5035_s10 + $0x130] ss:$24 sps:$4 sm:$0xff]   ;;  %v6027_v26 = vld [vmem:[%s5035_s10 + $0x404] ss:$24 sps:$4 sm:$0xff]   ;;  %v4129_v45 = vld [vmem:[%s5035_s10 + $0x100] ss:$24 sps:$4 sm:$0xff]  }
 0x23f   : > { %v1245_v36 = vmul.f32 %v5527_v11, %v1153_v23  ;;  %v1246_v37 = vmul.f32 %v5544_v7, %v1154_v50  ;;  %v1244_v30 = vmul.f32 %v5556_v49, %v1152_v24  ;;  %v6023_v1 = vld [vmem:[%s5035_s10 + $0x430] ss:$24 sps:$4 sm:$0xff]   ;;  %v4134_v39 = vld [vmem:[%s5035_s10 + $0xd4] ss:$24 sps:$4 sm:$0xff]   ;;  %v6033_v21 = vld [vmem:[%s5035_s10 + $0x400] ss:$24 sps:$4 sm:$0xff]  }
 0x240   : > { %2416 = vmatprep.mubr.bf16.mxu0 %v5979_v35  ;;  %2578 = vmatmul.mubr.bf16.gmra.mxu1 %v5981_v5  ;;  %v6038_v55 = vld [vmem:[%s5035_s10 + $0x3d4] ss:$24 sps:$4 sm:$0xff]   ;;  %v4132_v23 = vld [vmem:[%s5035_s10 + $0xd0] ss:$24 sps:$4 sm:$0xff]   ;;  %v4137_v4 = vld [vmem:[%s5035_s10 + $0xa4] ss:$24 sps:$4 sm:$0xff]  }
 0x241   : > { %2417 = vmatmul.mubr.bf16.gmra.mxu0 %v5983_v13  ;;  %v1337_v51 = vadd.f32 %v5530_v56, %v1245_v36  ;;  %2587 = vmatprep.mubr.bf16.mxu1 %v7077_v19  ;;  %v1338_v11 = vadd.f32 %v5547_v48, %v1246_v37  ;;  %v1336_v7 = vadd.f32 %v5567_v52, %v1244_v30  ;;  %v7119_v56 = vld [vmem:[#allocation25_spill] sm:$0xff]  ;;  %v4123_v48 = vld [vmem:[%s5035_s10 + $0x160] ss:$24 sps:$4 sm:$0xff]   ;;  %v6051_v0 = vld [vmem:[%s5035_s10 + $0x3a4] ss:$24 sps:$4 sm:$0xff]  }
 0x242   : > { %v4128_v52 = vld [vmem:[%s5035_s10 + $0x134] ss:$24 sps:$4 sm:$0xff]   ;;  %v6047_v50 = vld [vmem:[%s5035_s10 + $0x3d0] ss:$24 sps:$4 sm:$0xff]   ;;  %v4135_v24 = vld [vmem:[%s5035_s10 + $0xa0] ss:$24 sps:$4 sm:$0xff]  }
 0x243   : > { %v5994_v29 = vpack.c.bf16 %v1337_v51, %v1337_v51  ;;  %v5998_v49 = vpack.c.bf16 %v1338_v11, %v1338_v11  ;;  %v6000_v40 = vpack.c.bf16 %v1336_v7, %v1336_v7  ;;  %v4143_v36 = vld [vmem:[%s5035_s10 + $0x74] ss:$24 sps:$4 sm:$0xff]   ;;  %v6062_v37 = vld [vmem:[%s5035_s10 + $0x3a0] ss:$24 sps:$4 sm:$0xff]   ;;  %v4141_v51 = vld [vmem:[%s5035_s10 + $0x70] ss:$24 sps:$4 sm:$0xff]  }
 0x244   : > { %v6067_v30 = vld [vmem:[%s5035_s10 + $0x374] ss:$24 sps:$4 sm:$0xff]   ;;  %v6073_v11 = vld [vmem:[%s6058_s23] sm:$0x3f] }
 0x245   : > { %2426 = vmatprep.mubr.bf16.mxu0 %v5994_v29  ;;  %7122 = vst [vmem:[#allocation40_spill] sm:$0xff] %v6067_v30  ;;  %7123 = vst [vmem:[#allocation38_spill] sm:$0xff] %v6073_v11  ;;  %v4146_v7 = vld [vmem:[%s5035_s10 + $0x44] ss:$24 sps:$4 sm:$0xff]  }
 0x248   : > { %2588 = vmatmul.mubr.bf16.gmra.mxu1 %v5998_v49 }
 0x249   : > { %2427 = vmatmul.mubr.bf16.gmra.mxu0 %v6000_v40  ;;  %2628 = vmatprep.mubr.bf16.mxu1 %v7119_v56 }
 0x24a   : > { %2789 = vmatprep.mubr.bf16.mxu0 %v7077_v19 }
 0x250   : > { %2629 = vmatmul.mubr.bf16.vlgmr.msra.gmra.mxu1 %v7120_v15 }
 0x251   : > { %2919 = vmatpush1.bf16.msra.mxu1 %v4123_v48  ;;  %2638 = vmatprep.mubr.bf16.mxu1 %v5620_v22  ;;  %v6079_v48 = vld [vmem:[%s5035_s10 + $0x370] ss:$24 sps:$4 sm:$0xff]  }
 0x252   : > { %2790 = vmatmul.mubr.bf16.vlgmr.msra.gmra.mxu0 %v7121_v6  ;;  %2920 = vmatprep.subr.bf16.mxu1 %v4128_v52  ;;  %7124 = vst [vmem:[#allocation39_spill] sm:$0xff] %v6079_v48  ;;  %v6083_v52 = vld [vmem:[%s5035_s10 + $0x344] ss:$24 sps:$4 sm:$0xff]  }
 0x253   : > { %2799 = vmatprep.mubr.bf16.mxu0 %v7077_v19  ;;  %3080 = vmatpush1.bf16.msra.mxu0 %v6009_v43  ;;  %7125 = vst [vmem:[#allocation42_spill] sm:$0xff] %v6083_v52 }
 0x254   : > { %3081 = vmatprep.subr.bf16.mxu0 %v6013_v14 }
 0x255   : > { %2921 = vmatpush1.bf16.msra.mxu1 %v4126_v17  ;;  %v7126_v17 = vld [vmem:[#allocation24_spill] sm:$0xff] }
 0x256   : > { %2922 = vmatprep.subr.bf16.mxu1 %v4131_v3  ;;  %v6087_v3 = vrot.slane %v6073_v11, %v7126_v17 }
 0x257   : > { %3082 = vmatpush1.bf16.msra.mxu0 %v6023_v1 }
 0x258   : > { %2639 = vmatmul.mubr.bf16.gmra.mxu1 %v5625_v12  ;;  %3083 = vmatprep.subr.bf16.mxu0 %v6027_v26 }
 0x259   : > { %2648 = vmatprep.mubr.bf16.mxu1 %v5645_v20  ;;  %2923 = vmatpush1.bf16.msra.mxu1 %v4129_v45  ;;  %v4144_v45 = vld [vmem:[%s5035_s10 + $0x40] ss:$24 sps:$4 sm:$0xff]  }
 0x25a   : > { %2800 = vmatmul.mubr.bf16.gmra.mxu0 %v5622_v54  ;;  %2924 = vmatprep.subr.bf16.mxu1 %v4134_v39  ;;  %v4152_v39 = vld [vmem:[%s5035_s10 + $0x14] ss:$24 sps:$4 sm:$0xff]  }
 0x25b   : > { %2809 = vmatprep.mubr.bf16.mxu0 %v7077_v19  ;;  %3084 = vmatpush1.bf16.msra.mxu0 %v6033_v21 }
 0x25c   : > { %3085 = vmatprep.subr.bf16.mxu0 %v6038_v55 }
 0x25d   : > { %2925 = vmatpush1.bf16.msra.mxu1 %v4132_v23  ;;  %v7127_v23 = vld [vmem:[#allocation21_spill] sm:$0xff] }
 0x25e   : > { %2926 = vmatprep.subr.bf16.mxu1 %v4137_v4  ;;  %v6095_v4 = vrot.slane %v6073_v11, %v7127_v23  ;;  %v4150_v23 = vld [vmem:[%s5035_s10 + $0x10] ss:$24 sps:$4 sm:$0xff]  }
 0x25f   : > { %3086 = vmatpush1.bf16.msra.mxu0 %v6047_v50 }
 0x260   : > { %2649 = vmatmul.mubr.bf16.gmra.mxu1 %v5673_v58  ;;  %3087 = vmatprep.subr.bf16.mxu0 %v6051_v0 }
 0x261   : > { %2658 = vmatprep.mubr.bf16.mxu1 %v5689_v57  ;;  %2927 = vmatpush1.bf16.msra.mxu1 %v4135_v24  ;;  %v6099_v24 = vld [vmem:[%s5035_s10 + $0x340] ss:$24 sps:$4 sm:$0xff]  }
 0x262   : > { %2810 = vmatmul.mubr.bf16.gmra.mxu0 %v5663_v60  ;;  %2928 = vmatprep.subr.bf16.mxu1 %v4143_v36  ;;  %7128 = vst [vmem:[#allocation44_spill] sm:$0xff] %v6099_v24 }
 0x263   : > { %2819 = vmatprep.mubr.bf16.mxu0 %v7077_v19  ;;  %3088 = vmatpush1.bf16.msra.mxu0 %v6062_v37 }
 0x264   : > { %3089 = vmatprep.subr.bf16.mxu0 %v6067_v30  ;;  %v4155_v30 = vld [vmem:[%s5035_s10 + $0x2e4] ss:$24 sps:$4 sm:$0xff]  }
 0x265   : > { %2929 = vmatpush1.bf16.msra.mxu1 %v4141_v51  ;;  %v6104_v51 = vld [vmem:[%s5035_s10 + $0x314] ss:$24 sps:$4 sm:$0xff]  }
 0x266   : > { %2930 = vmatprep.subr.bf16.mxu1 %v4146_v7  ;;  %7129 = vst [vmem:[#allocation46_spill] sm:$0xff] %v6104_v51 }
 0x267   : > { %3090 = vmatpush1.bf16.msra.mxu0 %v6079_v48  ;;  %v2469_v36 = vpop.f32.mrf.mxu1 }
 0x268   : > { %2659 = vmatmul.mubr.bf16.gmra.mxu1 %v5710_v63  ;;  %v2308_v17 = vpop.f32.mrf.mxu0  ;;  %3091 = vmatprep.subr.bf16.mxu0 %v6083_v52 }
 0x269   : > { %v2309_v7 = vadd.f32 %v2308_v17, %v6087_v3  ;;  %2668 = vmatprep.mubr.bf16.mxu1 %v5727_v32  ;;  %2931 = vmatpush1.bf16.msra.mxu1 %v4144_v45  ;;  %v2471_v11 = vpop.f32.mrf.mxu1  ;;  %v6115_v17 = vld [vmem:[%s5035_s10 + $0x310] ss:$24 sps:$4 sm:$0xff]  }
 0x26a   : > { %2820 = vmatmul.mubr.bf16.gmra.mxu0 %v5700_v61  ;;  %v2310_v48 = vpop.f32.mrf.mxu0  ;;  %2932 = vmatprep.subr.bf16.mxu1 %v4152_v39 }
 0x26b   : > { %v2470_v63 = vadd.f32 %v2469_v36, %v2309_v7  ;;  %v2311_v60 = vadd.f32 %v2310_v48, %v6095_v4  ;;  %2829 = vmatprep.mubr.bf16.mxu0 %v7077_v19  ;;  %3092 = vmatpush1.bf16.msra.mxu0 %v6099_v24  ;;  %v2473_v32 = vpop.f32.mrf.mxu1  ;;  %v4153_v36 = vld [vmem:[%s5035_s10 + $0x2e0] ss:$24 sps:$4 sm:$0xff]   ;;  %v4161_v24 = vld [vmem:[%s5035_s10 + $0x2b4] ss:$24 sps:$4 sm:$0xff]  }
 0x26c   : > { %v2312_v45 = vpop.f32.mrf.mxu0  ;;  %3093 = vmatprep.subr.bf16.mxu0 %v6104_v51 }
 0x26d   : > { %3240 = vst [vmem:[%s6118_s18] sm:$0xff] %v2470_v63  ;;  %v2472_v39 = vadd.f32 %v2471_v11, %v2311_v60  ;;  %v2313_v48 = vadd.f32 %v2312_v45, %v6087_v3  ;;  %2933 = vmatpush1.bf16.msra.mxu1 %v4150_v23  ;;  %v2475_v7 = vpop.f32.mrf.mxu1  ;;  %v4164_v45 = vld [vmem:[%s5035_s10 + $0x284] ss:$24 sps:$4 sm:$0xff]  }
 0x26e   : > { %v2314_v61 = vpop.f32.mrf.mxu0  ;;  %2934 = vmatprep.subr.bf16.mxu1 %v4155_v30  ;;  %v4159_v30 = vld [vmem:[%s5035_s10 + $0x2b0] ss:$24 sps:$4 sm:$0xff]  }
 0x26f   : > { %3241 = vst [vmem:[%s6118_s18 + $0x8] sm:$0xff] %v2472_v39  ;;  %v2474_v52 = vadd.f32 %v2473_v32, %v2313_v48  ;;  %v2315_v51 = vadd.f32 %v2314_v61, %v6095_v4  ;;  %3094 = vmatpush1.bf16.msra.mxu0 %v6115_v17  ;;  %v2479_v63 = vpop.f32.mrf.mxu1 }
 0x270   : > { %2669 = vmatmul.mubr.bf16.gmra.mxu1 %v5752_v44  ;;  %v2318_v60 = vpop.f32.mrf.mxu0 }
 0x271   : > { %3246 = vst [vmem:[%s6118_s18 + $0x30] sm:$0xff] %v2474_v52  ;;  %v2476_v11 = vadd.f32 %v2475_v7, %v2315_v51  ;;  %v2319_v23 = vadd.f32 %v2318_v60, %v6087_v3  ;;  %2678 = vmatprep.mubr.bf16.mxu1 %v5757_v31  ;;  %2935 = vmatpush2.bf16.msra.mxu1 %v4153_v36  ;;  %v2481_v61 = vpop.f32.mrf.mxu1  ;;  %v4162_v60 = vld [vmem:[%s5035_s10 + $0x280] ss:$24 sps:$4 sm:$0xff]  }
 0x272   : > { %2830 = vmatmul.mubr.bf16.gmra.mxu0 %v5742_v28  ;;  %v2320_v32 = vpop.f32.mrf.mxu0  ;;  %2936 = vmatprep.subr.bf16.mxu1 %v4161_v24 }
 0x273   : > { %3247 = vst [vmem:[%s6118_s18 + $0x38] sm:$0xff] %v2476_v11  ;;  %v2480_v39 = vadd.f32 %v2479_v63, %v2319_v23  ;;  %v2321_v52 = vadd.f32 %v2320_v32, %v6095_v4  ;;  %2839 = vmatprep.mubr.bf16.mxu0 %v7077_v19  ;;  %v2483_v51 = vpop.f32.mrf.mxu1  ;;  %v4170_v11 = vld [vmem:[%s5035_s10 + $0x254] ss:$24 sps:$4 sm:$0xff]  }
 0x274   : > { %v2322_v48 = vpop.f32.mrf.mxu0 }
 0x275   : > { %3252 = vst [vmem:[%s6118_s18 + $0x60] sm:$0xff] %v2480_v39  ;;  %v2482_v36 = vadd.f32 %v2481_v61, %v2321_v52  ;;  %v2323_v7 = vadd.f32 %v2322_v48, %v6087_v3  ;;  %2937 = vmatpush2.bf16.msra.mxu1 %v4159_v30  ;;  %v2485_v24 = vpop.f32.mrf.mxu1  ;;  %v4168_v30 = vld [vmem:[%s5035_s10 + $0x250] ss:$24 sps:$4 sm:$0xff]   ;;  %v4173_v52 = vld [vmem:[%s5035_s10 + $0x224] ss:$24 sps:$4 sm:$0xff]  }
 0x276   : > { %v2324_v28 = vpop.f32.mrf.mxu0  ;;  %2938 = vmatprep.subr.bf16.mxu1 %v4164_v45 }
 0x277   : > { %3253 = vst [vmem:[%s6118_s18 + $0x68] sm:$0xff] %v2482_v36  ;;  %v2484_v63 = vadd.f32 %v2483_v51, %v2323_v7  ;;  %v2325_v23 = vadd.f32 %v2324_v28, %v6095_v4  ;;  %v2489_v32 = vpop.f32.mrf.mxu1 }
 0x278   : > { %2679 = vmatmul.mubr.bf16.gmra.mxu1 %v5788_v41 }
 0x279   : > { %3258 = vst [vmem:[%s6118_s18 + $0x90] sm:$0xff] %v2484_v63  ;;  %v2486_v61 = vadd.f32 %v2485_v24, %v2325_v23  ;;  %2688 = vmatprep.mubr.bf16.mxu1 %v5793_v9  ;;  %2939 = vmatpush2.bf16.msra.mxu1 %v4162_v60  ;;  %v2328_v39 = vpop.f32.mrf.mxu0  ;;  %v2491_v45 = vpop.f32.mrf.mxu1  ;;  %v4171_v60 = vld [vmem:[%s5035_s10 + $0x220] ss:$24 sps:$4 sm:$0xff]   ;;  %v4179_v23 = vld [vmem:[%s5035_s10 + $0x1f4] ss:$24 sps:$4 sm:$0xff]  }
 0x27a   : > { %2840 = vmatmul.mubr.bf16.gmra.mxu0 %v5783_v53  ;;  %2940 = vmatprep.subr.bf16.mxu1 %v4170_v11  ;;  %v2329_v28 = vadd.f32 %v2328_v39, %v6087_v3 }
 0x27b   : > { %3259 = vst [vmem:[%s6118_s18 + $0x98] sm:$0xff] %v2486_v61  ;;  %2849 = vmatprep.mubr.bf16.mxu0 %v7077_v19  ;;  %v2330_v51 = vpop.f32.mrf.mxu0  ;;  %v2493_v48 = vpop.f32.mrf.mxu1 }
 0x27c   : > { %v2490_v36 = vadd.f32 %v2489_v32, %v2329_v28  ;;  %v2331_v7 = vadd.f32 %v2330_v51, %v6095_v4  ;;  %v4182_v51 = vld [vmem:[%s5035_s10 + $0x1c4] ss:$24 sps:$4 sm:$0xff]  }
 0x27d   : > { %2941 = vmatpush2.bf16.msra.mxu1 %v4168_v30  ;;  %v2332_v24 = vpop.f32.mrf.mxu0  ;;  %v2495_v63 = vpop.f32.mrf.mxu1 }
 0x27e   : > { %2942 = vmatprep.subr.bf16.mxu1 %v4173_v52  ;;  %3264 = vst [vmem:[%s6118_s18 + $0xc0] sm:$0xff] %v2490_v36  ;;  %v2492_v11 = vadd.f32 %v2491_v45, %v2331_v7  ;;  %v2333_v61 = vadd.f32 %v2332_v24, %v6087_v3  ;;  %v4177_v52 = vld [vmem:[%s5035_s10 + $0x1f0] ss:$24 sps:$4 sm:$0xff]  }
 0x27f   : > { %v2334_v39 = vpop.f32.mrf.mxu0  ;;  %v2499_v53 = vpop.f32.mrf.mxu1 }
 0x280   : > { %2689 = vmatmul.mubr.bf16.gmra.mxu1 %v5827_v46  ;;  %3265 = vst [vmem:[%s6118_s18 + $0xc8] sm:$0xff] %v2492_v11  ;;  %v2494_v32 = vadd.f32 %v2493_v48, %v2333_v61  ;;  %v2335_v30 = vadd.f32 %v2334_v39, %v6095_v4  ;;  %v4180_v61 = vld [vmem:[%s5035_s10 + $0x1c0] ss:$24 sps:$4 sm:$0xff]  }
 0x281   : > { %2698 = vmatprep.mubr.bf16.mxu1 %v5832_v62  ;;  %2943 = vmatpush2.bf16.msra.mxu1 %v4171_v60  ;;  %v2338_v28 = vpop.f32.mrf.mxu0  ;;  %v2501_v45 = vpop.f32.mrf.mxu1 }
 0x282   : > { %2850 = vmatmul.mubr.bf16.gmra.mxu0 %v5822_v33  ;;  %2944 = vmatprep.subr.bf16.mxu1 %v4179_v23  ;;  %3270 = vst [vmem:[%s6118_s18 + $0xf0] sm:$0xff] %v2494_v32  ;;  %v2496_v36 = vadd.f32 %v2495_v63, %v2335_v30  ;;  %v2339_v48 = vadd.f32 %v2338_v28, %v6087_v3  ;;  %v4188_v33 = vld [vmem:[%s5035_s10 + $0x194] ss:$24 sps:$4 sm:$0xff]  }
 0x283   : > { %2859 = vmatprep.mubr.bf16.mxu0 %v7077_v19  ;;  %v2340_v7 = vpop.f32.mrf.mxu0  ;;  %v2503_v24 = vpop.f32.mrf.mxu1 }
 0x284   : > { %3271 = vst [vmem:[%s6118_s18 + $0xf8] sm:$0xff] %v2496_v36  ;;  %v2500_v60 = vadd.f32 %v2499_v53, %v2339_v48  ;;  %v2341_v11 = vadd.f32 %v2340_v7, %v6095_v4  ;;  %v4186_v36 = vld [vmem:[%s5035_s10 + $0x190] ss:$24 sps:$4 sm:$0xff]  }
 0x285   : > { %2945 = vmatpush2.bf16.msra.mxu1 %v4177_v52  ;;  %v2342_v23 = vpop.f32.mrf.mxu0  ;;  %v2505_v39 = vpop.f32.mrf.mxu1 }
 0x286   : > { %2946 = vmatprep.subr.bf16.mxu1 %v4182_v51  ;;  %3276 = vst [vmem:[%s6118_s18 + $0x120] sm:$0xff] %v2500_v60  ;;  %v2502_v63 = vadd.f32 %v2501_v45, %v2341_v11  ;;  %v2343_v32 = vadd.f32 %v2342_v23, %v6087_v3 }
 0x287   : > { %v2344_v30 = vpop.f32.mrf.mxu0  ;;  %v2509_v28 = vpop.f32.mrf.mxu1 }
 0x288   : > { %2699 = vmatmul.mubr.bf16.gmra.mxu1 %v5869_v42  ;;  %3277 = vst [vmem:[%s6118_s18 + $0x128] sm:$0xff] %v2502_v63  ;;  %v2504_v53 = vadd.f32 %v2503_v24, %v2343_v32  ;;  %v2345_v52 = vadd.f32 %v2344_v30, %v6095_v4 }
 0x289   : > { %2708 = vmatprep.mubr.bf16.mxu1 %v5873_v16  ;;  %2947 = vmatpush2.bf16.msra.mxu1 %v4180_v61  ;;  %v2348_v51 = vpop.f32.mrf.mxu0  ;;  %v2511_v45 = vpop.f32.mrf.mxu1 }
 0x28a   : > { %2860 = vmatmul.mubr.bf16.gmra.mxu0 %v5860_v59  ;;  %2948 = vmatprep.subr.bf16.mxu1 %v4188_v33  ;;  %3282 = vst [vmem:[%s6118_s18 + $0x150] sm:$0xff] %v2504_v53  ;;  %v2506_v48 = vadd.f32 %v2505_v39, %v2345_v52  ;;  %v2349_v7 = vadd.f32 %v2348_v51, %v6087_v3 }
 0x28b   : > { %2869 = vmatprep.mubr.bf16.mxu0 %v7077_v19  ;;  %v2350_v24 = vpop.f32.mrf.mxu0  ;;  %v2513_v60 = vpop.f32.mrf.mxu1 }
 0x28c   : > { %3283 = vst [vmem:[%s6118_s18 + $0x158] sm:$0xff] %v2506_v48  ;;  %v2510_v11 = vadd.f32 %v2509_v28, %v2349_v7  ;;  %v2351_v61 = vadd.f32 %v2350_v24, %v6095_v4 }
 0x28d   : > { %2949 = vmatpush2.bf16.msra.mxu1 %v4186_v36  ;;  %v2352_v23 = vpop.f32.mrf.mxu0  ;;  %v2515_v63 = vpop.f32.mrf.mxu1 }
 0x28e   : > { %3935 = vmatprep.subr.bf16.mxu1 %v5934_v10  ;;  %3288 = vst [vmem:[%s6118_s18 + $0x180] sm:$0xff] %v2510_v11  ;;  %v2512_v33 = vadd.f32 %v2511_v45, %v2351_v61  ;;  %v2353_v39 = vadd.f32 %v2352_v23, %v6087_v3 }
 0x28f   : > { %v2354_v32 = vpop.f32.mrf.mxu0  ;;  %v2519_v30 = vpop.f32.mrf.mxu1 }
 0x290   : > { %2709 = vmatmul.mubr.bf16.gmra.mxu1 %v5902_v25  ;;  %3289 = vst [vmem:[%s6118_s18 + $0x188] sm:$0xff] %v2512_v33  ;;  %v2514_v53 = vadd.f32 %v2513_v60, %v2353_v39  ;;  %v2355_v28 = vadd.f32 %v2354_v32, %v6095_v4 }
 0x291   : > { %2718 = vmatprep.mubr.bf16.mxu1 %v5904_v2  ;;  %v2358_v52 = vpop.f32.mrf.mxu0  ;;  %v2521_v10 = vpop.f32.mrf.mxu1 }
 0x292   : > { %2870 = vmatmul.mubr.bf16.gmra.mxu0 %v5897_v47  ;;  %3294 = vst [vmem:[%s6118_s18 + $0x1b0] sm:$0xff] %v2514_v53  ;;  %v2516_v36 = vadd.f32 %v2515_v63, %v2355_v28  ;;  %v2359_v51 = vadd.f32 %v2358_v52, %v6087_v3 }
 0x293   : > { %2879 = vmatprep.mubr.bf16.mxu0 %v7077_v19  ;;  %v2360_v45 = vpop.f32.mrf.mxu0  ;;  %v2523_v48 = vpop.f32.mrf.mxu1 }
 0x294   : > { %3295 = vst [vmem:[%s6118_s18 + $0x1b8] sm:$0xff] %v2516_v36  ;;  %v2520_v7 = vadd.f32 %v2519_v30, %v2359_v51  ;;  %v2361_v24 = vadd.f32 %v2360_v45, %v6095_v4 }
 0x295   : > { %v2362_v60 = vpop.f32.mrf.mxu0  ;;  %v2525_v11 = vpop.f32.mrf.mxu1 }
 0x296   : > { %3300 = vst [vmem:[%s6118_s18 + $0x1e0] sm:$0xff] %v2520_v7  ;;  %v2522_v61 = vadd.f32 %v2521_v10, %v2361_v24  ;;  %v2363_v23 = vadd.f32 %v2362_v60, %v6087_v3 }
 0x297   : > { %v2364_v33 = vpop.f32.mrf.mxu0  ;;  %v2529_v63 = vpop.f32.mrf.mxu1 }
 0x298   : > { %2719 = vmatmul.mubr.bf16.gmra.mxu1 %v5937_v18  ;;  %3301 = vst [vmem:[%s6118_s18 + $0x1e8] sm:$0xff] %v2522_v61  ;;  %v2524_v39 = vadd.f32 %v2523_v48, %v2363_v23  ;;  %v2365_v32 = vadd.f32 %v2364_v33, %v6095_v4 }
 0x299   : > { %2728 = vmatprep.mubr.bf16.mxu1 %v5941_v8  ;;  %v2368_v30 = vpop.f32.mrf.mxu0  ;;  %v2531_v53 = vpop.f32.mrf.mxu1 }
 0x29a   : > { %2880 = vmatmul.mubr.bf16.gmra.mxu0 %v5928_v38  ;;  %3306 = vst [vmem:[%s6118_s18 + $0x210] sm:$0xff] %v2524_v39  ;;  %v2526_v28 = vadd.f32 %v2525_v11, %v2365_v32  ;;  %v2369_v52 = vadd.f32 %v2368_v30, %v6087_v3 }
 0x29b   : > { %2889 = vmatprep.mubr.bf16.mxu0 %v7077_v19  ;;  %v2370_v10 = vpop.f32.mrf.mxu0  ;;  %v2533_v36 = vpop.f32.mrf.mxu1 }
 0x29c   : > { %3307 = vst [vmem:[%s6118_s18 + $0x218] sm:$0xff] %v2526_v28  ;;  %v2530_v51 = vadd.f32 %v2529_v63, %v2369_v52  ;;  %v2371_v45 = vadd.f32 %v2370_v10, %v6095_v4 }
 0x29d   : > { %v2372_v48 = vpop.f32.mrf.mxu0  ;;  %v2535_v7 = vpop.f32.mrf.mxu1 }
 0x29e   : > { %3312 = vst [vmem:[%s6118_s18 + $0x240] sm:$0xff] %v2530_v51  ;;  %v2532_v24 = vadd.f32 %v2531_v53, %v2371_v45  ;;  %v2373_v60 = vadd.f32 %v2372_v48, %v6087_v3 }
 0x29f   : > { %v2374_v61 = vpop.f32.mrf.mxu0  ;;  %v2539_v11 = vpop.f32.mrf.mxu1 }
 0x2a0   : > { %2729 = vmatmul.mubr.bf16.gmra.mxu1 %v5954_v34  ;;  %3313 = vst [vmem:[%s6118_s18 + $0x248] sm:$0xff] %v2532_v24  ;;  %v2534_v23 = vadd.f32 %v2533_v36, %v2373_v60  ;;  %v2375_v33 = vadd.f32 %v2374_v61, %v6095_v4 }
 0x2a1   : > { %2738 = vmatprep.mubr.bf16.mxu1 %v5979_v35  ;;  %v2378_v63 = vpop.f32.mrf.mxu0  ;;  %v2541_v39 = vpop.f32.mrf.mxu1 }
 0x2a2   : > { %2890 = vmatmul.mubr.bf16.gmra.mxu0 %v5951_v27  ;;  %3318 = vst [vmem:[%s6118_s18 + $0x270] sm:$0xff] %v2534_v23  ;;  %v2536_v32 = vadd.f32 %v2535_v7, %v2375_v33  ;;  %v2379_v30 = vadd.f32 %v2378_v63, %v6087_v3 }
 0x2a3   : > { %2899 = vmatprep.mubr.bf16.mxu0 %v7077_v19  ;;  %v2380_v53 = vpop.f32.mrf.mxu0  ;;  %v2543_v28 = vpop.f32.mrf.mxu1 }
 0x2a4   : > { %3319 = vst [vmem:[%s6118_s18 + $0x278] sm:$0xff] %v2536_v32  ;;  %v2540_v52 = vadd.f32 %v2539_v11, %v2379_v30  ;;  %v2381_v10 = vadd.f32 %v2380_v53, %v6095_v4 }
 0x2a5   : > { %v2382_v36 = vpop.f32.mrf.mxu0  ;;  %v2545_v51 = vpop.f32.mrf.mxu1 }
 0x2a6   : > { %3324 = vst [vmem:[%s6118_s18 + $0x2a0] sm:$0xff] %v2540_v52  ;;  %v2542_v45 = vadd.f32 %v2541_v39, %v2381_v10  ;;  %v2383_v48 = vadd.f32 %v2382_v36, %v6087_v3 }
 0x2a7   : > { %v2384_v24 = vpop.f32.mrf.mxu0  ;;  %v2549_v7 = vpop.f32.mrf.mxu1 }
 0x2a8   : > { %2739 = vmatmul.mubr.bf16.gmra.mxu1 %v5983_v13  ;;  %3325 = vst [vmem:[%s6118_s18 + $0x2a8] sm:$0xff] %v2542_v45  ;;  %v2544_v60 = vadd.f32 %v2543_v28, %v2383_v48  ;;  %v2385_v61 = vadd.f32 %v2384_v24, %v6095_v4 }
 0x2a9   : > { %2748 = vmatprep.mubr.bf16.mxu1 %v5994_v29  ;;  %v2388_v11 = vpop.f32.mrf.mxu0  ;;  %v2551_v23 = vpop.f32.mrf.mxu1 }
 0x2aa   : > { %2900 = vmatmul.mubr.bf16.gmra.mxu0 %v5981_v5  ;;  %3330 = vst [vmem:[%s6118_s18 + $0x2d0] sm:$0xff] %v2544_v60  ;;  %v2546_v33 = vadd.f32 %v2545_v51, %v2385_v61  ;;  %v2389_v63 = vadd.f32 %v2388_v11, %v6087_v3 }
 0x2ab   : > { %2909 = vmatprep.mubr.bf16.mxu0 %v7077_v19  ;;  %v2390_v39 = vpop.f32.mrf.mxu0  ;;  %v2553_v32 = vpop.f32.mrf.mxu1 }
 0x2ac   : > { %3331 = vst [vmem:[%s6118_s18 + $0x2d8] sm:$0xff] %v2546_v33  ;;  %v2550_v30 = vadd.f32 %v2549_v7, %v2389_v63  ;;  %v2391_v53 = vadd.f32 %v2390_v39, %v6095_v4 }
 0x2ad   : > { %v2392_v28 = vpop.f32.mrf.mxu0  ;;  %v2555_v52 = vpop.f32.mrf.mxu1 }
 0x2ae   : > { %3336 = vst [vmem:[%s6118_s18 + $0x300] sm:$0xff] %v2550_v30  ;;  %v2552_v10 = vadd.f32 %v2551_v23, %v2391_v53  ;;  %v2393_v36 = vadd.f32 %v2392_v28, %v6087_v3 }
 0x2af   : > { %v2394_v45 = vpop.f32.mrf.mxu0  ;;  %v2559_v51 = vpop.f32.mrf.mxu1 }
 0x2b0   : > { %2749 = vmatmul.mubr.bf16.gmra.mxu1 %v6000_v40  ;;  %3337 = vst [vmem:[%s6118_s18 + $0x308] sm:$0xff] %v2552_v10  ;;  %v2554_v48 = vadd.f32 %v2553_v32, %v2393_v36  ;;  %v2395_v24 = vadd.f32 %v2394_v45, %v6095_v4 }
 0x2b1   : > { %2950 = vmatprep.mubr.bf16.mxu1 %v7119_v56  ;;  %v2398_v7 = vpop.f32.mrf.mxu0  ;;  %v2561_v60 = vpop.f32.mrf.mxu1 }
 0x2b2   : > { %2910 = vmatmul.mubr.bf16.gmra.mxu0 %v5998_v49  ;;  %3342 = vst [vmem:[%s6118_s18 + $0x330] sm:$0xff] %v2554_v48  ;;  %v2556_v61 = vadd.f32 %v2555_v52, %v2395_v24  ;;  %v2399_v11 = vadd.f32 %v2398_v7, %v6087_v3 }
 0x2b3   : > { %3111 = vmatprep.mubr.bf16.mxu0 %v7077_v19  ;;  %v2400_v23 = vpop.f32.mrf.mxu0  ;;  %v2563_v33 = vpop.f32.mrf.mxu1 }
 0x2b4   : > { %3343 = vst [vmem:[%s6118_s18 + $0x338] sm:$0xff] %v2556_v61  ;;  %v2560_v63 = vadd.f32 %v2559_v51, %v2399_v11  ;;  %v2401_v39 = vadd.f32 %v2400_v23, %v6095_v4 }
 0x2b5   : > { %v2402_v32 = vpop.f32.mrf.mxu0  ;;  %v2565_v30 = vpop.f32.mrf.mxu1 }
 0x2b6   : > { %3348 = vst [vmem:[%s6118_s18 + $0x360] sm:$0xff] %v2560_v63  ;;  %v2562_v56 = vadd.f32 %v2561_v60, %v2401_v39  ;;  %v2403_v53 = vadd.f32 %v2402_v32, %v6087_v3 }
 0x2b7   : > { %v2404_v28 = vpop.f32.mrf.mxu0  ;;  %v2569_v52 = vpop.f32.mrf.mxu1 }
 0x2b8   : > { %2951 = vmatmul.mubr.bf16.vlgmr.msra.gmra.mxu1 %v7120_v15  ;;  %3349 = vst [vmem:[%s6118_s18 + $0x368] sm:$0xff] %v2562_v56  ;;  %v2564_v10 = vadd.f32 %v2563_v33, %v2403_v53  ;;  %v2405_v36 = vadd.f32 %v2404_v28, %v6095_v4  ;;  %v7140_v33 = vld [vmem:[#allocation36_spill] sm:$0xff]  ;;  %v7142_v28 = vld [vmem:[#allocation11_spill] sm:$0xff] }
 0x2b9   : > { %3943 = vmatpush1.bf16.msra.mxu1 %v6009_v43  ;;  %2960 = vmatprep.mubr.bf16.mxu1 %v5620_v22  ;;  %v2408_v45 = vpop.f32.mrf.mxu0  ;;  %v2571_v51 = vpop.f32.mrf.mxu1 }
 0x2ba   : > { %3112 = vmatmul.mubr.bf16.vlgmr.msra.gmra.mxu0 %v7121_v6  ;;  %3936 = vmatprep.subr.bf16.mxu1 %v6013_v14  ;;  %3354 = vst [vmem:[%s6118_s18 + $0x390] sm:$0xff] %v2564_v10  ;;  %v2566_v48 = vadd.f32 %v2565_v30, %v2405_v36  ;;  %v2409_v15 = vadd.f32 %v2408_v45, %v6087_v3 }
 0x2bb   : > { %3121 = vmatprep.mubr.bf16.mxu0 %v7077_v19  ;;  %v2410_v24 = vpop.f32.mrf.mxu0  ;;  %v2573_v22 = vpop.f32.mrf.mxu1 }
 0x2bc   : > { %3355 = vst [vmem:[%s6118_s18 + $0x398] sm:$0xff] %v2566_v48  ;;  %v2570_v7 = vadd.f32 %v2569_v52, %v2409_v15  ;;  %v2411_v43 = vadd.f32 %v2410_v24, %v6095_v4  ;;  %v1538_v52 = vsub.s32 3, %v7142_v28  ;;  %v7144_v48 = vld [vmem:[#allocation38_spill] sm:$0xff] }
 0x2bd   : > { %3944 = vmatpush1.bf16.msra.mxu1 %v6023_v1  ;;  %v2412_v6 = vpop.f32.mrf.mxu0  ;;  %v2575_v1 = vpop.f32.mrf.mxu1 }
 0x2be   : > { %3937 = vmatprep.subr.bf16.mxu1 %v6027_v26  ;;  %3360 = vst [vmem:[%s6118_s18 + $0x3c0] sm:$0xff] %v2570_v7  ;;  %v2572_v14 = vadd.f32 %v2571_v51, %v2411_v43  ;;  %v2413_v60 = vadd.f32 %v2412_v6, %v6087_v3  ;;  %v7143_v51 = vld [vmem:[#allocation22_spill] sm:$0xff] }
 0x2bf   : > { %v2414_v61 = vpop.f32.mrf.mxu0 }
 0x2c0   : > { %2961 = vmatmul.mubr.bf16.gmra.mxu1 %v5625_v12  ;;  %3361 = vst [vmem:[%s6118_s18 + $0x3c8] sm:$0xff] %v2572_v14  ;;  %v2574_v11 = vadd.f32 %v2573_v22, %v2413_v60  ;;  %v2415_v23 = vadd.f32 %v2414_v61, %v6095_v4  ;;  %v7130_v12 = vld [vmem:[#allocation32_spill] sm:$0xff] }
 0x2c1   : > { %2970 = vmatprep.mubr.bf16.mxu1 %v5645_v20  ;;  %3945 = vmatpush1.bf16.msra.mxu1 %v6033_v21  ;;  %v7132_v20 = vld [vmem:[#allocation39_spill] sm:$0xff]  ;;  %v7133_v21 = vld [vmem:[#allocation42_spill] sm:$0xff] }
 0x2c2   : > { %3122 = vmatmul.mubr.bf16.gmra.mxu0 %v5622_v54  ;;  %3938 = vmatprep.subr.bf16.mxu1 %v6038_v55  ;;  %3366 = vst [vmem:[%s6118_s18 + $0x3f0] sm:$0xff] %v2574_v11  ;;  %v2576_v26 = vadd.f32 %v2575_v1, %v2415_v23  ;;  %v7131_v54 = vld [vmem:[#allocation40_spill] sm:$0xff]  ;;  %v7134_v55 = vld [vmem:[#allocation34_spill] sm:$0xff] }
 0x2c3   : > { %3131 = vmatprep.mubr.bf16.mxu0 %v7077_v19 }
 0x2c4   : > { %3367 = vst [vmem:[%s6118_s18 + $0x3f8] sm:$0xff] %v2576_v26 }
 0x2c5   : > { %3946 = vmatpush1.bf16.msra.mxu1 %v6047_v50  ;;  %v7135_v50 = vld [vmem:[#allocation35_spill] sm:$0xff] }
 0x2c6   : > { %3939 = vmatprep.subr.bf16.mxu1 %v6051_v0  ;;  %v7136_v0 = vld [vmem:[#allocation44_spill] sm:$0xff] }
 0x2c8   : > { %2971 = vmatmul.mubr.bf16.gmra.mxu1 %v5673_v58  ;;  %v7137_v58 = vld [vmem:[#allocation30_spill] sm:$0xff] }
 0x2c9   : > { %2980 = vmatprep.mubr.bf16.mxu1 %v5689_v57  ;;  %3947 = vmatpush1.bf16.msra.mxu1 %v6062_v37  ;;  %v7138_v57 = vld [vmem:[#allocation46_spill] sm:$0xff]  ;;  %v7139_v37 = vld [vmem:[#allocation33_spill] sm:$0xff] }
 0x2ca   : > { %3132 = vmatmul.mubr.bf16.gmra.mxu0 %v7130_v12  ;;  %3940 = vmatprep.subr.bf16.mxu1 %v7131_v54 }
 0x2cb   : > { %3141 = vmatprep.mubr.bf16.mxu0 %v7077_v19 }
 0x2cd   : > { %3948 = vmatpush1.bf16.msra.mxu1 %v7132_v20 }
 0x2ce   : > { %3941 = vmatprep.subr.bf16.mxu1 %v7133_v21 }
 0x2d0   : > { %2981 = vmatmul.mubr.bf16.gmra.mxu1 %v7134_v55 }
 0x2d1   : > { %2990 = vmatprep.mubr.bf16.mxu1 %v7135_v50  ;;  %3949 = vmatpush1.bf16.msra.mxu1 %v7136_v0 }
 0x2d2   : > { %3142 = vmatmul.mubr.bf16.gmra.mxu0 %v7137_v58  ;;  %3942 = vmatprep.subr.bf16.mxu1 %v7138_v57 }
 0x2d3   : > { %3151 = vmatprep.mubr.bf16.mxu0 %v7077_v19 }
 0x2d5   : > { %3950 = vmatpush1.bf16.msra.mxu1 %v6115_v17  ;;  %v7141_v17 = vld [vmem:[#allocation37_spill] sm:$0xff] }
 0x2d8   : > { %2991 = vmatmul.mubr.bf16.gmra.mxu1 %v5752_v44 }
 0x2d9   : > { %3000 = vmatprep.mubr.bf16.mxu1 %v5757_v31 }
 0x2da   : > { %3152 = vmatmul.mubr.bf16.gmra.mxu0 %v7139_v37 }
 0x2db   : > { %3161 = vmatprep.mubr.bf16.mxu0 %v7077_v19 }
 0x2e0   : > { %3001 = vmatmul.mubr.bf16.gmra.mxu1 %v5788_v41 }
 0x2e1   : > { %3010 = vmatprep.mubr.bf16.mxu1 %v5793_v9 }
 0x2e2   : > { %3162 = vmatmul.mubr.bf16.gmra.mxu0 %v7140_v33 }
 0x2e3   : > { %3171 = vmatprep.mubr.bf16.mxu0 %v7077_v19 }
 0x2e8   : > { %3011 = vmatmul.mubr.bf16.gmra.mxu1 %v5827_v46 }
 0x2e9   : > { %3020 = vmatprep.mubr.bf16.mxu1 %v5832_v62 }
 0x2ea   : > { %3172 = vmatmul.mubr.bf16.gmra.mxu0 %v7141_v17 }
 0x2eb   : > { %3181 = vmatprep.mubr.bf16.mxu0 %v7077_v19 }
 0x2f0   : > { %3021 = vmatmul.mubr.bf16.gmra.mxu1 %v5869_v42 }
 0x2f1   : > { %3030 = vmatprep.mubr.bf16.mxu1 %v5873_v16 }
 0x2f2   : > { %3182 = vmatmul.mubr.bf16.gmra.mxu0 %v5860_v59 }
 0x2f3   : > { %3191 = vmatprep.mubr.bf16.mxu0 %v7077_v19 }
 0x2f8   : > { %3031 = vmatmul.mubr.bf16.gmra.mxu1 %v5902_v25 }
 0x2f9   : > { %3040 = vmatprep.mubr.bf16.mxu1 %v5904_v2 }
 0x2fa   : > { %3192 = vmatmul.mubr.bf16.gmra.mxu0 %v5897_v47 }
 0x2fb   : > { %3201 = vmatprep.mubr.bf16.mxu0 %v7077_v19 }
 0x300   : > { %v2579_v44 = vpop.f32.mrf.mxu1  ;;  %3041 = vmatmul.mubr.bf16.gmra.mxu1 %v5937_v18 }
 0x301   : > { %v2418_v31 = vpop.f32.mrf.mxu0  ;;  %3050 = vmatprep.mubr.bf16.mxu1 %v5941_v8 }
 0x302   : > { %v2419_v41 = vadd.f32 %v2418_v31, %v6087_v3  ;;  %3202 = vmatmul.mubr.bf16.gmra.mxu0 %v5928_v38  ;;  %v2581_v9 = vpop.f32.mrf.mxu1 }
 0x303   : > { %v2420_v46 = vpop.f32.mrf.mxu0  ;;  %3211 = vmatprep.mubr.bf16.mxu0 %v7077_v19 }
 0x304   : > { %v2580_v62 = vadd.f32 %v2579_v44, %v2419_v41  ;;  %v2421_v59 = vadd.f32 %v2420_v46, %v6095_v4  ;;  %v2583_v42 = vpop.f32.mrf.mxu1 }
 0x305   : > { %v2422_v16 = vpop.f32.mrf.mxu0 }
 0x306   : > { %3372 = vst [vmem:[%s6118_s18 + $0x420] sm:$0xff] %v2580_v62  ;;  %v2582_v47 = vadd.f32 %v2581_v9, %v2421_v59  ;;  %v2423_v25 = vadd.f32 %v2422_v16, %v6087_v3  ;;  %v2585_v2 = vpop.f32.mrf.mxu1 }
 0x307   : > { %v2424_v18 = vpop.f32.mrf.mxu0 }
 0x308   : > { %3373 = vst [vmem:[%s6118_s18 + $0x428] sm:$0xff] %v2582_v47  ;;  %v2584_v8 = vadd.f32 %v2583_v42, %v2423_v25  ;;  %v2425_v38 = vadd.f32 %v2424_v18, %v6095_v4  ;;  %v2589_v63 = vpop.f32.mrf.mxu1  ;;  %3051 = vmatmul.mubr.bf16.gmra.mxu1 %v5954_v34 }
 0x309   : > { %v2428_v39 = vpop.f32.mrf.mxu0  ;;  %3060 = vmatprep.mubr.bf16.mxu1 %v5979_v35  ;;  %v6330_v35 = vrot.slane %v7144_v48, %v7143_v51 }
 0x30a   : > { %3378 = vst [vmem:[%s6118_s18 + $0x450] sm:$0xff] %v2584_v8  ;;  %v2586_v32 = vadd.f32 %v2585_v2, %v2425_v38  ;;  %v2429_v30 = vadd.f32 %v2428_v39, %v6087_v3  ;;  %3212 = vmatmul.mubr.bf16.gmra.mxu0 %v5951_v27  ;;  %v2591_v56 = vpop.f32.mrf.mxu1  ;;  %v6334_v27 = vrot.slane %v7144_v48, %v1538_v52 }
 0x30b   : > { %v2430_v53 = vpop.f32.mrf.mxu0 }
 0x30c   : > { %3379 = vst [vmem:[%s6118_s18 + $0x458] sm:$0xff] %v2586_v32  ;;  %v2590_v10 = vadd.f32 %v2589_v63, %v2429_v30  ;;  %v2431_v36 = vadd.f32 %v2430_v53, %v6095_v4  ;;  %v2593_v34 = vpop.f32.mrf.mxu1 }
 0x30d   : > { %v2432_v45 = vpop.f32.mrf.mxu0 }
 0x30e   : > { %3384 = vst [vmem:[%s6118_s18 + $0x480] sm:$0xf] %v2590_v10  ;;  %v2592_v3 = vadd.f32 %v2591_v56, %v2431_v36  ;;  %v2594_v15 = vpop.f32.mrf.mxu1 }
 0x30f   : > { %v2433_v24 = vpop.f32.mrf.mxu0 }
 0x310   : > { %3385 = vst [vmem:[%s6118_s18 + $0x488] sm:$0xf] %v2592_v3  ;;  %v2630_v7 = vpop.f32.mrf.mxu1  ;;  %3061 = vmatmul.mubr.bf16.gmra.mxu1 %v5983_v13 }
 0x311   : > { %v2631_v4 = vadd.f32 %v2630_v7, %v6330_v35  ;;  %3070 = vmatprep.mubr.bf16.mxu1 %v5994_v29 }
 0x312   : > { %v2791_v43 = vpop.f32.mrf.mxu0  ;;  %v2632_v22 = vpop.f32.mrf.mxu1 }
 0x313   : > { %v2792_v6 = vadd.f32 %v2791_v43, %v2631_v4  ;;  %v2633_v14 = vadd.f32 %v2632_v22, %v6334_v27 }
 0x314   : > { %v2793_v60 = vpop.f32.mrf.mxu0  ;;  %v2634_v61 = vpop.f32.mrf.mxu1 }
 0x315   : > { %3242 = vst [vmem:[%s6118_s18 + $0x10] sm:$0xff] %v2792_v6  ;;  %v2794_v11 = vadd.f32 %v2793_v60, %v2633_v14  ;;  %v2635_v23 = vadd.f32 %v2634_v61, %v6330_v35 }
 0x316   : > { %v2795_v1 = vpop.f32.mrf.mxu0  ;;  %v2636_v26 = vpop.f32.mrf.mxu1 }
 0x317   : > { %3243 = vst [vmem:[%s6118_s18 + $0x18] sm:$0xff] %v2794_v11  ;;  %v2796_v13 = vadd.f32 %v2795_v1, %v2635_v23  ;;  %v2637_v29 = vadd.f32 %v2636_v26, %v6334_v27 }
 0x318   : > { %v2797_v12 = vpop.f32.mrf.mxu0  ;;  %v2640_v54 = vpop.f32.mrf.mxu1  ;;  %3071 = vmatmul.mubr.bf16.gmra.mxu1 %v6000_v40 }
 0x319   : > { %3248 = vst [vmem:[%s6118_s18 + $0x40] sm:$0xff] %v2796_v13  ;;  %v2798_v20 = vadd.f32 %v2797_v12, %v2637_v29  ;;  %v2641_v21 = vadd.f32 %v2640_v54, %v6330_v35  ;;  %3221 = vmatprep.mubr.bf16.mxu1 %v7077_v19 }
 0x31a   : > { %v2801_v55 = vpop.f32.mrf.mxu0  ;;  %v2642_v50 = vpop.f32.mrf.mxu1 }
 0x31b   : > { %3249 = vst [vmem:[%s6118_s18 + $0x48] sm:$0xff] %v2798_v20  ;;  %v2802_v0 = vadd.f32 %v2801_v55, %v2641_v21  ;;  %v2643_v58 = vadd.f32 %v2642_v50, %v6334_v27 }
 0x31c   : > { %v2803_v57 = vpop.f32.mrf.mxu0  ;;  %v2644_v37 = vpop.f32.mrf.mxu1 }
 0x31d   : > { %3254 = vst [vmem:[%s6118_s18 + $0x70] sm:$0xff] %v2802_v0  ;;  %v2804_v33 = vadd.f32 %v2803_v57, %v2643_v58  ;;  %v2645_v40 = vadd.f32 %v2644_v37, %v6330_v35 }
 0x31e   : > { %v2805_v17 = vpop.f32.mrf.mxu0  ;;  %v2646_v44 = vpop.f32.mrf.mxu1 }
 0x31f   : > { %3255 = vst [vmem:[%s6118_s18 + $0x78] sm:$0xff] %v2804_v33  ;;  %v2806_v31 = vadd.f32 %v2805_v17, %v2645_v40  ;;  %v2647_v41 = vadd.f32 %v2646_v44, %v6334_v27 }
 0x320   : > { %v2807_v9 = vpop.f32.mrf.mxu0  ;;  %v2650_v46 = vpop.f32.mrf.mxu1  ;;  %3222 = vmatmul.mubr.bf16.vlgmr.msra.gmra.mxu1 %v5981_v5 }
 0x321   : > { %3260 = vst [vmem:[%s6118_s18 + $0xa0] sm:$0xff] %v2806_v31  ;;  %v2808_v62 = vadd.f32 %v2807_v9, %v2647_v41  ;;  %v2651_v59 = vadd.f32 %v2650_v46, %v6330_v35  ;;  %3231 = vmatprep.mubr.bf16.mxu1 %v7077_v19 }
 0x322   : > { %v2811_v42 = vpop.f32.mrf.mxu0  ;;  %v2652_v16 = vpop.f32.mrf.mxu1 }
 0x323   : > { %3261 = vst [vmem:[%s6118_s18 + $0xa8] sm:$0xff] %v2808_v62  ;;  %v2812_v47 = vadd.f32 %v2811_v42, %v2651_v59  ;;  %v2653_v25 = vadd.f32 %v2652_v16, %v6334_v27 }
 0x324   : > { %v2813_v2 = vpop.f32.mrf.mxu0  ;;  %v2654_v18 = vpop.f32.mrf.mxu1 }
 0x325   : > { %3266 = vst [vmem:[%s6118_s18 + $0xd0] sm:$0xff] %v2812_v47  ;;  %v2814_v8 = vadd.f32 %v2813_v2, %v2653_v25  ;;  %v2655_v5 = vadd.f32 %v2654_v18, %v6330_v35 }
 0x326   : > { %v2815_v38 = vpop.f32.mrf.mxu0  ;;  %v2656_v63 = vpop.f32.mrf.mxu1 }
 0x327   : > { %3267 = vst [vmem:[%s6118_s18 + $0xd8] sm:$0xff] %v2814_v8  ;;  %v2816_v39 = vadd.f32 %v2815_v38, %v2655_v5  ;;  %v2657_v19 = vadd.f32 %v2656_v63, %v6334_v27 }
 0x328   : > { %v2817_v32 = vpop.f32.mrf.mxu0  ;;  %v2660_v30 = vpop.f32.mrf.mxu1  ;;  %3232 = vmatmul.mubr.bf16.gmra.mxu1 %v5998_v49 }
 0x329   : > { %3272 = vst [vmem:[%s6118_s18 + $0x100] sm:$0xff] %v2816_v39  ;;  %v2818_v56 = vadd.f32 %v2817_v32, %v2657_v19  ;;  %v2661_v53 = vadd.f32 %v2660_v30, %v6330_v35 }
 0x32a   : > { %v2821_v52 = vpop.f32.mrf.mxu0  ;;  %v2662_v10 = vpop.f32.mrf.mxu1 }
 0x32b   : > { %3273 = vst [vmem:[%s6118_s18 + $0x108] sm:$0xff] %v2818_v56  ;;  %v2822_v36 = vadd.f32 %v2821_v52, %v2661_v53  ;;  %v2663_v34 = vadd.f32 %v2662_v10, %v6334_v27 }
 0x32c   : > { %v2823_v45 = vpop.f32.mrf.mxu0  ;;  %v2664_v51 = vpop.f32.mrf.mxu1 }
 0x32d   : > { %3278 = vst [vmem:[%s6118_s18 + $0x130] sm:$0xff] %v2822_v36  ;;  %v2824_v48 = vadd.f32 %v2823_v45, %v2663_v34  ;;  %v2665_v3 = vadd.f32 %v2664_v51, %v6330_v35 }
 0x32e   : > { %v2825_v49 = vpop.f32.mrf.mxu0  ;;  %v2666_v15 = vpop.f32.mrf.mxu1 }
 0x32f   : > { %3279 = vst [vmem:[%s6118_s18 + $0x138] sm:$0xff] %v2824_v48  ;;  %v2826_v24 = vadd.f32 %v2825_v49, %v2665_v3  ;;  %v2667_v7 = vadd.f32 %v2666_v15, %v6334_v27 }
 0x330   : > { %v2827_v4 = vpop.f32.mrf.mxu0  ;;  %v2670_v43 = vpop.f32.mrf.mxu1 }
 0x331   : > { %3284 = vst [vmem:[%s6118_s18 + $0x160] sm:$0xff] %v2826_v24  ;;  %v2828_v22 = vadd.f32 %v2827_v4, %v2667_v7  ;;  %v2671_v6 = vadd.f32 %v2670_v43, %v6330_v35 }
 0x332   : > { %v2831_v14 = vpop.f32.mrf.mxu0  ;;  %v2672_v60 = vpop.f32.mrf.mxu1 }
 0x333   : > { %3285 = vst [vmem:[%s6118_s18 + $0x168] sm:$0xff] %v2828_v22  ;;  %v2832_v61 = vadd.f32 %v2831_v14, %v2671_v6  ;;  %v2673_v11 = vadd.f32 %v2672_v60, %v6334_v27 }
 0x334   : > { %v2833_v23 = vpop.f32.mrf.mxu0  ;;  %v2674_v1 = vpop.f32.mrf.mxu1 }
 0x335   : > { %3290 = vst [vmem:[%s6118_s18 + $0x190] sm:$0xff] %v2832_v61  ;;  %v2834_v26 = vadd.f32 %v2833_v23, %v2673_v11  ;;  %v2675_v13 = vadd.f32 %v2674_v1, %v6330_v35 }
 0x336   : > { %v2835_v29 = vpop.f32.mrf.mxu0  ;;  %v2676_v12 = vpop.f32.mrf.mxu1 }
 0x337   : > { %3291 = vst [vmem:[%s6118_s18 + $0x198] sm:$0xff] %v2834_v26  ;;  %v2836_v54 = vadd.f32 %v2835_v29, %v2675_v13  ;;  %v2677_v20 = vadd.f32 %v2676_v12, %v6334_v27 }
 0x338   : > { %v2837_v21 = vpop.f32.mrf.mxu0  ;;  %v2680_v55 = vpop.f32.mrf.mxu1 }
 0x339   : > { %3296 = vst [vmem:[%s6118_s18 + $0x1c0] sm:$0xff] %v2836_v54  ;;  %v2838_v50 = vadd.f32 %v2837_v21, %v2677_v20  ;;  %v2681_v0 = vadd.f32 %v2680_v55, %v6330_v35 }
 0x33a   : > { %v2841_v58 = vpop.f32.mrf.mxu0  ;;  %v2682_v57 = vpop.f32.mrf.mxu1 }
 0x33b   : > { %3297 = vst [vmem:[%s6118_s18 + $0x1c8] sm:$0xff] %v2838_v50  ;;  %v2842_v37 = vadd.f32 %v2841_v58, %v2681_v0  ;;  %v2683_v33 = vadd.f32 %v2682_v57, %v6334_v27 }
 0x33c   : > { %v2843_v40 = vpop.f32.mrf.mxu0  ;;  %v2684_v17 = vpop.f32.mrf.mxu1 }
 0x33d   : > { %3302 = vst [vmem:[%s6118_s18 + $0x1f0] sm:$0xff] %v2842_v37  ;;  %v2844_v44 = vadd.f32 %v2843_v40, %v2683_v33  ;;  %v2685_v31 = vadd.f32 %v2684_v17, %v6330_v35 }
 0x33e   : > { %v2845_v41 = vpop.f32.mrf.mxu0  ;;  %v2686_v9 = vpop.f32.mrf.mxu1 }
 0x33f   : > { %3303 = vst [vmem:[%s6118_s18 + $0x1f8] sm:$0xff] %v2844_v44  ;;  %v2846_v46 = vadd.f32 %v2845_v41, %v2685_v31  ;;  %v2687_v62 = vadd.f32 %v2686_v9, %v6334_v27 }
 0x340   : > { %v2847_v59 = vpop.f32.mrf.mxu0  ;;  %v2690_v42 = vpop.f32.mrf.mxu1 }
 0x341   : > { %3308 = vst [vmem:[%s6118_s18 + $0x220] sm:$0xff] %v2846_v46  ;;  %v2848_v16 = vadd.f32 %v2847_v59, %v2687_v62  ;;  %v2691_v47 = vadd.f32 %v2690_v42, %v6330_v35 }
 0x342   : > { %v2851_v25 = vpop.f32.mrf.mxu0  ;;  %v2692_v2 = vpop.f32.mrf.mxu1 }
 0x343   : > { %3309 = vst [vmem:[%s6118_s18 + $0x228] sm:$0xff] %v2848_v16  ;;  %v2852_v18 = vadd.f32 %v2851_v25, %v2691_v47  ;;  %v2693_v8 = vadd.f32 %v2692_v2, %v6334_v27 }
 0x344   : > { %v2853_v5 = vpop.f32.mrf.mxu0  ;;  %v2694_v38 = vpop.f32.mrf.mxu1 }
 0x345   : > { %3314 = vst [vmem:[%s6118_s18 + $0x250] sm:$0xff] %v2852_v18  ;;  %v2854_v63 = vadd.f32 %v2853_v5, %v2693_v8  ;;  %v2695_v39 = vadd.f32 %v2694_v38, %v6330_v35 }
 0x346   : > { %v2855_v19 = vpop.f32.mrf.mxu0  ;;  %v2696_v32 = vpop.f32.mrf.mxu1 }
 0x347   : > { %3315 = vst [vmem:[%s6118_s18 + $0x258] sm:$0xff] %v2854_v63  ;;  %v2856_v30 = vadd.f32 %v2855_v19, %v2695_v39  ;;  %v2697_v56 = vadd.f32 %v2696_v32, %v6334_v27 }
 0x348   : > { %v2857_v53 = vpop.f32.mrf.mxu0  ;;  %v2700_v52 = vpop.f32.mrf.mxu1 }
 0x349   : > { %3320 = vst [vmem:[%s6118_s18 + $0x280] sm:$0xff] %v2856_v30  ;;  %v2858_v10 = vadd.f32 %v2857_v53, %v2697_v56  ;;  %v2701_v36 = vadd.f32 %v2700_v52, %v6330_v35 }
 0x34a   : > { %v2861_v34 = vpop.f32.mrf.mxu0  ;;  %v2702_v45 = vpop.f32.mrf.mxu1 }
 0x34b   : > { %3321 = vst [vmem:[%s6118_s18 + $0x288] sm:$0xff] %v2858_v10  ;;  %v2862_v51 = vadd.f32 %v2861_v34, %v2701_v36  ;;  %v2703_v48 = vadd.f32 %v2702_v45, %v6334_v27 }
 0x34c   : > { %v2863_v3 = vpop.f32.mrf.mxu0  ;;  %v2704_v49 = vpop.f32.mrf.mxu1 }
 0x34d   : > { %3326 = vst [vmem:[%s6118_s18 + $0x2b0] sm:$0xff] %v2862_v51  ;;  %v2864_v15 = vadd.f32 %v2863_v3, %v2703_v48  ;;  %v2705_v24 = vadd.f32 %v2704_v49, %v6330_v35 }
 0x34e   : > { %v2865_v7 = vpop.f32.mrf.mxu0  ;;  %v2706_v4 = vpop.f32.mrf.mxu1 }
 0x34f   : > { %3327 = vst [vmem:[%s6118_s18 + $0x2b8] sm:$0xff] %v2864_v15  ;;  %v2866_v43 = vadd.f32 %v2865_v7, %v2705_v24  ;;  %v2707_v22 = vadd.f32 %v2706_v4, %v6334_v27 }
 0x350   : > { %v2867_v6 = vpop.f32.mrf.mxu0  ;;  %v2710_v14 = vpop.f32.mrf.mxu1 }
 0x351   : > { %3332 = vst [vmem:[%s6118_s18 + $0x2e0] sm:$0xff] %v2866_v43  ;;  %v2868_v60 = vadd.f32 %v2867_v6, %v2707_v22  ;;  %v2711_v61 = vadd.f32 %v2710_v14, %v6330_v35 }
 0x352   : > { %v2871_v11 = vpop.f32.mrf.mxu0  ;;  %v2712_v23 = vpop.f32.mrf.mxu1 }
 0x353   : > { %3333 = vst [vmem:[%s6118_s18 + $0x2e8] sm:$0xff] %v2868_v60  ;;  %v2872_v1 = vadd.f32 %v2871_v11, %v2711_v61  ;;  %v2713_v26 = vadd.f32 %v2712_v23, %v6334_v27 }
 0x354   : > { %v2873_v13 = vpop.f32.mrf.mxu0  ;;  %v2714_v29 = vpop.f32.mrf.mxu1 }
 0x355   : > { %3338 = vst [vmem:[%s6118_s18 + $0x310] sm:$0xff] %v2872_v1  ;;  %v2874_v12 = vadd.f32 %v2873_v13, %v2713_v26  ;;  %v2715_v54 = vadd.f32 %v2714_v29, %v6330_v35  ;;  %v1542_v26 = vsub.s32 4, %v7142_v28 }
 0x356   : > { %v2875_v20 = vpop.f32.mrf.mxu0  ;;  %v2716_v21 = vpop.f32.mrf.mxu1 }
 0x357   : > { %3339 = vst [vmem:[%s6118_s18 + $0x318] sm:$0xff] %v2874_v12  ;;  %v2876_v55 = vadd.f32 %v2875_v20, %v2715_v54  ;;  %v2717_v50 = vadd.f32 %v2716_v21, %v6334_v27  ;;  %v1546_v20 = vsub.s32 5, %v7142_v28 }
 0x358   : > { %v2877_v0 = vpop.f32.mrf.mxu0  ;;  %v2720_v58 = vpop.f32.mrf.mxu1 }
 0x359   : > { %3344 = vst [vmem:[%s6118_s18 + $0x340] sm:$0xff] %v2876_v55  ;;  %v2878_v57 = vadd.f32 %v2877_v0, %v2717_v50  ;;  %v2721_v37 = vadd.f32 %v2720_v58, %v6330_v35  ;;  %v4245_v0 = vld [vmem:[%s6058_s23] sm:$0x3f] }
 0x35a   : > { %v2881_v33 = vpop.f32.mrf.mxu0  ;;  %v2722_v40 = vpop.f32.mrf.mxu1  ;;  %v6446_v58 = vrot.slane %v4245_v0, %v1542_v26 }
 0x35b   : > { %3345 = vst [vmem:[%s6118_s18 + $0x348] sm:$0xff] %v2878_v57  ;;  %v2882_v17 = vadd.f32 %v2881_v33, %v2721_v37  ;;  %v2723_v44 = vadd.f32 %v2722_v40, %v6334_v27  ;;  %v6449_v37 = vrot.slane %v4245_v0, %v1546_v20 }
 0x35c   : > { %v2883_v31 = vpop.f32.mrf.mxu0  ;;  %v2724_v41 = vpop.f32.mrf.mxu1 }
 0x35d   : > { %3350 = vst [vmem:[%s6118_s18 + $0x370] sm:$0xff] %v2882_v17  ;;  %v2884_v9 = vadd.f32 %v2883_v31, %v2723_v44  ;;  %v2725_v46 = vadd.f32 %v2724_v41, %v6330_v35 }
 0x35e   : > { %v2885_v62 = vpop.f32.mrf.mxu0  ;;  %v2726_v59 = vpop.f32.mrf.mxu1 }
 0x35f   : > { %3351 = vst [vmem:[%s6118_s18 + $0x378] sm:$0xff] %v2884_v9  ;;  %v2886_v42 = vadd.f32 %v2885_v62, %v2725_v46  ;;  %v2727_v16 = vadd.f32 %v2726_v59, %v6334_v27 }
 0x360   : > { %v2887_v47 = vpop.f32.mrf.mxu0  ;;  %v2730_v25 = vpop.f32.mrf.mxu1 }
 0x361   : > { %3356 = vst [vmem:[%s6118_s18 + $0x3a0] sm:$0xff] %v2886_v42  ;;  %v2888_v2 = vadd.f32 %v2887_v47, %v2727_v16  ;;  %v2731_v18 = vadd.f32 %v2730_v25, %v6330_v35 }
 0x362   : > { %v2891_v8 = vpop.f32.mrf.mxu0  ;;  %v2732_v5 = vpop.f32.mrf.mxu1 }
 0x363   : > { %3357 = vst [vmem:[%s6118_s18 + $0x3a8] sm:$0xff] %v2888_v2  ;;  %v2892_v38 = vadd.f32 %v2891_v8, %v2731_v18  ;;  %v2733_v63 = vadd.f32 %v2732_v5, %v6334_v27 }
 0x364   : > { %v2893_v39 = vpop.f32.mrf.mxu0  ;;  %v2734_v19 = vpop.f32.mrf.mxu1 }
 0x365   : > { %3362 = vst [vmem:[%s6118_s18 + $0x3d0] sm:$0xff] %v2892_v38  ;;  %v2894_v32 = vadd.f32 %v2893_v39, %v2733_v63  ;;  %v2735_v30 = vadd.f32 %v2734_v19, %v6330_v35 }
 0x366   : > { %v2895_v56 = vpop.f32.mrf.mxu0  ;;  %v2736_v53 = vpop.f32.mrf.mxu1 }
 0x367   : > { %3363 = vst [vmem:[%s6118_s18 + $0x3d8] sm:$0xff] %v2894_v32  ;;  %v2896_v52 = vadd.f32 %v2895_v56, %v2735_v30  ;;  %v2737_v10 = vadd.f32 %v2736_v53, %v6334_v27 }
 0x368   : > { %v2897_v36 = vpop.f32.mrf.mxu0  ;;  %v2740_v34 = vpop.f32.mrf.mxu1 }
 0x369   : > { %3368 = vst [vmem:[%s6118_s18 + $0x400] sm:$0xff] %v2896_v52  ;;  %v2898_v45 = vadd.f32 %v2897_v36, %v2737_v10  ;;  %v2741_v51 = vadd.f32 %v2740_v34, %v6330_v35 }
 0x36a   : > { %v2901_v48 = vpop.f32.mrf.mxu0  ;;  %v2742_v3 = vpop.f32.mrf.mxu1 }
 0x36b   : > { %3369 = vst [vmem:[%s6118_s18 + $0x408] sm:$0xff] %v2898_v45  ;;  %v2902_v49 = vadd.f32 %v2901_v48, %v2741_v51  ;;  %v2743_v15 = vadd.f32 %v2742_v3, %v6334_v27 }
 0x36c   : > { %v2903_v24 = vpop.f32.mrf.mxu0  ;;  %v2744_v7 = vpop.f32.mrf.mxu1 }
 0x36d   : > { %3374 = vst [vmem:[%s6118_s18 + $0x430] sm:$0xff] %v2902_v49  ;;  %v2904_v4 = vadd.f32 %v2903_v24, %v2743_v15  ;;  %v2745_v43 = vadd.f32 %v2744_v7, %v6330_v35 }
 0x36e   : > { %v2905_v22 = vpop.f32.mrf.mxu0  ;;  %v2746_v6 = vpop.f32.mrf.mxu1 }
 0x36f   : > { %3375 = vst [vmem:[%s6118_s18 + $0x438] sm:$0xff] %v2904_v4  ;;  %v2906_v14 = vadd.f32 %v2905_v22, %v2745_v43  ;;  %v2747_v60 = vadd.f32 %v2746_v6, %v6334_v27 }
 0x370   : > { %v2907_v61 = vpop.f32.mrf.mxu0  ;;  %v2750_v11 = vpop.f32.mrf.mxu1 }
 0x371   : > { %3380 = vst [vmem:[%s6118_s18 + $0x460] sm:$0xff] %v2906_v14  ;;  %v2908_v23 = vadd.f32 %v2907_v61, %v2747_v60  ;;  %v2751_v1 = vadd.f32 %v2750_v11, %v6330_v35 }
 0x372   : > { %v2911_v13 = vpop.f32.mrf.mxu0  ;;  %v2752_v29 = vpop.f32.mrf.mxu1 }
 0x373   : > { %3381 = vst [vmem:[%s6118_s18 + $0x468] sm:$0xff] %v2908_v23  ;;  %v2912_v12 = vadd.f32 %v2911_v13, %v2751_v1  ;;  %v2753_v54 = vadd.f32 %v2752_v29, %v6334_v27 }
 0x374   : > { %v2913_v21 = vpop.f32.mrf.mxu0  ;;  %v2754_v55 = vpop.f32.mrf.mxu1 }
 0x375   : > { %3386 = vst [vmem:[%s6118_s18 + $0x490] sm:$0xf] %v2912_v12  ;;  %v2914_v50 = vadd.f32 %v2913_v21, %v2753_v54 }
 0x376   : > { %v2915_v35 = vpop.f32.mrf.mxu0  ;;  %v2755_v57 = vpop.f32.mrf.mxu1 }
 0x377   : > { %3387 = vst [vmem:[%s6118_s18 + $0x498] sm:$0xf] %v2914_v50 }
 0x378   : > { %v2916_v33 = vpop.f32.mrf.mxu0  ;;  %v2952_v40 = vpop.f32.mrf.mxu1 }
 0x379   : > { %v2953_v27 = vadd.f32 %v2952_v40, %v6446_v58 }
 0x37a   : > { %v3113_v17 = vpop.f32.mrf.mxu0  ;;  %v2954_v28 = vpop.f32.mrf.mxu1 }
 0x37b   : > { %v3114_v44 = vadd.f32 %v3113_v17, %v2953_v27  ;;  %v2955_v31 = vadd.f32 %v2954_v28, %v6449_v37 }
 0x37c   : > { %v3115_v41 = vpop.f32.mrf.mxu0  ;;  %v2956_v9 = vpop.f32.mrf.mxu1 }
 0x37d   : > { %3244 = vst [vmem:[%s6118_s18 + $0x20] sm:$0xff] %v3114_v44  ;;  %v3116_v46 = vadd.f32 %v3115_v41, %v2955_v31  ;;  %v2957_v62 = vadd.f32 %v2956_v9, %v6446_v58 }
 0x37e   : > { %v3117_v59 = vpop.f32.mrf.mxu0  ;;  %v2958_v42 = vpop.f32.mrf.mxu1 }
 0x37f   : > { %3245 = vst [vmem:[%s6118_s18 + $0x28] sm:$0xff] %v3116_v46  ;;  %v3118_v16 = vadd.f32 %v3117_v59, %v2957_v62  ;;  %v2959_v47 = vadd.f32 %v2958_v42, %v6449_v37 }
 0x380   : > { %v3119_v25 = vpop.f32.mrf.mxu0  ;;  %v2962_v2 = vpop.f32.mrf.mxu1 }
 0x381   : > { %3250 = vst [vmem:[%s6118_s18 + $0x50] sm:$0xff] %v3118_v16  ;;  %v3120_v18 = vadd.f32 %v3119_v25, %v2959_v47  ;;  %v2963_v8 = vadd.f32 %v2962_v2, %v6446_v58 }
 0x382   : > { %v3123_v5 = vpop.f32.mrf.mxu0  ;;  %v2964_v38 = vpop.f32.mrf.mxu1 }
 0x383   : > { %3251 = vst [vmem:[%s6118_s18 + $0x58] sm:$0xff] %v3120_v18  ;;  %v3124_v63 = vadd.f32 %v3123_v5, %v2963_v8  ;;  %v2965_v39 = vadd.f32 %v2964_v38, %v6449_v37 }
 0x384   : > { %v3125_v19 = vpop.f32.mrf.mxu0  ;;  %v2966_v32 = vpop.f32.mrf.mxu1 }
 0x385   : > { %3256 = vst [vmem:[%s6118_s18 + $0x80] sm:$0xff] %v3124_v63  ;;  %v3126_v30 = vadd.f32 %v3125_v19, %v2965_v39  ;;  %v2967_v56 = vadd.f32 %v2966_v32, %v6446_v58 }
 0x386   : > { %v3127_v53 = vpop.f32.mrf.mxu0  ;;  %v2968_v52 = vpop.f32.mrf.mxu1 }
 0x387   : > { %3257 = vst [vmem:[%s6118_s18 + $0x88] sm:$0xff] %v3126_v30  ;;  %v3128_v10 = vadd.f32 %v3127_v53, %v2967_v56  ;;  %v2969_v36 = vadd.f32 %v2968_v52, %v6449_v37 }
 0x388   : > { %v3129_v34 = vpop.f32.mrf.mxu0  ;;  %v2972_v45 = vpop.f32.mrf.mxu1 }
 0x389   : > { %3262 = vst [vmem:[%s6118_s18 + $0xb0] sm:$0xff] %v3128_v10  ;;  %v3130_v51 = vadd.f32 %v3129_v34, %v2969_v36  ;;  %v2973_v48 = vadd.f32 %v2972_v45, %v6446_v58 }
 0x38a   : > { %v3133_v3 = vpop.f32.mrf.mxu0  ;;  %v2974_v49 = vpop.f32.mrf.mxu1 }
 0x38b   : > { %3263 = vst [vmem:[%s6118_s18 + $0xb8] sm:$0xff] %v3130_v51  ;;  %v3134_v15 = vadd.f32 %v3133_v3, %v2973_v48  ;;  %v2975_v24 = vadd.f32 %v2974_v49, %v6449_v37 }
 0x38c   : > { %v3135_v7 = vpop.f32.mrf.mxu0  ;;  %v2976_v4 = vpop.f32.mrf.mxu1 }
 0x38d   : > { %3268 = vst [vmem:[%s6118_s18 + $0xe0] sm:$0xff] %v3134_v15  ;;  %v3136_v43 = vadd.f32 %v3135_v7, %v2975_v24  ;;  %v2977_v22 = vadd.f32 %v2976_v4, %v6446_v58 }
 0x38e   : > { %v3137_v6 = vpop.f32.mrf.mxu0  ;;  %v2978_v14 = vpop.f32.mrf.mxu1 }
 0x38f   : > { %3269 = vst [vmem:[%s6118_s18 + $0xe8] sm:$0xff] %v3136_v43  ;;  %v3138_v60 = vadd.f32 %v3137_v6, %v2977_v22  ;;  %v2979_v61 = vadd.f32 %v2978_v14, %v6449_v37 }
 0x390   : > { %v3139_v11 = vpop.f32.mrf.mxu0  ;;  %v2982_v23 = vpop.f32.mrf.mxu1 }
 0x391   : > { %3274 = vst [vmem:[%s6118_s18 + $0x110] sm:$0xff] %v3138_v60  ;;  %v3140_v1 = vadd.f32 %v3139_v11, %v2979_v61  ;;  %v2983_v26 = vadd.f32 %v2982_v23, %v6446_v58 }
 0x392   : > { %v3143_v13 = vpop.f32.mrf.mxu0  ;;  %v2984_v29 = vpop.f32.mrf.mxu1 }
 0x393   : > { %3275 = vst [vmem:[%s6118_s18 + $0x118] sm:$0xff] %v3140_v1  ;;  %v3144_v12 = vadd.f32 %v3143_v13, %v2983_v26  ;;  %v2985_v54 = vadd.f32 %v2984_v29, %v6449_v37 }
 0x394   : > { %v3145_v20 = vpop.f32.mrf.mxu0  ;;  %v2986_v21 = vpop.f32.mrf.mxu1 }
 0x395   : > { %3280 = vst [vmem:[%s6118_s18 + $0x140] sm:$0xff] %v3144_v12  ;;  %v3146_v55 = vadd.f32 %v3145_v20, %v2985_v54  ;;  %v2987_v50 = vadd.f32 %v2986_v21, %v6446_v58 }
 0x396   : > { %v3147_v0 = vpop.f32.mrf.mxu0  ;;  %v2988_v35 = vpop.f32.mrf.mxu1 }
 0x397   : > { %3281 = vst [vmem:[%s6118_s18 + $0x148] sm:$0xff] %v3146_v55  ;;  %v3148_v57 = vadd.f32 %v3147_v0, %v2987_v50  ;;  %v2989_v33 = vadd.f32 %v2988_v35, %v6449_v37 }
 0x398   : > { %v3149_v40 = vpop.f32.mrf.mxu0  ;;  %v2992_v27 = vpop.f32.mrf.mxu1 }
 0x399   : > { %3286 = vst [vmem:[%s6118_s18 + $0x170] sm:$0xff] %v3148_v57  ;;  %v3150_v17 = vadd.f32 %v3149_v40, %v2989_v33  ;;  %v2993_v28 = vadd.f32 %v2992_v27, %v6446_v58 }
 0x39a   : > { %v3153_v44 = vpop.f32.mrf.mxu0  ;;  %v2994_v31 = vpop.f32.mrf.mxu1 }
 0x39b   : > { %3287 = vst [vmem:[%s6118_s18 + $0x178] sm:$0xff] %v3150_v17  ;;  %v3154_v41 = vadd.f32 %v3153_v44, %v2993_v28  ;;  %v2995_v9 = vadd.f32 %v2994_v31, %v6449_v37 }
 0x39c   : > { %v3155_v46 = vpop.f32.mrf.mxu0  ;;  %v2996_v62 = vpop.f32.mrf.mxu1 }
 0x39d   : > { %3292 = vst [vmem:[%s6118_s18 + $0x1a0] sm:$0xff] %v3154_v41  ;;  %v3156_v59 = vadd.f32 %v3155_v46, %v2995_v9  ;;  %v2997_v42 = vadd.f32 %v2996_v62, %v6446_v58 }
 0x39e   : > { %v3157_v16 = vpop.f32.mrf.mxu0  ;;  %v2998_v47 = vpop.f32.mrf.mxu1 }
 0x39f   : > { %3293 = vst [vmem:[%s6118_s18 + $0x1a8] sm:$0xff] %v3156_v59  ;;  %v3158_v25 = vadd.f32 %v3157_v16, %v2997_v42  ;;  %v2999_v2 = vadd.f32 %v2998_v47, %v6449_v37 }
 0x3a0   : > { %v3159_v18 = vpop.f32.mrf.mxu0  ;;  %v3002_v8 = vpop.f32.mrf.mxu1 }
 0x3a1   : > { %3298 = vst [vmem:[%s6118_s18 + $0x1d0] sm:$0xff] %v3158_v25  ;;  %v3160_v5 = vadd.f32 %v3159_v18, %v2999_v2  ;;  %v3003_v38 = vadd.f32 %v3002_v8, %v6446_v58 }
 0x3a2   : > { %v3163_v63 = vpop.f32.mrf.mxu0  ;;  %v3004_v39 = vpop.f32.mrf.mxu1 }
 0x3a3   : > { %3299 = vst [vmem:[%s6118_s18 + $0x1d8] sm:$0xff] %v3160_v5  ;;  %v3164_v19 = vadd.f32 %v3163_v63, %v3003_v38  ;;  %v3005_v32 = vadd.f32 %v3004_v39, %v6449_v37 }
 0x3a4   : > { %v3165_v30 = vpop.f32.mrf.mxu0  ;;  %v3006_v56 = vpop.f32.mrf.mxu1 }
 0x3a5   : > { %3304 = vst [vmem:[%s6118_s18 + $0x200] sm:$0xff] %v3164_v19  ;;  %v3166_v53 = vadd.f32 %v3165_v30, %v3005_v32  ;;  %v3007_v52 = vadd.f32 %v3006_v56, %v6446_v58 }
 0x3a6   : > { %v3167_v10 = vpop.f32.mrf.mxu0  ;;  %v3008_v36 = vpop.f32.mrf.mxu1 }
 0x3a7   : > { %3305 = vst [vmem:[%s6118_s18 + $0x208] sm:$0xff] %v3166_v53  ;;  %v3168_v34 = vadd.f32 %v3167_v10, %v3007_v52  ;;  %v3009_v45 = vadd.f32 %v3008_v36, %v6449_v37 }
 0x3a8   : > { %v3169_v51 = vpop.f32.mrf.mxu0  ;;  %v3012_v48 = vpop.f32.mrf.mxu1 }
 0x3a9   : > { %3310 = vst [vmem:[%s6118_s18 + $0x230] sm:$0xff] %v3168_v34  ;;  %v3170_v3 = vadd.f32 %v3169_v51, %v3009_v45  ;;  %v3013_v49 = vadd.f32 %v3012_v48, %v6446_v58 }
 0x3aa   : > { %v3173_v15 = vpop.f32.mrf.mxu0  ;;  %v3014_v24 = vpop.f32.mrf.mxu1 }
 0x3ab   : > { %3311 = vst [vmem:[%s6118_s18 + $0x238] sm:$0xff] %v3170_v3  ;;  %v3174_v7 = vadd.f32 %v3173_v15, %v3013_v49  ;;  %v3015_v4 = vadd.f32 %v3014_v24, %v6449_v37 }
 0x3ac   : > { %v3175_v43 = vpop.f32.mrf.mxu0  ;;  %v3016_v22 = vpop.f32.mrf.mxu1 }
 0x3ad   : > { %3316 = vst [vmem:[%s6118_s18 + $0x260] sm:$0xff] %v3174_v7  ;;  %v3176_v6 = vadd.f32 %v3175_v43, %v3015_v4  ;;  %v3017_v14 = vadd.f32 %v3016_v22, %v6446_v58 }
 0x3ae   : > { %v3177_v60 = vpop.f32.mrf.mxu0  ;;  %v3018_v61 = vpop.f32.mrf.mxu1 }
 0x3af   : > { %3317 = vst [vmem:[%s6118_s18 + $0x268] sm:$0xff] %v3176_v6  ;;  %v3178_v11 = vadd.f32 %v3177_v60, %v3017_v14  ;;  %v3019_v23 = vadd.f32 %v3018_v61, %v6449_v37 }
 0x3b0   : > { %v3179_v1 = vpop.f32.mrf.mxu0  ;;  %v3022_v26 = vpop.f32.mrf.mxu1 }
 0x3b1   : > { %3322 = vst [vmem:[%s6118_s18 + $0x290] sm:$0xff] %v3178_v11  ;;  %v3180_v13 = vadd.f32 %v3179_v1, %v3019_v23  ;;  %v3023_v29 = vadd.f32 %v3022_v26, %v6446_v58 }
 0x3b2   : > { %v3183_v12 = vpop.f32.mrf.mxu0  ;;  %v3024_v54 = vpop.f32.mrf.mxu1 }
 0x3b3   : > { %3323 = vst [vmem:[%s6118_s18 + $0x298] sm:$0xff] %v3180_v13  ;;  %v3184_v20 = vadd.f32 %v3183_v12, %v3023_v29  ;;  %v3025_v21 = vadd.f32 %v3024_v54, %v6449_v37 }
 0x3b4   : > { %v3185_v55 = vpop.f32.mrf.mxu0  ;;  %v3026_v50 = vpop.f32.mrf.mxu1 }
 0x3b5   : > { %3328 = vst [vmem:[%s6118_s18 + $0x2c0] sm:$0xff] %v3184_v20  ;;  %v3186_v0 = vadd.f32 %v3185_v55, %v3025_v21  ;;  %v3027_v35 = vadd.f32 %v3026_v50, %v6446_v58 }
 0x3b6   : > { %v3187_v57 = vpop.f32.mrf.mxu0  ;;  %v3028_v33 = vpop.f32.mrf.mxu1 }
 0x3b7   : > { %3329 = vst [vmem:[%s6118_s18 + $0x2c8] sm:$0xff] %v3186_v0  ;;  %v3188_v40 = vadd.f32 %v3187_v57, %v3027_v35  ;;  %v3029_v27 = vadd.f32 %v3028_v33, %v6449_v37 }
 0x3b8   : > { %v3189_v17 = vpop.f32.mrf.mxu0  ;;  %v3032_v28 = vpop.f32.mrf.mxu1 }
 0x3b9   : > { %3334 = vst [vmem:[%s6118_s18 + $0x2f0] sm:$0xff] %v3188_v40  ;;  %v3190_v44 = vadd.f32 %v3189_v17, %v3029_v27  ;;  %v3033_v31 = vadd.f32 %v3032_v28, %v6446_v58 }
 0x3ba   : > { %v3193_v41 = vpop.f32.mrf.mxu0  ;;  %v3034_v9 = vpop.f32.mrf.mxu1 }
 0x3bb   : > { %3335 = vst [vmem:[%s6118_s18 + $0x2f8] sm:$0xff] %v3190_v44  ;;  %v3194_v46 = vadd.f32 %v3193_v41, %v3033_v31  ;;  %v3035_v62 = vadd.f32 %v3034_v9, %v6449_v37 }
 0x3bc   : > { %v3195_v59 = vpop.f32.mrf.mxu0  ;;  %v3036_v42 = vpop.f32.mrf.mxu1 }
 0x3bd   : > { %3340 = vst [vmem:[%s6118_s18 + $0x320] sm:$0xff] %v3194_v46  ;;  %v3196_v16 = vadd.f32 %v3195_v59, %v3035_v62  ;;  %v3037_v47 = vadd.f32 %v3036_v42, %v6446_v58 }
 0x3be   : > { %v3197_v25 = vpop.f32.mrf.mxu0  ;;  %v3038_v2 = vpop.f32.mrf.mxu1 }
 0x3bf   : > { %3341 = vst [vmem:[%s6118_s18 + $0x328] sm:$0xff] %v3196_v16  ;;  %v3198_v18 = vadd.f32 %v3197_v25, %v3037_v47  ;;  %v3039_v8 = vadd.f32 %v3038_v2, %v6449_v37 }
 0x3c0   : > { %v3199_v5 = vpop.f32.mrf.mxu0  ;;  %v3042_v38 = vpop.f32.mrf.mxu1 }
 0x3c1   : > { %3346 = vst [vmem:[%s6118_s18 + $0x350] sm:$0xff] %v3198_v18  ;;  %v3200_v63 = vadd.f32 %v3199_v5, %v3039_v8  ;;  %v3043_v39 = vadd.f32 %v3042_v38, %v6446_v58  ;;  %v3416_v5 = vld [vmem:[%s6118_s18 + $0x10] sm:$0xff] (%p4332_p5)  ;;  %v3418_v38 = vld [vmem:[%s6118_s18 + $0x18] sm:$0xff] (%p4332_p5) }
 0x3c2   : > { %v3203_v19 = vpop.f32.mrf.mxu0  ;;  %v3044_v32 = vpop.f32.mrf.mxu1  ;;  %3417 = vst [vmem:[%s6563_s27 + $0x10] sm:$0xff] (%p4332_p5), %v3416_v5  ;;  %3419 = vst [vmem:[%s6563_s27 + $0x18] sm:$0xff] (%p4332_p5), %v3418_v38  ;;  %v3544_v5 = vld [vmem:[%s6118_s18 + $0x210] sm:$0xff] (%p4332_p5)  ;;  %v3546_v38 = vld [vmem:[%s6118_s18 + $0x218] sm:$0xff] (%p4332_p5) }
 0x3c3   : > { %3347 = vst [vmem:[%s6118_s18 + $0x358] sm:$0xff] %v3200_v63  ;;  %v3204_v30 = vadd.f32 %v3203_v19, %v3043_v39  ;;  %v3045_v56 = vadd.f32 %v3044_v32, %v6449_v37  ;;  %v3420_v63 = vld [vmem:[%s6118_s18 + $0x20] sm:$0xff] (%p4332_p5)  ;;  %v3422_v39 = vld [vmem:[%s6118_s18 + $0x28] sm:$0xff] (%p4332_p5)  ;;  %v3424_v19 = vld [vmem:[%s6118_s18 + $0x30] sm:$0xff] (%p4332_p5) }
 0x3c4   : > { %v3205_v53 = vpop.f32.mrf.mxu0  ;;  %v3046_v52 = vpop.f32.mrf.mxu1  ;;  %v3426_v32 = vld [vmem:[%s6118_s18 + $0x38] sm:$0xff] (%p4332_p5)  ;;  %3421 = vst [vmem:[%s6563_s27 + $0x20] sm:$0xff] (%p4332_p5), %v3420_v63  ;;  %3423 = vst [vmem:[%s6563_s27 + $0x28] sm:$0xff] (%p4332_p5), %v3422_v39  ;;  %v3548_v63 = vld [vmem:[%s6118_s18 + $0x220] sm:$0xff] (%p4332_p5) }
 0x3c5   : > { %3352 = vst [vmem:[%s6118_s18 + $0x380] sm:$0xff] %v3204_v30  ;;  %v3206_v10 = vadd.f32 %v3205_v53, %v3045_v56  ;;  %v3047_v36 = vadd.f32 %v3046_v52, %v6446_v58  ;;  %v3428_v30 = vld [vmem:[%s6118_s18 + $0x40] sm:$0xff] (%p4332_p5)  ;;  %3425 = vst [vmem:[%s6563_s27 + $0x60] sm:$0xff] (%p4332_p5), %v3424_v19  ;;  %v3430_v56 = vld [vmem:[%s6118_s18 + $0x48] sm:$0xff] (%p4332_p5) }
 0x3c6   : > { %v3207_v34 = vpop.f32.mrf.mxu0  ;;  %v3048_v45 = vpop.f32.mrf.mxu1  ;;  %3427 = vst [vmem:[%s6563_s27 + $0x68] sm:$0xff] (%p4332_p5), %v3426_v32  ;;  %3429 = vst [vmem:[%s6563_s27 + $0x70] sm:$0xff] (%p4332_p5), %v3428_v30  ;;  %v3432_v53 = vld [vmem:[%s6118_s18 + $0x50] sm:$0xff] (%p4332_p5)  ;;  %v3434_v52 = vld [vmem:[%s6118_s18 + $0x58] sm:$0xff] (%p4332_p5) }
 0x3c7   : > { %3353 = vst [vmem:[%s6118_s18 + $0x388] sm:$0xff] %v3206_v10  ;;  %v3208_v51 = vadd.f32 %v3207_v34, %v3047_v36  ;;  %v3049_v48 = vadd.f32 %v3048_v45, %v6449_v37  ;;  %3431 = vst [vmem:[%s6563_s27 + $0x78] sm:$0xff] (%p4332_p5), %v3430_v56  ;;  %v3436_v10 = vld [vmem:[%s6118_s18 + $0x60] sm:$0xff] (%p4332_p5)  ;;  %v3438_v36 = vld [vmem:[%s6118_s18 + $0x68] sm:$0xff] (%p4332_p5) }
 0x3c8   : > { %v3209_v3 = vpop.f32.mrf.mxu0  ;;  %v3052_v49 = vpop.f32.mrf.mxu1  ;;  %3433 = vst [vmem:[%s6563_s27 + $0x80] sm:$0xff] (%p4332_p5), %v3432_v53  ;;  %3435 = vst [vmem:[%s6563_s27 + $0x88] sm:$0xff] (%p4332_p5), %v3434_v52  ;;  %v3440_v34 = vld [vmem:[%s6118_s18 + $0x70] sm:$0xff] (%p4332_p5)  ;;  %v3442_v45 = vld [vmem:[%s6118_s18 + $0x78] sm:$0xff] (%p4332_p5) }
 0x3c9   : > { %3358 = vst [vmem:[%s6118_s18 + $0x3b0] sm:$0xff] %v3208_v51  ;;  %v3210_v15 = vadd.f32 %v3209_v3, %v3049_v48  ;;  %v3053_v24 = vadd.f32 %v3052_v49, %v6446_v58  ;;  %3437 = vst [vmem:[%s6563_s27 + $0xc0] sm:$0xff] (%p4332_p5), %v3436_v10  ;;  %v3444_v51 = vld [vmem:[%s6118_s18 + $0x80] sm:$0xff] (%p4332_p5)  ;;  %v3446_v48 = vld [vmem:[%s6118_s18 + $0x88] sm:$0xff] (%p4332_p5) }
 0x3ca   : > { %v3213_v7 = vpop.f32.mrf.mxu0  ;;  %v3054_v4 = vpop.f32.mrf.mxu1  ;;  %3439 = vst [vmem:[%s6563_s27 + $0xc8] sm:$0xff] (%p4332_p5), %v3438_v36  ;;  %3441 = vst [vmem:[%s6563_s27 + $0xd0] sm:$0xff] (%p4332_p5), %v3440_v34  ;;  %v3448_v3 = vld [vmem:[%s6118_s18 + $0x90] sm:$0xff] (%p4332_p5)  ;;  %v3450_v49 = vld [vmem:[%s6118_s18 + $0x98] sm:$0xff] (%p4332_p5) }
 0x3cb   : > { %3359 = vst [vmem:[%s6118_s18 + $0x3b8] sm:$0xff] %v3210_v15  ;;  %v3214_v43 = vadd.f32 %v3213_v7, %v3053_v24  ;;  %v3055_v22 = vadd.f32 %v3054_v4, %v6449_v37  ;;  %3443 = vst [vmem:[%s6563_s27 + $0xd8] sm:$0xff] (%p4332_p5), %v3442_v45  ;;  %v3452_v15 = vld [vmem:[%s6118_s18 + $0xa0] sm:$0xff] (%p4332_p5)  ;;  %v3454_v24 = vld [vmem:[%s6118_s18 + $0xa8] sm:$0xff] (%p4332_p5) }
 0x3cc   : > { %v3215_v6 = vpop.f32.mrf.mxu0  ;;  %v3056_v14 = vpop.f32.mrf.mxu1  ;;  %3445 = vst [vmem:[%s6563_s27 + $0xe0] sm:$0xff] (%p4332_p5), %v3444_v51  ;;  %3447 = vst [vmem:[%s6563_s27 + $0xe8] sm:$0xff] (%p4332_p5), %v3446_v48  ;;  %v3456_v7 = vld [vmem:[%s6118_s18 + $0xb0] sm:$0xff] (%p4332_p5)  ;;  %v3458_v4 = vld [vmem:[%s6118_s18 + $0xb8] sm:$0xff] (%p4332_p5) }
 0x3cd   : > { %3364 = vst [vmem:[%s6118_s18 + $0x3e0] sm:$0xff] %v3214_v43  ;;  %v3216_v60 = vadd.f32 %v3215_v6, %v3055_v22  ;;  %v3057_v61 = vadd.f32 %v3056_v14, %v6446_v58  ;;  %3449 = vst [vmem:[%s6563_s27 + $0x120] sm:$0xff] (%p4332_p5), %v3448_v3  ;;  %v3460_v43 = vld [vmem:[%s6118_s18 + $0xc0] sm:$0xff] (%p4332_p5)  ;;  %v3462_v22 = vld [vmem:[%s6118_s18 + $0xc8] sm:$0xff] (%p4332_p5) }
 0x3ce   : > { %v3217_v11 = vpop.f32.mrf.mxu0  ;;  %v3058_v23 = vpop.f32.mrf.mxu1  ;;  %3451 = vst [vmem:[%s6563_s27 + $0x128] sm:$0xff] (%p4332_p5), %v3450_v49  ;;  %3453 = vst [vmem:[%s6563_s27 + $0x130] sm:$0xff] (%p4332_p5), %v3452_v15  ;;  %v3464_v6 = vld [vmem:[%s6118_s18 + $0xd0] sm:$0xff] (%p4332_p5)  ;;  %v3466_v14 = vld [vmem:[%s6118_s18 + $0xd8] sm:$0xff] (%p4332_p5) }
 0x3cf   : > { %3365 = vst [vmem:[%s6118_s18 + $0x3e8] sm:$0xff] %v3216_v60  ;;  %v3218_v1 = vadd.f32 %v3217_v11, %v3057_v61  ;;  %v3059_v26 = vadd.f32 %v3058_v23, %v6449_v37  ;;  %3455 = vst [vmem:[%s6563_s27 + $0x138] sm:$0xff] (%p4332_p5), %v3454_v24  ;;  %v3468_v60 = vld [vmem:[%s6118_s18 + $0xe0] sm:$0xff] (%p4332_p5)  ;;  %v3470_v61 = vld [vmem:[%s6118_s18 + $0xe8] sm:$0xff] (%p4332_p5) }
 0x3d0   : > { %v3219_v13 = vpop.f32.mrf.mxu0  ;;  %v3062_v29 = vpop.f32.mrf.mxu1  ;;  %3457 = vst [vmem:[%s6563_s27 + $0x140] sm:$0xff] (%p4332_p5), %v3456_v7  ;;  %3459 = vst [vmem:[%s6563_s27 + $0x148] sm:$0xff] (%p4332_p5), %v3458_v4  ;;  %v3472_v11 = vld [vmem:[%s6118_s18 + $0xf0] sm:$0xff] (%p4332_p5)  ;;  %v3474_v23 = vld [vmem:[%s6118_s18 + $0xf8] sm:$0xff] (%p4332_p5) }
 0x3d1   : > { %3370 = vst [vmem:[%s6118_s18 + $0x410] sm:$0xff] %v3218_v1  ;;  %v3220_v12 = vadd.f32 %v3219_v13, %v3059_v26  ;;  %v3063_v57 = vadd.f32 %v3062_v29, %v6446_v58  ;;  %3461 = vst [vmem:[%s6563_s27 + $0x180] sm:$0xff] (%p4332_p5), %v3460_v43  ;;  %v3476_v1 = vld [vmem:[%s6118_s18 + $0x100] sm:$0xff] (%p4332_p5)  ;;  %v3478_v26 = vld [vmem:[%s6118_s18 + $0x108] sm:$0xff] (%p4332_p5) }
 0x3d2   : > { %v3064_v54 = vpop.f32.mrf.mxu1  ;;  %3463 = vst [vmem:[%s6563_s27 + $0x188] sm:$0xff] (%p4332_p5), %v3462_v22  ;;  %3465 = vst [vmem:[%s6563_s27 + $0x190] sm:$0xff] (%p4332_p5), %v3464_v6  ;;  %v3480_v13 = vld [vmem:[%s6118_s18 + $0x110] sm:$0xff] (%p4332_p5)  ;;  %v3482_v29 = vld [vmem:[%s6118_s18 + $0x118] sm:$0xff] (%p4332_p5) }
 0x3d3   : > { %3371 = vst [vmem:[%s6118_s18 + $0x418] sm:$0xff] %v3220_v12  ;;  %v3065_v40 = vadd.f32 %v3064_v54, %v6449_v37  ;;  %3467 = vst [vmem:[%s6563_s27 + $0x198] sm:$0xff] (%p4332_p5), %v3466_v14  ;;  %v3484_v12 = vld [vmem:[%s6118_s18 + $0x120] sm:$0xff] (%p4332_p5)  ;;  %v3486_v54 = vld [vmem:[%s6118_s18 + $0x128] sm:$0xff] (%p4332_p5) }
 0x3d4   : > { %v3066_v20 = vpop.f32.mrf.mxu1  ;;  %3469 = vst [vmem:[%s6563_s27 + $0x1a0] sm:$0xff] (%p4332_p5), %v3468_v60  ;;  %3471 = vst [vmem:[%s6563_s27 + $0x1a8] sm:$0xff] (%p4332_p5), %v3470_v61  ;;  %v3550_v39 = vld [vmem:[%s6118_s18 + $0x228] sm:$0xff] (%p4332_p5)  ;;  %v3552_v19 = vld [vmem:[%s6118_s18 + $0x230] sm:$0xff] (%p4332_p5) }
 0x3d5   : > { %v3067_v28 = vadd.f32 %v3066_v20, %v6446_v58  ;;  %3473 = vst [vmem:[%s6563_s27 + $0x1e0] sm:$0xff] (%p4332_p5), %v3472_v11  ;;  %3475 = vst [vmem:[%s6563_s27 + $0x1e8] sm:$0xff] (%p4332_p5), %v3474_v23  ;;  %v3488_v20 = vld [vmem:[%s6118_s18 + $0x130] sm:$0xff] (%p4332_p5)  ;;  %v3554_v32 = vld [vmem:[%s6118_s18 + $0x238] sm:$0xff] (%p4332_p5) }
 0x3d6   : > { %v3068_v21 = vpop.f32.mrf.mxu1  ;;  %3477 = vst [vmem:[%s6563_s27 + $0x1f0] sm:$0xff] (%p4332_p5), %v3476_v1  ;;  %3479 = vst [vmem:[%s6563_s27 + $0x1f8] sm:$0xff] (%p4332_p5), %v3478_v26  ;;  %v3556_v30 = vld [vmem:[%s6118_s18 + $0x240] sm:$0xff] (%p4332_p5)  ;;  %v3558_v56 = vld [vmem:[%s6118_s18 + $0x248] sm:$0xff] (%p4332_p5) }
 0x3d7   : > { %v3069_v41 = vadd.f32 %v3068_v21, %v6449_v37  ;;  %3481 = vst [vmem:[%s6563_s27 + $0x200] sm:$0xff] (%p4332_p5), %v3480_v13  ;;  %3483 = vst [vmem:[%s6563_s27 + $0x208] sm:$0xff] (%p4332_p5), %v3482_v29  ;;  %v3490_v21 = vld [vmem:[%s6118_s18 + $0x138] sm:$0xff] (%p4332_p5)  ;;  %v3560_v53 = vld [vmem:[%s6118_s18 + $0x250] sm:$0xff] (%p4332_p5) }
 0x3d8   : > { %v3072_v55 = vpop.f32.mrf.mxu1  ;;  %3485 = vst [vmem:[%s6563_s27 + $0x240] sm:$0xff] (%p4332_p5), %v3484_v12  ;;  %3487 = vst [vmem:[%s6563_s27 + $0x248] sm:$0xff] (%p4332_p5), %v3486_v54  ;;  %v3562_v52 = vld [vmem:[%s6118_s18 + $0x258] sm:$0xff] (%p4332_p5)  ;;  %v3564_v10 = vld [vmem:[%s6118_s18 + $0x260] sm:$0xff] (%p4332_p5) }
 0x3d9   : > { %v3073_v62 = vadd.f32 %v3072_v55, %v6446_v58  ;;  %v3412_v58 = vld [vmem:[%s6118_s18] sm:$0xff] (%p4332_p5)  ;;  %3489 = vst [vmem:[%s6563_s27 + $0x250] sm:$0xff] (%p4332_p5), %v3488_v20  ;;  %3491 = vst [vmem:[%s6563_s27 + $0x258] sm:$0xff] (%p4332_p5), %v3490_v21  ;;  %v3566_v36 = vld [vmem:[%s6118_s18 + $0x268] sm:$0xff] (%p4332_p5) }
 0x3da   : > { %v3074_v50 = vpop.f32.mrf.mxu1  ;;  %3413 = vst [vmem:[%s6563_s27] sm:$0xff] (%p4332_p5), %v3412_v58  ;;  %v3492_v55 = vld [vmem:[%s6118_s18 + $0x140] sm:$0xff] (%p4332_p5)  ;;  %3545 = vst [vmem:[%s6563_s27 + $0x420] sm:$0xff] (%p4332_p5), %v3544_v5  ;;  %v3568_v34 = vld [vmem:[%s6118_s18 + $0x270] sm:$0xff] (%p4332_p5) }
 0x3db   : > { %v3075_v16 = vadd.f32 %v3074_v50, %v6449_v37  ;;  %v3414_v37 = vld [vmem:[%s6118_s18 + $0x8] sm:$0xff] (%p4332_p5)  ;;  %3493 = vst [vmem:[%s6563_s27 + $0x260] sm:$0xff] (%p4332_p5), %v3492_v55  ;;  %v3540_v58 = vld [vmem:[%s6118_s18 + $0x200] sm:$0xff] (%p4332_p5)  ;;  %3547 = vst [vmem:[%s6563_s27 + $0x428] sm:$0xff] (%p4332_p5), %v3546_v38 }
 0x3dc   : > { %v3076_v0 = vpop.f32.mrf.mxu1  ;;  %3415 = vst [vmem:[%s6563_s27 + $0x8] sm:$0xff] (%p4332_p5), %v3414_v37  ;;  %v3494_v50 = vld [vmem:[%s6118_s18 + $0x148] sm:$0xff] (%p4332_p5)  ;;  %3541 = vst [vmem:[%s6563_s27 + $0x3e0] sm:$0xff] (%p4332_p5), %v3540_v58  ;;  %v3570_v45 = vld [vmem:[%s6118_s18 + $0x278] sm:$0xff] (%p4332_p5) }
 0x3dd   : > { %3495 = vst [vmem:[%s6563_s27 + $0x268] sm:$0xff] (%p4332_p5), %v3494_v50  ;;  %v3496_v0 = vld [vmem:[%s6118_s18 + $0x150] sm:$0xff] (%p4332_p5)  ;;  %v3542_v37 = vld [vmem:[%s6118_s18 + $0x208] sm:$0xff] (%p4332_p5)  ;;  %3549 = vst [vmem:[%s6563_s27 + $0x430] sm:$0xff] (%p4332_p5), %v3548_v63 }
 0x3de   : > { %v3077_v35 = vpop.f32.mrf.mxu1  ;;  %3497 = vst [vmem:[%s6563_s27 + $0x2a0] sm:$0xff] (%p4332_p5), %v3496_v0  ;;  %3543 = vst [vmem:[%s6563_s27 + $0x3e8] sm:$0xff] (%p4332_p5), %v3542_v37  ;;  %v3572_v51 = vld [vmem:[%s6118_s18 + $0x280] sm:$0xff] (%p4332_p5)  ;;  %v3574_v48 = vld [vmem:[%s6118_s18 + $0x288] sm:$0xff] (%p4332_p5) }
 0x3df   : > { %v3498_v35 = vld [vmem:[%s6118_s18 + $0x158] sm:$0xff] (%p4332_p5)  ;;  %3551 = vst [vmem:[%s6563_s27 + $0x438] sm:$0xff] (%p4332_p5), %v3550_v39  ;;  %3553 = vst [vmem:[%s6563_s27 + $0x440] sm:$0xff] (%p4332_p5), %v3552_v19  ;;  %v3576_v3 = vld [vmem:[%s6118_s18 + $0x290] sm:$0xff] (%p4332_p5) }
 0x3e0   : > { %v3223_v33 = vpop.f32.mrf.mxu1  ;;  %3499 = vst [vmem:[%s6563_s27 + $0x2a8] sm:$0xff] (%p4332_p5), %v3498_v35  ;;  %3555 = vst [vmem:[%s6563_s27 + $0x448] sm:$0xff] (%p4332_p5), %v3554_v32  ;;  %v3578_v49 = vld [vmem:[%s6118_s18 + $0x298] sm:$0xff] (%p4332_p5)  ;;  %v3580_v15 = vld [vmem:[%s6118_s18 + $0x2a0] sm:$0xff] (%p4332_p5) }
 0x3e1   : > { %v3224_v27 = vadd.f32 %v3223_v33, %v3063_v57  ;;  %v3500_v57 = vld [vmem:[%s6118_s18 + $0x160] sm:$0xff] (%p4332_p5)  ;;  %v3502_v33 = vld [vmem:[%s6118_s18 + $0x168] sm:$0xff] (%p4332_p5)  ;;  %3557 = vst [vmem:[%s6563_s27 + $0x480] sm:$0xff] (%p4332_p5), %v3556_v30  ;;  %3559 = vst [vmem:[%s6563_s27 + $0x488] sm:$0xff] (%p4332_p5), %v3558_v56 }
 0x3e2   : > { %v3225_v17 = vpop.f32.mrf.mxu1  ;;  %3501 = vst [vmem:[%s6563_s27 + $0x2b0] sm:$0xff] (%p4332_p5), %v3500_v57  ;;  %3503 = vst [vmem:[%s6563_s27 + $0x2b8] sm:$0xff] (%p4332_p5), %v3502_v33  ;;  %v3582_v24 = vld [vmem:[%s6118_s18 + $0x2a8] sm:$0xff] (%p4332_p5)  ;;  %v3584_v7 = vld [vmem:[%s6118_s18 + $0x2b0] sm:$0xff] (%p4332_p5) }
 0x3e3   : > { %3376 = vst [vmem:[%s6118_s18 + $0x440] sm:$0xff] %v3224_v27  ;;  %v3226_v44 = vadd.f32 %v3225_v17, %v3065_v40  ;;  %v3504_v40 = vld [vmem:[%s6118_s18 + $0x170] sm:$0xff] (%p4332_p5)  ;;  %v3506_v27 = vld [vmem:[%s6118_s18 + $0x178] sm:$0xff] (%p4332_p5)  ;;  %v3508_v17 = vld [vmem:[%s6118_s18 + $0x180] sm:$0xff] (%p4332_p5) }
 0x3e4   : > { %v3227_v31 = vpop.f32.mrf.mxu1  ;;  %3505 = vst [vmem:[%s6563_s27 + $0x2c0] sm:$0xff] (%p4332_p5), %v3504_v40  ;;  %3507 = vst [vmem:[%s6563_s27 + $0x2c8] sm:$0xff] (%p4332_p5), %v3506_v27  ;;  %v3586_v4 = vld [vmem:[%s6118_s18 + $0x2b8] sm:$0xff] (%p4332_p5)  ;;  %v3588_v43 = vld [vmem:[%s6118_s18 + $0x2c0] sm:$0xff] (%p4332_p5) }
 0x3e5   : > { %3377 = vst [vmem:[%s6118_s18 + $0x448] sm:$0xff] %v3226_v44  ;;  %v3228_v9 = vadd.f32 %v3227_v31, %v3067_v28  ;;  %v3510_v28 = vld [vmem:[%s6118_s18 + $0x188] sm:$0xff] (%p4332_p5)  ;;  %v3512_v44 = vld [vmem:[%s6118_s18 + $0x190] sm:$0xff] (%p4332_p5)  ;;  %3509 = vst [vmem:[%s6563_s27 + $0x300] sm:$0xff] (%p4332_p5), %v3508_v17 }
 0x3e6   : > { %v3229_v46 = vpop.f32.mrf.mxu1  ;;  %3511 = vst [vmem:[%s6563_s27 + $0x308] sm:$0xff] (%p4332_p5), %v3510_v28  ;;  %3513 = vst [vmem:[%s6563_s27 + $0x310] sm:$0xff] (%p4332_p5), %v3512_v44  ;;  %v3514_v31 = vld [vmem:[%s6118_s18 + $0x198] sm:$0xff] (%p4332_p5)  ;;  %v3590_v22 = vld [vmem:[%s6118_s18 + $0x2c8] sm:$0xff] (%p4332_p5) }
 0x3e7   : > { %3382 = vst [vmem:[%s6118_s18 + $0x470] sm:$0xff] %v3228_v9  ;;  %v3230_v59 = vadd.f32 %v3229_v46, %v3069_v41  ;;  %v3516_v41 = vld [vmem:[%s6118_s18 + $0x1a0] sm:$0xff] (%p4332_p5)  ;;  %v3518_v9 = vld [vmem:[%s6118_s18 + $0x1a8] sm:$0xff] (%p4332_p5)  ;;  %3515 = vst [vmem:[%s6563_s27 + $0x318] sm:$0xff] (%p4332_p5), %v3514_v31 }
 0x3e8   : > { %v3233_v42 = vpop.f32.mrf.mxu1  ;;  %3517 = vst [vmem:[%s6563_s27 + $0x320] sm:$0xff] (%p4332_p5), %v3516_v41  ;;  %3519 = vst [vmem:[%s6563_s27 + $0x328] sm:$0xff] (%p4332_p5), %v3518_v9  ;;  %v3520_v46 = vld [vmem:[%s6118_s18 + $0x1b0] sm:$0xff] (%p4332_p5)  ;;  %v3594_v14 = vld [vmem:[%s6118_s18 + $0x2d8] sm:$0xff] (%p4332_p5) }
 0x3e9   : > { %3383 = vst [vmem:[%s6118_s18 + $0x478] sm:$0xff] %v3230_v59  ;;  %v3234_v47 = vadd.f32 %v3233_v42, %v3073_v62  ;;  %v3522_v62 = vld [vmem:[%s6118_s18 + $0x1b8] sm:$0xff] (%p4332_p5)  ;;  %v3524_v59 = vld [vmem:[%s6118_s18 + $0x1c0] sm:$0xff] (%p4332_p5)  ;;  %3521 = vst [vmem:[%s6563_s27 + $0x360] sm:$0xff] (%p4332_p5), %v3520_v46 }
 0x3ea   : > { %v3235_v25 = vpop.f32.mrf.mxu1  ;;  %3396 = sbr.rel (!%p4332_p5) target bundleno = 1046 (0x416), region = 67  ;;  %3523 = vst [vmem:[%s6563_s27 + $0x368] sm:$0xff] (%p4332_p5), %v3522_v62  ;;  %3525 = vst [vmem:[%s6563_s27 + $0x370] sm:$0xff] (%p4332_p5), %v3524_v59  ;;  %v3526_v42 = vld [vmem:[%s6118_s18 + $0x1c8] sm:$0xff] (%p4332_p5)  ;;  %v3592_v6 = vld [vmem:[%s6118_s18 + $0x2d0] sm:$0xff] (%p4332_p5) }
 0x3eb   : > { %3388 = vst [vmem:[%s6118_s18 + $0x4a0] sm:$0xf] %v3234_v47  ;;  %v3236_v2 = vadd.f32 %v3235_v25, %v3075_v16  ;;  %v3528_v16 = vld [vmem:[%s6118_s18 + $0x1d0] sm:$0xff] (%p4332_p5)  ;;  %v3530_v47 = vld [vmem:[%s6118_s18 + $0x1d8] sm:$0xff] (%p4332_p5)  ;;  %3527 = vst [vmem:[%s6563_s27 + $0x378] sm:$0xff] (%p4332_p5), %v3526_v42 }
 0x3ec   : > { %v3237_v18 = vpop.f32.mrf.mxu1  ;;  %3529 = vst [vmem:[%s6563_s27 + $0x380] sm:$0xff] (%p4332_p5), %v3528_v16  ;;  %3531 = vst [vmem:[%s6563_s27 + $0x388] sm:$0xff] (%p4332_p5), %v3530_v47  ;;  %v3532_v25 = vld [vmem:[%s6118_s18 + $0x1e0] sm:$0xff] (%p4332_p5)  ;;  %v3598_v61 = vld [vmem:[%s6118_s18 + $0x2e8] sm:$0xff] (%p4332_p5) }
 0x3ed   : > { %3389 = vst [vmem:[%s6118_s18 + $0x4a8] sm:$0xf] %v3236_v2  ;;  %v3534_v2 = vld [vmem:[%s6118_s18 + $0x1e8] sm:$0xff] (%p4332_p5)  ;;  %v3536_v18 = vld [vmem:[%s6118_s18 + $0x1f0] sm:$0xff] (%p4332_p5)  ;;  %3533 = vst [vmem:[%s6563_s27 + $0x3c0] sm:$0xff] (%p4332_p5), %v3532_v25 }
 0x3ee   : > { %v3238_v8 = vpop.f32.mrf.mxu1  ;;  %3535 = vst [vmem:[%s6563_s27 + $0x3c8] sm:$0xff] (%p4332_p5), %v3534_v2  ;;  %3537 = vst [vmem:[%s6563_s27 + $0x3d0] sm:$0xff] (%p4332_p5), %v3536_v18  ;;  %v3596_v60 = vld [vmem:[%s6118_s18 + $0x2e0] sm:$0xff] (%p4332_p5)  ;;  %v3600_v11 = vld [vmem:[%s6118_s18 + $0x2f0] sm:$0xff] (%p4332_p5) }
 0x3ef   : > { %v3538_v8 = vld [vmem:[%s6118_s18 + $0x1f8] sm:$0xff]  ;;  %3561 = vst [vmem:[%s6563_s27 + $0x490] sm:$0xff] %v3560_v53  ;;  %3563 = vst [vmem:[%s6563_s27 + $0x498] sm:$0xff] %v3562_v52  ;;  %v3604_v1 = vld [vmem:[%s6118_s18 + $0x300] sm:$0xff] }
 0x3f0   : > { %3539 = vst [vmem:[%s6563_s27 + $0x3d8] sm:$0xff] %v3538_v8  ;;  %3565 = vst [vmem:[%s6563_s27 + $0x4a0] sm:$0xff] %v3564_v10  ;;  %v3602_v23 = vld [vmem:[%s6118_s18 + $0x2f8] sm:$0xff]  ;;  %v3606_v26 = vld [vmem:[%s6118_s18 + $0x308] sm:$0xff] }
 0x3f1   : > { %3567 = vst [vmem:[%s6563_s27 + $0x4a8] sm:$0xff] %v3566_v36  ;;  %3569 = vst [vmem:[%s6563_s27 + $0x4e0] sm:$0xff] %v3568_v34  ;;  %v3608_v13 = vld [vmem:[%s6118_s18 + $0x310] sm:$0xff]  ;;  %v3610_v29 = vld [vmem:[%s6118_s18 + $0x318] sm:$0xff] }
 0x3f2   : > { %3571 = vst [vmem:[%s6563_s27 + $0x4e8] sm:$0xff] %v3570_v45  ;;  %3573 = vst [vmem:[%s6563_s27 + $0x4f0] sm:$0xff] %v3572_v51  ;;  %v3612_v12 = vld [vmem:[%s6118_s18 + $0x320] sm:$0xff]  ;;  %v3614_v54 = vld [vmem:[%s6118_s18 + $0x328] sm:$0xff] }
 0x3f3   : > { %3575 = vst [vmem:[%s6563_s27 + $0x4f8] sm:$0xff] %v3574_v48  ;;  %3577 = vst [vmem:[%s6563_s27 + $0x500] sm:$0xff] %v3576_v3  ;;  %v3616_v20 = vld [vmem:[%s6118_s18 + $0x330] sm:$0xff]  ;;  %v3618_v21 = vld [vmem:[%s6118_s18 + $0x338] sm:$0xff] }
 0x3f4   : > { %3579 = vst [vmem:[%s6563_s27 + $0x508] sm:$0xff] %v3578_v49  ;;  %3581 = vst [vmem:[%s6563_s27 + $0x540] sm:$0xff] %v3580_v15  ;;  %v3620_v55 = vld [vmem:[%s6118_s18 + $0x340] sm:$0xff]  ;;  %v3622_v50 = vld [vmem:[%s6118_s18 + $0x348] sm:$0xff] }
 0x3f5   : > { %3583 = vst [vmem:[%s6563_s27 + $0x548] sm:$0xff] %v3582_v24  ;;  %3585 = vst [vmem:[%s6563_s27 + $0x550] sm:$0xff] %v3584_v7  ;;  %v3624_v0 = vld [vmem:[%s6118_s18 + $0x350] sm:$0xff]  ;;  %v3626_v35 = vld [vmem:[%s6118_s18 + $0x358] sm:$0xff] }
 0x3f6   : > { %3587 = vst [vmem:[%s6563_s27 + $0x558] sm:$0xff] %v3586_v4  ;;  %3589 = vst [vmem:[%s6563_s27 + $0x560] sm:$0xff] %v3588_v43  ;;  %v3628_v57 = vld [vmem:[%s6118_s18 + $0x360] sm:$0xff]  ;;  %v3630_v33 = vld [vmem:[%s6118_s18 + $0x368] sm:$0xff] }
 0x3f7   : > { %3591 = vst [vmem:[%s6563_s27 + $0x568] sm:$0xff] %v3590_v22  ;;  %3593 = vst [vmem:[%s6563_s27 + $0x5a0] sm:$0xff] %v3592_v6  ;;  %v3632_v40 = vld [vmem:[%s6118_s18 + $0x370] sm:$0xff]  ;;  %v3634_v27 = vld [vmem:[%s6118_s18 + $0x378] sm:$0xff] }
 0x3f8   : > { %3595 = vst [vmem:[%s6563_s27 + $0x5a8] sm:$0xff] %v3594_v14  ;;  %3597 = vst [vmem:[%s6563_s27 + $0x5b0] sm:$0xff] %v3596_v60  ;;  %v3636_v17 = vld [vmem:[%s6118_s18 + $0x380] sm:$0xff]  ;;  %v3638_v28 = vld [vmem:[%s6118_s18 + $0x388] sm:$0xff] }
 0x3f9   : > { %3599 = vst [vmem:[%s6563_s27 + $0x5b8] sm:$0xff] %v3598_v61  ;;  %3601 = vst [vmem:[%s6563_s27 + $0x5c0] sm:$0xff] %v3600_v11  ;;  %v3640_v44 = vld [vmem:[%s6118_s18 + $0x390] sm:$0xff]  ;;  %v3642_v31 = vld [vmem:[%s6118_s18 + $0x398] sm:$0xff] }
 0x3fa   : > { %3603 = vst [vmem:[%s6563_s27 + $0x5c8] sm:$0xff] %v3602_v23  ;;  %3605 = vst [vmem:[%s6563_s27 + $0x600] sm:$0xff] %v3604_v1  ;;  %v3644_v41 = vld [vmem:[%s6118_s18 + $0x3a0] sm:$0xff]  ;;  %v3646_v9 = vld [vmem:[%s6118_s18 + $0x3a8] sm:$0xff] }
 0x3fb   : > { %3607 = vst [vmem:[%s6563_s27 + $0x608] sm:$0xff] %v3606_v26  ;;  %3609 = vst [vmem:[%s6563_s27 + $0x610] sm:$0xff] %v3608_v13  ;;  %v3648_v46 = vld [vmem:[%s6118_s18 + $0x3b0] sm:$0xff]  ;;  %v3650_v62 = vld [vmem:[%s6118_s18 + $0x3b8] sm:$0xff] }
 0x3fc   : > { %3611 = vst [vmem:[%s6563_s27 + $0x618] sm:$0xff] %v3610_v29  ;;  %3613 = vst [vmem:[%s6563_s27 + $0x620] sm:$0xff] %v3612_v12  ;;  %v3652_v59 = vld [vmem:[%s6118_s18 + $0x3c0] sm:$0xff]  ;;  %v3654_v42 = vld [vmem:[%s6118_s18 + $0x3c8] sm:$0xff] }
 0x3fd   : > { %3615 = vst [vmem:[%s6563_s27 + $0x628] sm:$0xff] %v3614_v54  ;;  %3617 = vst [vmem:[%s6563_s27 + $0x660] sm:$0xff] %v3616_v20  ;;  %v3656_v16 = vld [vmem:[%s6118_s18 + $0x3d0] sm:$0xff]  ;;  %v3658_v47 = vld [vmem:[%s6118_s18 + $0x3d8] sm:$0xff] }
 0x3fe   : > { %3619 = vst [vmem:[%s6563_s27 + $0x668] sm:$0xff] %v3618_v21  ;;  %3621 = vst [vmem:[%s6563_s27 + $0x670] sm:$0xff] %v3620_v55  ;;  %v3660_v25 = vld [vmem:[%s6118_s18 + $0x3e0] sm:$0xff]  ;;  %v3662_v2 = vld [vmem:[%s6118_s18 + $0x3e8] sm:$0xff] }
 0x3ff   : > { %3623 = vst [vmem:[%s6563_s27 + $0x678] sm:$0xff] %v3622_v50  ;;  %3625 = vst [vmem:[%s6563_s27 + $0x680] sm:$0xff] %v3624_v0  ;;  %v3664_v18 = vld [vmem:[%s6118_s18 + $0x3f0] sm:$0xff]  ;;  %v3666_v8 = vld [vmem:[%s6118_s18 + $0x3f8] sm:$0xff] }
 0x400   : > { %3627 = vst [vmem:[%s6563_s27 + $0x688] sm:$0xff] %v3626_v35  ;;  %3629 = vst [vmem:[%s6563_s27 + $0x6c0] sm:$0xff] %v3628_v57  ;;  %v3668_v58 = vld [vmem:[%s6118_s18 + $0x400] sm:$0xff]  ;;  %v3670_v37 = vld [vmem:[%s6118_s18 + $0x408] sm:$0xff] }
 0x401   : > { %3631 = vst [vmem:[%s6563_s27 + $0x6c8] sm:$0xff] %v3630_v33  ;;  %3633 = vst [vmem:[%s6563_s27 + $0x6d0] sm:$0xff] %v3632_v40  ;;  %v3672_v5 = vld [vmem:[%s6118_s18 + $0x410] sm:$0xff]  ;;  %v3674_v38 = vld [vmem:[%s6118_s18 + $0x418] sm:$0xff] }
 0x402   : > { %3635 = vst [vmem:[%s6563_s27 + $0x6d8] sm:$0xff] %v3634_v27  ;;  %3637 = vst [vmem:[%s6563_s27 + $0x6e0] sm:$0xff] %v3636_v17  ;;  %v3676_v63 = vld [vmem:[%s6118_s18 + $0x420] sm:$0xff]  ;;  %v3678_v39 = vld [vmem:[%s6118_s18 + $0x428] sm:$0xff] }
 0x403   : > { %3639 = vst [vmem:[%s6563_s27 + $0x6e8] sm:$0xff] %v3638_v28  ;;  %3641 = vst [vmem:[%s6563_s27 + $0x720] sm:$0xff] %v3640_v44  ;;  %v3680_v19 = vld [vmem:[%s6118_s18 + $0x430] sm:$0xff]  ;;  %v3682_v32 = vld [vmem:[%s6118_s18 + $0x438] sm:$0xff] }
 0x404   : > { %3643 = vst [vmem:[%s6563_s27 + $0x728] sm:$0xff] %v3642_v31  ;;  %3645 = vst [vmem:[%s6563_s27 + $0x730] sm:$0xff] %v3644_v41  ;;  %v3684_v30 = vld [vmem:[%s6118_s18 + $0x440] sm:$0xff]  ;;  %v3686_v56 = vld [vmem:[%s6118_s18 + $0x448] sm:$0xff] }
 0x405   : > { %3647 = vst [vmem:[%s6563_s27 + $0x738] sm:$0xff] %v3646_v9  ;;  %3649 = vst [vmem:[%s6563_s27 + $0x740] sm:$0xff] %v3648_v46  ;;  %v3688_v53 = vld [vmem:[%s6118_s18 + $0x450] sm:$0xff]  ;;  %v3690_v52 = vld [vmem:[%s6118_s18 + $0x458] sm:$0xff] }
 0x406   : > { %3651 = vst [vmem:[%s6563_s27 + $0x748] sm:$0xff] %v3650_v62  ;;  %3653 = vst [vmem:[%s6563_s27 + $0x780] sm:$0xff] %v3652_v59  ;;  %v3692_v10 = vld [vmem:[%s6118_s18 + $0x460] sm:$0xff]  ;;  %v3694_v36 = vld [vmem:[%s6118_s18 + $0x468] sm:$0xff] }
 0x407   : > { %3655 = vst [vmem:[%s6563_s27 + $0x788] sm:$0xff] %v3654_v42  ;;  %3657 = vst [vmem:[%s6563_s27 + $0x790] sm:$0xff] %v3656_v16  ;;  %v3696_v34 = vld [vmem:[%s6118_s18 + $0x470] sm:$0xff]  ;;  %v3698_v45 = vld [vmem:[%s6118_s18 + $0x478] sm:$0xff] }
 0x408   : > { %3659 = vst [vmem:[%s6563_s27 + $0x798] sm:$0xff] %v3658_v47  ;;  %3661 = vst [vmem:[%s6563_s27 + $0x7a0] sm:$0xff] %v3660_v25  ;;  %v3700_v51 = vld [vmem:[%s6118_s18 + $0x480] sm:$0xff]  ;;  %v3702_v48 = vld [vmem:[%s6118_s18 + $0x488] sm:$0xff] }
 0x409   : > { %3663 = vst [vmem:[%s6563_s27 + $0x7a8] sm:$0xff] %v3662_v2  ;;  %3665 = vst [vmem:[%s6563_s27 + $0x7e0] sm:$0xff] %v3664_v18  ;;  %v3704_v3 = vld [vmem:[%s6118_s18 + $0x490] sm:$0xff]  ;;  %v3706_v49 = vld [vmem:[%s6118_s18 + $0x498] sm:$0xff] }
 0x40a   : > { %3667 = vst [vmem:[%s6563_s27 + $0x7e8] sm:$0xff] %v3666_v8  ;;  %3669 = vst [vmem:[%s6563_s27 + $0x7f0] sm:$0xff] %v3668_v58  ;;  %v3708_v15 = vld [vmem:[%s6118_s18 + $0x4a0] sm:$0xff]  ;;  %v3710_v24 = vld [vmem:[%s6118_s18 + $0x4a8] sm:$0xff] }
 0x40b   : > { %3671 = vst [vmem:[%s6563_s27 + $0x7f8] sm:$0xff] %v3670_v37  ;;  %3673 = vst [vmem:[%s6563_s27 + $0x800] sm:$0xff] %v3672_v5 }
 0x40c   : > { %3675 = vst [vmem:[%s6563_s27 + $0x808] sm:$0xff] %v3674_v38  ;;  %3677 = vst [vmem:[%s6563_s27 + $0x840] sm:$0xff] %v3676_v63 }
 0x40d   : > { %3679 = vst [vmem:[%s6563_s27 + $0x848] sm:$0xff] %v3678_v39  ;;  %3681 = vst [vmem:[%s6563_s27 + $0x850] sm:$0xff] %v3680_v19 }
 0x40e   : > { %3683 = vst [vmem:[%s6563_s27 + $0x858] sm:$0xff] %v3682_v32  ;;  %3685 = vst [vmem:[%s6563_s27 + $0x860] sm:$0xff] %v3684_v30 }
 0x40f   : > { %3687 = vst [vmem:[%s6563_s27 + $0x868] sm:$0xff] %v3686_v56  ;;  %3689 = vst [vmem:[%s6563_s27 + $0x8a0] sm:$0xff] %v3688_v53 }
 0x410   : > { %3691 = vst [vmem:[%s6563_s27 + $0x8a8] sm:$0xff] %v3690_v52  ;;  %3693 = vst [vmem:[%s6563_s27 + $0x8b0] sm:$0xff] %v3692_v10 }
 0x411   : > { %3695 = vst [vmem:[%s6563_s27 + $0x8b8] sm:$0xff] %v3694_v36  ;;  %3697 = vst [vmem:[%s6563_s27 + $0x8c0] sm:$0xff] %v3696_v34 }
 0x412   : > { %3699 = vst [vmem:[%s6563_s27 + $0x8c8] sm:$0xff] %v3698_v45  ;;  %3701 = vst [vmem:[%s6563_s27 + $0x900] sm:$0xff] %v3700_v51 }
 0x413   : > { %3703 = vst [vmem:[%s6563_s27 + $0x908] sm:$0xff] %v3702_v48  ;;  %3705 = vst [vmem:[%s6563_s27 + $0x910] sm:$0xff] %v3704_v3 }
 0x414   : > { %3707 = vst [vmem:[%s6563_s27 + $0x918] sm:$0xff] %v3706_v49  ;;  %3709 = vst [vmem:[%s6563_s27 + $0x920] sm:$0xff] %v3708_v15 }
 0x415   : > { %3711 = vst [vmem:[%s6563_s27 + $0x928] sm:$0xff] %v3710_v24 }
 0x416 PF: > { %p12_p11 = scmp.ge.s32.totalorder %s4320_s22, 4   ;;  %s7145_s18 = smov %s4264_s19 }
 0x417   : > { %s7146_s19 = smov %s4330_s25  ;;  %s7147_s20 = smov %s4320_s22 }
 0x418   :  { %14 = sbr.rel (!%p12_p11) target bundleno = 2 (0x2), region = 124 }

</bundles_post_ra>
